<compile_context>
chip_gen: v6e
topology: v6e:2x2x1
jax: 0.10.0
libtpu: 0.0.40
codegen_flags: <defaults>
</compile_context>

<pallas_src>
import functools

import numpy as np
import jax
import jax.numpy as jnp
from jax.experimental import pallas as pl
from jax.experimental.pallas import tpu as pltpu


# ----------------------------- Pallas kernel --------------------------------
def _crosshl_kernel(x_ref, x2_ref, wq_ref, wk_ref, wv_ref, wp_ref, bp_ref,
                    mq_ref, blk_ref, vmask_ref, o_ref, m_scr,
                    *, num_heads, head_dim, patches):
    # x_ref    : (BB, N, C)        x for BB batch elements (N = patches+1, C = dim)
    # x2_ref   : (BB, 1, HD*P)     x2 tiled HD times along features
    # wq_ref   : (HD*P, NH*NH)     Wq re-laid out (rows pair with tiled x2), scale folded in
    # wk_ref   : (C, dim)          Wk.weight.T
    # wv_ref   : (dim, N)          Wv.weight (as-is)
    # wp_ref   : (NH*dim, dim)     linear_projection.weight.T (full)
    # bp_ref   : (1, dim)          linear_projection.bias
    # mq_ref   : (NH*HD, HD*P)     constant selector mask for the query expansion
    # blk_ref  : (NH*HD, NH*NH)    constant block-diagonal ones (8-lane head groups)
    # vmask_ref: (NH*HD, NH*dim)   constant block-diagonal ones for the V expansion
    # o_ref    : (N, BB*dim)       lane-dense output block (batch packed on lanes)
    # m_scr    : (BB*NH*N, C)      per-head attention outputs, flat (b, h, i) row order
    NH, HD, P = num_heads, head_dim, patches
    BB, N, C = x_ref.shape

    # Grid-invariant parameters / constants (constant index_map => single VMEM copy).
    wqblk = wq_ref[...]
    wkT = wk_ref[...]
    wv = wv_ref[...]
    wpT = wp_ref[...]
    bias = bp_ref[...]
    maskq = mq_ref[...]
    blk8 = blk_ref[...]
    vmask = vmask_ref[...]

    ys = []
    for bi in range(BB):                    # static unroll: independent chains -> ILP
        x = x_ref[bi]                        # (N, C)
        x2r = x2_ref[bi]                     # (1, HD*P)

        # K and V^T: two full-width MXU matmuls.
        k = jnp.dot(x, wkT, preferred_element_type=jnp.float32)        # (N, dim)
        vT = jnp.dot(wv, x, preferred_element_type=jnp.float32)        # (dim, C)

        # Block-diagonal query  qbd[h*HD+dd, h*NH+j] = scale * q[h, j, dd]
        # via one 128-deep matmul + two constant masks (no iota/where per step).
        x2blk = x2r * maskq                                             # (64, 128)
        qbd = jnp.dot(x2blk, wqblk,
                      preferred_element_type=jnp.float32) * blk8        # (64, 64)

        # Attention logits for ALL heads at once (scale already folded into wqblk).
        logits = jnp.dot(k, qbd, preferred_element_type=jnp.float32)    # (N, NH*NH)

        # Full-width softmax over 8-lane head groups. Per-head maxes stay exact
        # (a row-global max could underflow an entire head's exponentials -> 0/0);
        # exp / group-sum / normalize run once on the whole tile, group sums via
        # one matmul against the block-diagonal ones matrix.
        parts = []
        for h in range(NH):
            lg = logits[:, h * NH:(h + 1) * NH]                         # (N, NH)
            parts.append(lg - jnp.max(lg, axis=-1, keepdims=True))
        centered = jnp.concatenate(parts, axis=-1)                      # (N, NH*NH)
        e = jnp.exp(centered)                                           # one EUP op
        denom = jnp.dot(e, blk8, preferred_element_type=jnp.float32)    # group sums (bcast)
        p = e * pl.reciprocal(denom, approx=True)                       # (N, NH*NH)

        # All heads' A@V in ONE matmul against a block-diagonal V:
        #   vblk[h*HD+j, h*C+c] = vT[h*HD+j, c]
        vblk = jnp.concatenate([vT] * NH, axis=-1) * vmask              # (dim, NH*C)
        av = jnp.dot(p, vblk, preferred_element_type=jnp.float32)       # (N, NH*C)
        # av[:, h*C:(h+1)*C] == M[h, :, :] (per-head attention output)

        # torch's x.reshape(B, N, -1) scramble:
        #   resh[r, s*C + c] == M_flat[r*NH + s, c]   with M_flat row f = h*N + i.
        # Write head-major into the scratch, read back with stride-NH row slices,
        # then ONE fused (N, NH*C) @ (NH*C, dim) projection matmul (+ bias).
        base = bi * NH * N
        for h in range(NH):
            m_scr[base + h * N: base + (h + 1) * N, :] = av[:, h * C:(h + 1) * C]
        g = jnp.concatenate(
            [m_scr[pl.ds(base + s, N, stride=NH), :] for s in range(NH)],
            axis=-1)                                                    # (N, NH*C)
        y = jnp.dot(g, wpT, preferred_element_type=jnp.float32) + bias  # (N, dim)
        ys.append(y)

    # Lane-dense store: with BB > 1 the batch is packed along lanes (full 128-lane
    # vst); the wrapper unpacks back to (B, N, dim).
    out = ys[0] if BB == 1 else jnp.concatenate(ys, axis=-1)            # (N, BB*dim)
    o_ref[...] = out.astype(o_ref.dtype)


# ------------------------------- wrapper -------------------------------------
def _default_batch_block(batch):
    """Batch elements per grid step.

    Multi-TensorCore chips (v4/v5p/v7x): 1 per step so the "parallel" batch axis
    spreads across cores. Single-core chips (v5e/v6e): fold the (small) batch into
    one grid step -- a serial grid only adds ~0.35us/step of overhead there."""
    try:
        kind = jax.devices()[0].device_kind.lower()
    except Exception:
        kind = ""
    if ("v7" in kind) or ("7x" in kind) or ("v4" in kind) or ("v5p" in kind):
        return 1
    bb = min(batch, 8)
    while batch % bb:
        bb -= 1
    return bb


def crosshl_attention(x, x2, wq_w, wk_w, wv_w, wp_w, bp, num_heads,
                      qk_scale=None, batch_block=None):
    """x: (B, N, C) with C == dim, N == patches+1;  x2: (B, 1, patches).
    Weights use PyTorch nn.Linear layout (out_features, in_features)."""
    B, N, C = x.shape
    dim = C
    NH = num_heads
    HD = dim // NH
    P = x2.shape[-1]
    assert HD == NH, "CrossHL_attention requires dim == num_heads**2"
    assert N == P + 1, "CrossHL_attention requires N == patches + 1"
    scale = qk_scale if qk_scale is not None else float(HD) ** -0.5

    bb = batch_block if batch_block is not None else _default_batch_block(B)
    assert B % bb == 0
    G = B // bb

    # ---- tiny wrapper-side re-layouts: weights and constants only ------------
    w4 = wq_w.reshape(NH, NH, HD, P)                                    # [h, j, dd, p]
    wqblk = jnp.transpose(w4, (2, 3, 0, 1)).reshape(HD * P, NH * NH) * scale
    wkT = wk_w.T                                                        # (C, dim)
    wpT = wp_w.T                                                        # (NH*dim, dim)
    bp2 = bp.reshape(1, dim)

    # Constant selector / block-diagonal-ones masks, built once host-side.
    r = np.arange(NH * HD)[:, None]
    maskq = jnp.asarray(np.arange(HD * P)[None, :] // P == r % HD, jnp.float32)
    blk8 = jnp.asarray(np.arange(NH * NH)[None, :] // NH == r // HD, jnp.float32)
    vmask = jnp.asarray(np.arange(NH * dim)[None, :] // dim == r // HD, jnp.float32)

    # x2 tiled HD times along features (B*HD*P floats: negligible).
    x2_rep = jnp.tile(x2.reshape(B, 1, P), (1, 1, HD))                  # (B, 1, HD*P)

    kernel = functools.partial(_crosshl_kernel, num_heads=NH, head_dim=HD,
                               patches=P)

    out = pl.pallas_call(
        kernel,
        out_shape=jax.ShapeDtypeStruct((G, N, bb * dim), x.dtype),
        grid_spec=pltpu.PrefetchScalarGridSpec(
            num_scalar_prefetch=0,
            grid=(G,),
            in_specs=[
                pl.BlockSpec((bb, N, C), lambda g: (g, 0, 0)),          # x
                pl.BlockSpec((bb, 1, HD * P), lambda g: (g, 0, 0)),     # x2 (tiled)
                pl.BlockSpec((HD * P, NH * NH), lambda g: (0, 0)),      # Wq (re-laid, scaled)
                pl.BlockSpec((C, dim), lambda g: (0, 0)),               # Wk^T
                pl.BlockSpec((dim, N), lambda g: (0, 0)),               # Wv
                pl.BlockSpec((NH * dim, dim), lambda g: (0, 0)),        # Wproj^T (full)
                pl.BlockSpec((1, dim), lambda g: (0, 0)),               # proj bias
                pl.BlockSpec((NH * HD, HD * P), lambda g: (0, 0)),      # maskq (const)
                pl.BlockSpec((NH * HD, NH * NH), lambda g: (0, 0)),     # blk8  (const)
                pl.BlockSpec((NH * HD, NH * dim), lambda g: (0, 0)),    # vmask (const)
            ],
            out_specs=pl.BlockSpec((None, N, bb * dim), lambda g: (g, 0, 0)),
            scratch_shapes=[pltpu.VMEM((bb * NH * N, C), jnp.float32)],
        ),
        compiler_params=pltpu.CompilerParams(
            dimension_semantics=("parallel",)),
    )(x, x2_rep, wqblk, wkT, wv_w, wpT, bp2, maskq, blk8, vmask)

    # Unpack the lane-dense (N, bb*dim) blocks back to (B, N, dim).
    return out.reshape(G, N, bb, dim).transpose(0, 2, 1, 3).reshape(B, N, dim)


# ------------------------------ pure-JAX reference ----------------------------
def crosshl_reference(x, x2, wq_w, wk_w, wv_w, wp_w, bp, num_heads, qk_scale=None):
    B, N, C = x.shape
    dim = C
    HD = dim // num_heads
    scale = qk_scale if qk_scale is not None else HD ** -0.5
    hi = jax.lax.Precision.HIGHEST
    q = jnp.einsum('bsp,op->bso', x2, wq_w, precision=hi)
    q = q.reshape(B, num_heads, num_heads, HD)
    k = jnp.einsum('bnc,oc->bno', x, wk_w, precision=hi)
    k = k.reshape(B, N, num_heads, HD).transpose(0, 2, 1, 3)
    v = jnp.einsum('bcn,on->bco', jnp.transpose(x, (0, 2, 1)), wv_w, precision=hi)
    v = v.reshape(B, C, num_heads, HD).transpose(0, 2, 3, 1)
    att = jnp.einsum('bhid,bhjd->bhij', k, q, precision=hi) * scale
    att = jax.nn.softmax(att, axis=-1)
    o = jnp.einsum('bhij,bhjd->bhid', att, v, precision=hi)
    o = o.reshape(B, N, num_heads * C)          # same row-major scramble as torch
    y = jnp.einsum('bnm,om->bno', o, wp_w, precision=hi) + bp
    return y                                     # dropout = identity (inference)


# --------------------------------- main ---------------------------------------
if __name__ == "__main__":
    # CrossHL_attention(dim=64, patches=16, num_heads=8) -> head_dim = 8 = num_heads,
    # x: (B, patches+1, dim), x2: (B, 1, patches).
    NH = 8
    DIM = NH * NH            # 64
    P = 16                   # patches
    N = P + 1                # 17
    B = 2

    key = jax.random.PRNGKey(0)
    ks = jax.random.split(key, 7)
    x = jax.random.normal(ks[0], (B, N, DIM), jnp.float32)
    x2 = jax.random.normal(ks[1], (B, 1, P), jnp.float32)

    sc = 0.08
    wq = sc * jax.random.normal(ks[2], (DIM * NH, P), jnp.float32)      # Wq.weight
    wk = sc * jax.random.normal(ks[3], (DIM, DIM), jnp.float32)         # Wk.weight
    wv = sc * jax.random.normal(ks[4], (DIM, P + 1), jnp.float32)       # Wv.weight
    wp = sc * jax.random.normal(ks[5], (DIM, DIM * NH), jnp.float32)    # proj.weight
    bp = sc * jax.random.normal(ks[6], (DIM,), jnp.float32)             # proj.bias

    out = crosshl_attention(x, x2, wq, wk, wv, wp, bp, NH)
    out = jax.block_until_ready(out)

    ref = crosshl_reference(x, x2, wq, wk, wv, wp, bp, NH)
    # approx reciprocal in the in-kernel softmax => slightly looser tolerance.
    np.testing.assert_allclose(np.asarray(out), np.asarray(ref),
                               rtol=2e-3, atol=2e-3)
    print("KERNEL_OK")
</pallas_src>

<mosaic_0001>
module attributes {stable_mosaic.version = 11 : i64} {
  func.func @_crosshl_kernel(%arg0: i32, %arg1: memref<2x17x64xf32, #tpu.memory_space<vmem>>, %arg2: memref<2x1x128xf32, #tpu.memory_space<vmem>>, %arg3: memref<128x64xf32, #tpu.memory_space<vmem>>, %arg4: memref<64x64xf32, #tpu.memory_space<vmem>>, %arg5: memref<64x17xf32, #tpu.memory_space<vmem>>, %arg6: memref<512x64xf32, #tpu.memory_space<vmem>>, %arg7: memref<1x64xf32, #tpu.memory_space<vmem>>, %arg8: memref<64x128xf32, #tpu.memory_space<vmem>>, %arg9: memref<64x64xf32, #tpu.memory_space<vmem>>, %arg10: memref<64x512xf32, #tpu.memory_space<vmem>>, %arg11: memref<1x17x128xf32, #tpu.memory_space<vmem>>, %arg12: memref<272x64xf32, #tpu.memory_space<vmem>>) attributes {dimension_semantics = [#tpu.dimension_semantics<parallel>], iteration_bounds = array<i64: 1>, scalar_prefetch = 0 : i64, scratch_operands = 1 : i64, tpu.core_type = #tpu.core_type<tc>, window_params = [{transform_indices = @transform_0, window_bounds = array<i64: 2, 17, 64>}, {transform_indices = @transform_1, window_bounds = array<i64: 2, 1, 128>}, {pipeline_mode = #tpu.pipeline_mode<synchronous>, transform_indices = @transform_2, window_bounds = array<i64: 128, 64>}, {pipeline_mode = #tpu.pipeline_mode<synchronous>, transform_indices = @transform_3, window_bounds = array<i64: 64, 64>}, {pipeline_mode = #tpu.pipeline_mode<synchronous>, transform_indices = @transform_4, window_bounds = array<i64: 64, 17>}, {pipeline_mode = #tpu.pipeline_mode<synchronous>, transform_indices = @transform_5, window_bounds = array<i64: 512, 64>}, {pipeline_mode = #tpu.pipeline_mode<synchronous>, transform_indices = @transform_6, window_bounds = array<i64: 1, 64>}, {pipeline_mode = #tpu.pipeline_mode<synchronous>, transform_indices = @transform_7, window_bounds = array<i64: 64, 128>}, {pipeline_mode = #tpu.pipeline_mode<synchronous>, transform_indices = @transform_8, window_bounds = array<i64: 64, 64>}, {pipeline_mode = #tpu.pipeline_mode<synchronous>, transform_indices = @transform_9, window_bounds = array<i64: 64, 512>}, {transform_indices = @transform_10, window_bounds = array<i64: 1, 17, 128>}]} {
    %c0 = arith.constant 0 : index
    %c0_0 = arith.constant 0 : index
    %0 = vector.load %arg3[%c0, %c0_0] : memref<128x64xf32, #tpu.memory_space<vmem>>, vector<128x64xf32>
    %c0_1 = arith.constant 0 : index
    %c0_2 = arith.constant 0 : index
    %1 = vector.load %arg4[%c0_1, %c0_2] : memref<64x64xf32, #tpu.memory_space<vmem>>, vector<64x64xf32>
    %c0_3 = arith.constant 0 : index
    %c0_4 = arith.constant 0 : index
    %2 = vector.load %arg5[%c0_3, %c0_4] : memref<64x17xf32, #tpu.memory_space<vmem>>, vector<64x17xf32>
    %c0_5 = arith.constant 0 : index
    %c0_6 = arith.constant 0 : index
    %3 = vector.load %arg6[%c0_5, %c0_6] : memref<512x64xf32, #tpu.memory_space<vmem>>, vector<512x64xf32>
    %c0_7 = arith.constant 0 : index
    %c0_8 = arith.constant 0 : index
    %4 = vector.load %arg7[%c0_7, %c0_8] : memref<1x64xf32, #tpu.memory_space<vmem>>, vector<1x64xf32>
    %c0_9 = arith.constant 0 : index
    %c0_10 = arith.constant 0 : index
    %5 = vector.load %arg8[%c0_9, %c0_10] : memref<64x128xf32, #tpu.memory_space<vmem>>, vector<64x128xf32>
    %c0_11 = arith.constant 0 : index
    %c0_12 = arith.constant 0 : index
    %6 = vector.load %arg9[%c0_11, %c0_12] : memref<64x64xf32, #tpu.memory_space<vmem>>, vector<64x64xf32>
    %c0_13 = arith.constant 0 : index
    %c0_14 = arith.constant 0 : index
    %7 = vector.load %arg10[%c0_13, %c0_14] : memref<64x512xf32, #tpu.memory_space<vmem>>, vector<64x512xf32>
    %c0_15 = arith.constant 0 : index
    %c0_16 = arith.constant 0 : index
    %c0_17 = arith.constant 0 : index
    %8 = vector.load %arg1[%c0_15, %c0_16, %c0_17] : memref<2x17x64xf32, #tpu.memory_space<vmem>>, vector<1x17x64xf32>
    %9 = vector.shape_cast %8 : vector<1x17x64xf32> to vector<17x64xf32>
    %c0_18 = arith.constant 0 : index
    %c0_19 = arith.constant 0 : index
    %c0_20 = arith.constant 0 : index
    %10 = vector.load %arg2[%c0_18, %c0_19, %c0_20] : memref<2x1x128xf32, #tpu.memory_space<vmem>>, vector<1x1x128xf32>
    %11 = vector.shape_cast %10 : vector<1x1x128xf32> to vector<1x128xf32>
    %cst = arith.constant dense<0.000000e+00> : vector<17x64xf32>
    %12 = tpu.matmul %9, %1, %cst {dimension_numbers = #tpu.dot_dimension_numbers<[1], [0], [0], [1], [0, 0, 1, 1], [], []>} : vector<17x64xf32>, vector<64x64xf32>, vector<17x64xf32> -> vector<17x64xf32>
    %cst_21 = arith.constant dense<0.000000e+00> : vector<64x64xf32>
    %13 = tpu.matmul %2, %9, %cst_21 {dimension_numbers = #tpu.dot_dimension_numbers<[1], [0], [0], [1], [0, 0, 1, 1], [], []>} : vector<64x17xf32>, vector<17x64xf32>, vector<64x64xf32> -> vector<64x64xf32>
    %14 = vector.broadcast %11 : vector<1x128xf32> to vector<64x128xf32>
    %15 = arith.mulf %14, %5 : vector<64x128xf32>
    %cst_22 = arith.constant dense<0.000000e+00> : vector<64x64xf32>
    %16 = tpu.matmul %15, %0, %cst_22 {dimension_numbers = #tpu.dot_dimension_numbers<[1], [0], [0], [1], [0, 0, 1, 1], [], []>} : vector<64x128xf32>, vector<128x64xf32>, vector<64x64xf32> -> vector<64x64xf32>
    %17 = arith.mulf %16, %6 : vector<64x64xf32>
    %cst_23 = arith.constant dense<0.000000e+00> : vector<17x64xf32>
    %18 = tpu.matmul %12, %17, %cst_23 {dimension_numbers = #tpu.dot_dimension_numbers<[1], [0], [0], [1], [0, 0, 1, 1], [], []>} : vector<17x64xf32>, vector<64x64xf32>, vector<17x64xf32> -> vector<17x64xf32>
    %19 = vector.extract_strided_slice %18 {offsets = [0, 0], sizes = [17, 8], strides = [1, 1]} : vector<17x64xf32> to vector<17x8xf32>
    %cst_24 = arith.constant dense<0xFF800000> : vector<17xf32>
    %20 = vector.multi_reduction <maximumf>, %19, %cst_24 [1] : vector<17x8xf32> to vector<17xf32>
    %21 = vector.shape_cast %20 : vector<17xf32> to vector<17x1xf32>
    %22 = vector.broadcast %21 : vector<17x1xf32> to vector<17x8xf32>
    %23 = arith.subf %19, %22 : vector<17x8xf32>
    %24 = vector.extract_strided_slice %18 {offsets = [0, 8], sizes = [17, 8], strides = [1, 1]} : vector<17x64xf32> to vector<17x8xf32>
    %cst_25 = arith.constant dense<0xFF800000> : vector<17xf32>
    %25 = vector.multi_reduction <maximumf>, %24, %cst_25 [1] : vector<17x8xf32> to vector<17xf32>
    %26 = vector.shape_cast %25 : vector<17xf32> to vector<17x1xf32>
    %27 = vector.broadcast %26 : vector<17x1xf32> to vector<17x8xf32>
    %28 = arith.subf %24, %27 : vector<17x8xf32>
    %29 = vector.extract_strided_slice %18 {offsets = [0, 16], sizes = [17, 8], strides = [1, 1]} : vector<17x64xf32> to vector<17x8xf32>
    %cst_26 = arith.constant dense<0xFF800000> : vector<17xf32>
    %30 = vector.multi_reduction <maximumf>, %29, %cst_26 [1] : vector<17x8xf32> to vector<17xf32>
    %31 = vector.shape_cast %30 : vector<17xf32> to vector<17x1xf32>
    %32 = vector.broadcast %31 : vector<17x1xf32> to vector<17x8xf32>
    %33 = arith.subf %29, %32 : vector<17x8xf32>
    %34 = vector.extract_strided_slice %18 {offsets = [0, 24], sizes = [17, 8], strides = [1, 1]} : vector<17x64xf32> to vector<17x8xf32>
    %cst_27 = arith.constant dense<0xFF800000> : vector<17xf32>
    %35 = vector.multi_reduction <maximumf>, %34, %cst_27 [1] : vector<17x8xf32> to vector<17xf32>
    %36 = vector.shape_cast %35 : vector<17xf32> to vector<17x1xf32>
    %37 = vector.broadcast %36 : vector<17x1xf32> to vector<17x8xf32>
    %38 = arith.subf %34, %37 : vector<17x8xf32>
    %39 = vector.extract_strided_slice %18 {offsets = [0, 32], sizes = [17, 8], strides = [1, 1]} : vector<17x64xf32> to vector<17x8xf32>
    %cst_28 = arith.constant dense<0xFF800000> : vector<17xf32>
    %40 = vector.multi_reduction <maximumf>, %39, %cst_28 [1] : vector<17x8xf32> to vector<17xf32>
    %41 = vector.shape_cast %40 : vector<17xf32> to vector<17x1xf32>
    %42 = vector.broadcast %41 : vector<17x1xf32> to vector<17x8xf32>
    %43 = arith.subf %39, %42 : vector<17x8xf32>
    %44 = vector.extract_strided_slice %18 {offsets = [0, 40], sizes = [17, 8], strides = [1, 1]} : vector<17x64xf32> to vector<17x8xf32>
    %cst_29 = arith.constant dense<0xFF800000> : vector<17xf32>
    %45 = vector.multi_reduction <maximumf>, %44, %cst_29 [1] : vector<17x8xf32> to vector<17xf32>
    %46 = vector.shape_cast %45 : vector<17xf32> to vector<17x1xf32>
    %47 = vector.broadcast %46 : vector<17x1xf32> to vector<17x8xf32>
    %48 = arith.subf %44, %47 : vector<17x8xf32>
    %49 = vector.extract_strided_slice %18 {offsets = [0, 48], sizes = [17, 8], strides = [1, 1]} : vector<17x64xf32> to vector<17x8xf32>
    %cst_30 = arith.constant dense<0xFF800000> : vector<17xf32>
    %50 = vector.multi_reduction <maximumf>, %49, %cst_30 [1] : vector<17x8xf32> to vector<17xf32>
    %51 = vector.shape_cast %50 : vector<17xf32> to vector<17x1xf32>
    %52 = vector.broadcast %51 : vector<17x1xf32> to vector<17x8xf32>
    %53 = arith.subf %49, %52 : vector<17x8xf32>
    %54 = vector.extract_strided_slice %18 {offsets = [0, 56], sizes = [17, 8], strides = [1, 1]} : vector<17x64xf32> to vector<17x8xf32>
    %cst_31 = arith.constant dense<0xFF800000> : vector<17xf32>
    %55 = vector.multi_reduction <maximumf>, %54, %cst_31 [1] : vector<17x8xf32> to vector<17xf32>
    %56 = vector.shape_cast %55 : vector<17xf32> to vector<17x1xf32>
    %57 = vector.broadcast %56 : vector<17x1xf32> to vector<17x8xf32>
    %58 = arith.subf %54, %57 : vector<17x8xf32>
    %59 = tpu.concatenate %23, %28, %33, %38, %43, %48, %53, %58 in 1 : vector<17x8xf32>, vector<17x8xf32>, vector<17x8xf32>, vector<17x8xf32>, vector<17x8xf32>, vector<17x8xf32>, vector<17x8xf32>, vector<17x8xf32> -> vector<17x64xf32>
    %60 = math.exp %59 : vector<17x64xf32>
    %cst_32 = arith.constant dense<0.000000e+00> : vector<17x64xf32>
    %61 = tpu.matmul %60, %6, %cst_32 {dimension_numbers = #tpu.dot_dimension_numbers<[1], [0], [0], [1], [0, 0, 1, 1], [], []>} : vector<17x64xf32>, vector<64x64xf32>, vector<17x64xf32> -> vector<17x64xf32>
    %62 = tpu.reciprocal %61 {approx = true} : vector<17x64xf32> -> vector<17x64xf32>
    %63 = arith.mulf %60, %62 : vector<17x64xf32>
    %64 = tpu.concatenate %13, %13, %13, %13, %13, %13, %13, %13 in 1 : vector<64x64xf32>, vector<64x64xf32>, vector<64x64xf32>, vector<64x64xf32>, vector<64x64xf32>, vector<64x64xf32>, vector<64x64xf32>, vector<64x64xf32> -> vector<64x512xf32>
    %65 = arith.mulf %64, %7 : vector<64x512xf32>
    %cst_33 = arith.constant dense<0.000000e+00> : vector<17x512xf32>
    %66 = tpu.matmul %63, %65, %cst_33 {dimension_numbers = #tpu.dot_dimension_numbers<[1], [0], [0], [1], [0, 0, 1, 1], [], []>} : vector<17x64xf32>, vector<64x512xf32>, vector<17x512xf32> -> vector<17x512xf32>
    %67 = vector.extract_strided_slice %66 {offsets = [0, 0], sizes = [17, 64], strides = [1, 1]} : vector<17x512xf32> to vector<17x64xf32>
    %c0_34 = arith.constant 0 : index
    %c0_35 = arith.constant 0 : index
    %68 = vector.load %arg12[%c0_34, %c0_35] : memref<272x64xf32, #tpu.memory_space<vmem>>, vector<17x64xf32>
    tpu.vector_store %arg12[%c0_34, %c0_35], %67 {strides = array<i32>} : memref<272x64xf32, #tpu.memory_space<vmem>>, vector<17x64xf32>,
    %69 = vector.extract_strided_slice %66 {offsets = [0, 64], sizes = [17, 64], strides = [1, 1]} : vector<17x512xf32> to vector<17x64xf32>
    %c17 = arith.constant 17 : index
    %c0_36 = arith.constant 0 : index
    %70 = vector.load %arg12[%c17, %c0_36] : memref<272x64xf32, #tpu.memory_space<vmem>>, vector<17x64xf32>
    tpu.vector_store %arg12[%c17, %c0_36], %69 {strides = array<i32>} : memref<272x64xf32, #tpu.memory_space<vmem>>, vector<17x64xf32>,
    %71 = vector.extract_strided_slice %66 {offsets = [0, 128], sizes = [17, 64], strides = [1, 1]} : vector<17x512xf32> to vector<17x64xf32>
    %c34 = arith.constant 34 : index
    %c0_37 = arith.constant 0 : index
    %72 = vector.load %arg12[%c34, %c0_37] : memref<272x64xf32, #tpu.memory_space<vmem>>, vector<17x64xf32>
    tpu.vector_store %arg12[%c34, %c0_37], %71 {strides = array<i32>} : memref<272x64xf32, #tpu.memory_space<vmem>>, vector<17x64xf32>,
    %73 = vector.extract_strided_slice %66 {offsets = [0, 192], sizes = [17, 64], strides = [1, 1]} : vector<17x512xf32> to vector<17x64xf32>
    %c51 = arith.constant 51 : index
    %c0_38 = arith.constant 0 : index
    %74 = vector.load %arg12[%c51, %c0_38] : memref<272x64xf32, #tpu.memory_space<vmem>>, vector<17x64xf32>
    tpu.vector_store %arg12[%c51, %c0_38], %73 {strides = array<i32>} : memref<272x64xf32, #tpu.memory_space<vmem>>, vector<17x64xf32>,
    %75 = vector.extract_strided_slice %66 {offsets = [0, 256], sizes = [17, 64], strides = [1, 1]} : vector<17x512xf32> to vector<17x64xf32>
    %c68 = arith.constant 68 : index
    %c0_39 = arith.constant 0 : index
    %76 = vector.load %arg12[%c68, %c0_39] : memref<272x64xf32, #tpu.memory_space<vmem>>, vector<17x64xf32>
    tpu.vector_store %arg12[%c68, %c0_39], %75 {strides = array<i32>} : memref<272x64xf32, #tpu.memory_space<vmem>>, vector<17x64xf32>,
    %77 = vector.extract_strided_slice %66 {offsets = [0, 320], sizes = [17, 64], strides = [1, 1]} : vector<17x512xf32> to vector<17x64xf32>
    %c85 = arith.constant 85 : index
    %c0_40 = arith.constant 0 : index
    %78 = vector.load %arg12[%c85, %c0_40] : memref<272x64xf32, #tpu.memory_space<vmem>>, vector<17x64xf32>
    tpu.vector_store %arg12[%c85, %c0_40], %77 {strides = array<i32>} : memref<272x64xf32, #tpu.memory_space<vmem>>, vector<17x64xf32>,
    %79 = vector.extract_strided_slice %66 {offsets = [0, 384], sizes = [17, 64], strides = [1, 1]} : vector<17x512xf32> to vector<17x64xf32>
    %c102 = arith.constant 102 : index
    %c0_41 = arith.constant 0 : index
    %80 = vector.load %arg12[%c102, %c0_41] : memref<272x64xf32, #tpu.memory_space<vmem>>, vector<17x64xf32>
    tpu.vector_store %arg12[%c102, %c0_41], %79 {strides = array<i32>} : memref<272x64xf32, #tpu.memory_space<vmem>>, vector<17x64xf32>,
    %81 = vector.extract_strided_slice %66 {offsets = [0, 448], sizes = [17, 64], strides = [1, 1]} : vector<17x512xf32> to vector<17x64xf32>
    %c119 = arith.constant 119 : index
    %c0_42 = arith.constant 0 : index
    %82 = vector.load %arg12[%c119, %c0_42] : memref<272x64xf32, #tpu.memory_space<vmem>>, vector<17x64xf32>
    tpu.vector_store %arg12[%c119, %c0_42], %81 {strides = array<i32>} : memref<272x64xf32, #tpu.memory_space<vmem>>, vector<17x64xf32>,
    %c0_43 = arith.constant 0 : index
    %c0_44 = arith.constant 0 : index
    %83 = tpu.strided_load %arg12[%c0_43, %c0_44] {strides = array<i32: 8, 1>} : memref<272x64xf32, #tpu.memory_space<vmem>>, vector<17x64xf32>
    %c1 = arith.constant 1 : index
    %c0_45 = arith.constant 0 : index
    %84 = tpu.strided_load %arg12[%c1, %c0_45] {strides = array<i32: 8, 1>} : memref<272x64xf32, #tpu.memory_space<vmem>>, vector<17x64xf32>
    %c2 = arith.constant 2 : index
    %c0_46 = arith.constant 0 : index
    %85 = tpu.strided_load %arg12[%c2, %c0_46] {strides = array<i32: 8, 1>} : memref<272x64xf32, #tpu.memory_space<vmem>>, vector<17x64xf32>
    %c3 = arith.constant 3 : index
    %c0_47 = arith.constant 0 : index
    %86 = tpu.strided_load %arg12[%c3, %c0_47] {strides = array<i32: 8, 1>} : memref<272x64xf32, #tpu.memory_space<vmem>>, vector<17x64xf32>
    %c4 = arith.constant 4 : index
    %c0_48 = arith.constant 0 : index
    %87 = tpu.strided_load %arg12[%c4, %c0_48] {strides = array<i32: 8, 1>} : memref<272x64xf32, #tpu.memory_space<vmem>>, vector<17x64xf32>
    %c5 = arith.constant 5 : index
    %c0_49 = arith.constant 0 : index
    %88 = tpu.strided_load %arg12[%c5, %c0_49] {strides = array<i32: 8, 1>} : memref<272x64xf32, #tpu.memory_space<vmem>>, vector<17x64xf32>
    %c6 = arith.constant 6 : index
    %c0_50 = arith.constant 0 : index
    %89 = tpu.strided_load %arg12[%c6, %c0_50] {strides = array<i32: 8, 1>} : memref<272x64xf32, #tpu.memory_space<vmem>>, vector<17x64xf32>
    %c7 = arith.constant 7 : index
    %c0_51 = arith.constant 0 : index
    %90 = tpu.strided_load %arg12[%c7, %c0_51] {strides = array<i32: 8, 1>} : memref<272x64xf32, #tpu.memory_space<vmem>>, vector<17x64xf32>
    %91 = tpu.concatenate %83, %84, %85, %86, %87, %88, %89, %90 in 1 : vector<17x64xf32>, vector<17x64xf32>, vector<17x64xf32>, vector<17x64xf32>, vector<17x64xf32>, vector<17x64xf32>, vector<17x64xf32>, vector<17x64xf32> -> vector<17x512xf32>
    %cst_52 = arith.constant dense<0.000000e+00> : vector<17x64xf32>
    %92 = tpu.matmul %91, %3, %cst_52 {dimension_numbers = #tpu.dot_dimension_numbers<[1], [0], [0], [1], [0, 0, 1, 1], [], []>} : vector<17x512xf32>, vector<512x64xf32>, vector<17x64xf32> -> vector<17x64xf32>
    %93 = vector.broadcast %4 : vector<1x64xf32> to vector<17x64xf32>
    %94 = arith.addf %92, %93 : vector<17x64xf32>
    %c1_53 = arith.constant 1 : index
    %c0_54 = arith.constant 0 : index
    %c0_55 = arith.constant 0 : index
    %95 = vector.load %arg1[%c1_53, %c0_54, %c0_55] : memref<2x17x64xf32, #tpu.memory_space<vmem>>, vector<1x17x64xf32>
    %96 = vector.shape_cast %95 : vector<1x17x64xf32> to vector<17x64xf32>
    %c1_56 = arith.constant 1 : index
    %c0_57 = arith.constant 0 : index
    %c0_58 = arith.constant 0 : index
    %97 = vector.load %arg2[%c1_56, %c0_57, %c0_58] : memref<2x1x128xf32, #tpu.memory_space<vmem>>, vector<1x1x128xf32>
    %98 = vector.shape_cast %97 : vector<1x1x128xf32> to vector<1x128xf32>
    %cst_59 = arith.constant dense<0.000000e+00> : vector<17x64xf32>
    %99 = tpu.matmul %96, %1, %cst_59 {dimension_numbers = #tpu.dot_dimension_numbers<[1], [0], [0], [1], [0, 0, 1, 1], [], []>} : vector<17x64xf32>, vector<64x64xf32>, vector<17x64xf32> -> vector<17x64xf32>
    %cst_60 = arith.constant dense<0.000000e+00> : vector<64x64xf32>
    %100 = tpu.matmul %2, %96, %cst_60 {dimension_numbers = #tpu.dot_dimension_numbers<[1], [0], [0], [1], [0, 0, 1, 1], [], []>} : vector<64x17xf32>, vector<17x64xf32>, vector<64x64xf32> -> vector<64x64xf32>
    %101 = vector.broadcast %98 : vector<1x128xf32> to vector<64x128xf32>
    %102 = arith.mulf %101, %5 : vector<64x128xf32>
    %cst_61 = arith.constant dense<0.000000e+00> : vector<64x64xf32>
    %103 = tpu.matmul %102, %0, %cst_61 {dimension_numbers = #tpu.dot_dimension_numbers<[1], [0], [0], [1], [0, 0, 1, 1], [], []>} : vector<64x128xf32>, vector<128x64xf32>, vector<64x64xf32> -> vector<64x64xf32>
    %104 = arith.mulf %103, %6 : vector<64x64xf32>
    %cst_62 = arith.constant dense<0.000000e+00> : vector<17x64xf32>
    %105 = tpu.matmul %99, %104, %cst_62 {dimension_numbers = #tpu.dot_dimension_numbers<[1], [0], [0], [1], [0, 0, 1, 1], [], []>} : vector<17x64xf32>, vector<64x64xf32>, vector<17x64xf32> -> vector<17x64xf32>
    %106 = vector.extract_strided_slice %105 {offsets = [0, 0], sizes = [17, 8], strides = [1, 1]} : vector<17x64xf32> to vector<17x8xf32>
    %cst_63 = arith.constant dense<0xFF800000> : vector<17xf32>
    %107 = vector.multi_reduction <maximumf>, %106, %cst_63 [1] : vector<17x8xf32> to vector<17xf32>
    %108 = vector.shape_cast %107 : vector<17xf32> to vector<17x1xf32>
    %109 = vector.broadcast %108 : vector<17x1xf32> to vector<17x8xf32>
    %110 = arith.subf %106, %109 : vector<17x8xf32>
    %111 = vector.extract_strided_slice %105 {offsets = [0, 8], sizes = [17, 8], strides = [1, 1]} : vector<17x64xf32> to vector<17x8xf32>
    %cst_64 = arith.constant dense<0xFF800000> : vector<17xf32>
    %112 = vector.multi_reduction <maximumf>, %111, %cst_64 [1] : vector<17x8xf32> to vector<17xf32>
    %113 = vector.shape_cast %112 : vector<17xf32> to vector<17x1xf32>
    %114 = vector.broadcast %113 : vector<17x1xf32> to vector<17x8xf32>
    %115 = arith.subf %111, %114 : vector<17x8xf32>
    %116 = vector.extract_strided_slice %105 {offsets = [0, 16], sizes = [17, 8], strides = [1, 1]} : vector<17x64xf32> to vector<17x8xf32>
    %cst_65 = arith.constant dense<0xFF800000> : vector<17xf32>
    %117 = vector.multi_reduction <maximumf>, %116, %cst_65 [1] : vector<17x8xf32> to vector<17xf32>
    %118 = vector.shape_cast %117 : vector<17xf32> to vector<17x1xf32>
    %119 = vector.broadcast %118 : vector<17x1xf32> to vector<17x8xf32>
    %120 = arith.subf %116, %119 : vector<17x8xf32>
    %121 = vector.extract_strided_slice %105 {offsets = [0, 24], sizes = [17, 8], strides = [1, 1]} : vector<17x64xf32> to vector<17x8xf32>
    %cst_66 = arith.constant dense<0xFF800000> : vector<17xf32>
    %122 = vector.multi_reduction <maximumf>, %121, %cst_66 [1] : vector<17x8xf32> to vector<17xf32>
    %123 = vector.shape_cast %122 : vector<17xf32> to vector<17x1xf32>
    %124 = vector.broadcast %123 : vector<17x1xf32> to vector<17x8xf32>
    %125 = arith.subf %121, %124 : vector<17x8xf32>
    %126 = vector.extract_strided_slice %105 {offsets = [0, 32], sizes = [17, 8], strides = [1, 1]} : vector<17x64xf32> to vector<17x8xf32>
    %cst_67 = arith.constant dense<0xFF800000> : vector<17xf32>
    %127 = vector.multi_reduction <maximumf>, %126, %cst_67 [1] : vector<17x8xf32> to vector<17xf32>
    %128 = vector.shape_cast %127 : vector<17xf32> to vector<17x1xf32>
    %129 = vector.broadcast %128 : vector<17x1xf32> to vector<17x8xf32>
    %130 = arith.subf %126, %129 : vector<17x8xf32>
    %131 = vector.extract_strided_slice %105 {offsets = [0, 40], sizes = [17, 8], strides = [1, 1]} : vector<17x64xf32> to vector<17x8xf32>
    %cst_68 = arith.constant dense<0xFF800000> : vector<17xf32>
    %132 = vector.multi_reduction <maximumf>, %131, %cst_68 [1] : vector<17x8xf32> to vector<17xf32>
    %133 = vector.shape_cast %132 : vector<17xf32> to vector<17x1xf32>
    %134 = vector.broadcast %133 : vector<17x1xf32> to vector<17x8xf32>
    %135 = arith.subf %131, %134 : vector<17x8xf32>
    %136 = vector.extract_strided_slice %105 {offsets = [0, 48], sizes = [17, 8], strides = [1, 1]} : vector<17x64xf32> to vector<17x8xf32>
    %cst_69 = arith.constant dense<0xFF800000> : vector<17xf32>
    %137 = vector.multi_reduction <maximumf>, %136, %cst_69 [1] : vector<17x8xf32> to vector<17xf32>
    %138 = vector.shape_cast %137 : vector<17xf32> to vector<17x1xf32>
    %139 = vector.broadcast %138 : vector<17x1xf32> to vector<17x8xf32>
    %140 = arith.subf %136, %139 : vector<17x8xf32>
    %141 = vector.extract_strided_slice %105 {offsets = [0, 56], sizes = [17, 8], strides = [1, 1]} : vector<17x64xf32> to vector<17x8xf32>
    %cst_70 = arith.constant dense<0xFF800000> : vector<17xf32>
    %142 = vector.multi_reduction <maximumf>, %141, %cst_70 [1] : vector<17x8xf32> to vector<17xf32>
    %143 = vector.shape_cast %142 : vector<17xf32> to vector<17x1xf32>
    %144 = vector.broadcast %143 : vector<17x1xf32> to vector<17x8xf32>
    %145 = arith.subf %141, %144 : vector<17x8xf32>
    %146 = tpu.concatenate %110, %115, %120, %125, %130, %135, %140, %145 in 1 : vector<17x8xf32>, vector<17x8xf32>, vector<17x8xf32>, vector<17x8xf32>, vector<17x8xf32>, vector<17x8xf32>, vector<17x8xf32>, vector<17x8xf32> -> vector<17x64xf32>
    %147 = math.exp %146 : vector<17x64xf32>
    %cst_71 = arith.constant dense<0.000000e+00> : vector<17x64xf32>
    %148 = tpu.matmul %147, %6, %cst_71 {dimension_numbers = #tpu.dot_dimension_numbers<[1], [0], [0], [1], [0, 0, 1, 1], [], []>} : vector<17x64xf32>, vector<64x64xf32>, vector<17x64xf32> -> vector<17x64xf32>
    %149 = tpu.reciprocal %148 {approx = true} : vector<17x64xf32> -> vector<17x64xf32>
    %150 = arith.mulf %147, %149 : vector<17x64xf32>
    %151 = tpu.concatenate %100, %100, %100, %100, %100, %100, %100, %100 in 1 : vector<64x64xf32>, vector<64x64xf32>, vector<64x64xf32>, vector<64x64xf32>, vector<64x64xf32>, vector<64x64xf32>, vector<64x64xf32>, vector<64x64xf32> -> vector<64x512xf32>
    %152 = arith.mulf %151, %7 : vector<64x512xf32>
    %cst_72 = arith.constant dense<0.000000e+00> : vector<17x512xf32>
    %153 = tpu.matmul %150, %152, %cst_72 {dimension_numbers = #tpu.dot_dimension_numbers<[1], [0], [0], [1], [0, 0, 1, 1], [], []>} : vector<17x64xf32>, vector<64x512xf32>, vector<17x512xf32> -> vector<17x512xf32>
    %154 = vector.extract_strided_slice %153 {offsets = [0, 0], sizes = [17, 64], strides = [1, 1]} : vector<17x512xf32> to vector<17x64xf32>
    %c136 = arith.constant 136 : index
    %c0_73 = arith.constant 0 : index
    %155 = vector.load %arg12[%c136, %c0_73] : memref<272x64xf32, #tpu.memory_space<vmem>>, vector<17x64xf32>
    tpu.vector_store %arg12[%c136, %c0_73], %154 {strides = array<i32>} : memref<272x64xf32, #tpu.memory_space<vmem>>, vector<17x64xf32>,
    %156 = vector.extract_strided_slice %153 {offsets = [0, 64], sizes = [17, 64], strides = [1, 1]} : vector<17x512xf32> to vector<17x64xf32>
    %c153 = arith.constant 153 : index
    %c0_74 = arith.constant 0 : index
    %157 = vector.load %arg12[%c153, %c0_74] : memref<272x64xf32, #tpu.memory_space<vmem>>, vector<17x64xf32>
    tpu.vector_store %arg12[%c153, %c0_74], %156 {strides = array<i32>} : memref<272x64xf32, #tpu.memory_space<vmem>>, vector<17x64xf32>,
    %158 = vector.extract_strided_slice %153 {offsets = [0, 128], sizes = [17, 64], strides = [1, 1]} : vector<17x512xf32> to vector<17x64xf32>
    %c170 = arith.constant 170 : index
    %c0_75 = arith.constant 0 : index
    %159 = vector.load %arg12[%c170, %c0_75] : memref<272x64xf32, #tpu.memory_space<vmem>>, vector<17x64xf32>
    tpu.vector_store %arg12[%c170, %c0_75], %158 {strides = array<i32>} : memref<272x64xf32, #tpu.memory_space<vmem>>, vector<17x64xf32>,
    %160 = vector.extract_strided_slice %153 {offsets = [0, 192], sizes = [17, 64], strides = [1, 1]} : vector<17x512xf32> to vector<17x64xf32>
    %c187 = arith.constant 187 : index
    %c0_76 = arith.constant 0 : index
    %161 = vector.load %arg12[%c187, %c0_76] : memref<272x64xf32, #tpu.memory_space<vmem>>, vector<17x64xf32>
    tpu.vector_store %arg12[%c187, %c0_76], %160 {strides = array<i32>} : memref<272x64xf32, #tpu.memory_space<vmem>>, vector<17x64xf32>,
    %162 = vector.extract_strided_slice %153 {offsets = [0, 256], sizes = [17, 64], strides = [1, 1]} : vector<17x512xf32> to vector<17x64xf32>
    %c204 = arith.constant 204 : index
    %c0_77 = arith.constant 0 : index
    %163 = vector.load %arg12[%c204, %c0_77] : memref<272x64xf32, #tpu.memory_space<vmem>>, vector<17x64xf32>
    tpu.vector_store %arg12[%c204, %c0_77], %162 {strides = array<i32>} : memref<272x64xf32, #tpu.memory_space<vmem>>, vector<17x64xf32>,
    %164 = vector.extract_strided_slice %153 {offsets = [0, 320], sizes = [17, 64], strides = [1, 1]} : vector<17x512xf32> to vector<17x64xf32>
    %c221 = arith.constant 221 : index
    %c0_78 = arith.constant 0 : index
    %165 = vector.load %arg12[%c221, %c0_78] : memref<272x64xf32, #tpu.memory_space<vmem>>, vector<17x64xf32>
    tpu.vector_store %arg12[%c221, %c0_78], %164 {strides = array<i32>} : memref<272x64xf32, #tpu.memory_space<vmem>>, vector<17x64xf32>,
    %166 = vector.extract_strided_slice %153 {offsets = [0, 384], sizes = [17, 64], strides = [1, 1]} : vector<17x512xf32> to vector<17x64xf32>
    %c238 = arith.constant 238 : index
    %c0_79 = arith.constant 0 : index
    %167 = vector.load %arg12[%c238, %c0_79] : memref<272x64xf32, #tpu.memory_space<vmem>>, vector<17x64xf32>
    tpu.vector_store %arg12[%c238, %c0_79], %166 {strides = array<i32>} : memref<272x64xf32, #tpu.memory_space<vmem>>, vector<17x64xf32>,
    %168 = vector.extract_strided_slice %153 {offsets = [0, 448], sizes = [17, 64], strides = [1, 1]} : vector<17x512xf32> to vector<17x64xf32>
    %c255 = arith.constant 255 : index
    %c0_80 = arith.constant 0 : index
    %169 = vector.load %arg12[%c255, %c0_80] : memref<272x64xf32, #tpu.memory_space<vmem>>, vector<17x64xf32>
    tpu.vector_store %arg12[%c255, %c0_80], %168 {strides = array<i32>} : memref<272x64xf32, #tpu.memory_space<vmem>>, vector<17x64xf32>,
    %c136_81 = arith.constant 136 : index
    %c0_82 = arith.constant 0 : index
    %170 = tpu.strided_load %arg12[%c136_81, %c0_82] {strides = array<i32: 8, 1>} : memref<272x64xf32, #tpu.memory_space<vmem>>, vector<17x64xf32>
    %c137 = arith.constant 137 : index
    %c0_83 = arith.constant 0 : index
    %171 = tpu.strided_load %arg12[%c137, %c0_83] {strides = array<i32: 8, 1>} : memref<272x64xf32, #tpu.memory_space<vmem>>, vector<17x64xf32>
    %c138 = arith.constant 138 : index
    %c0_84 = arith.constant 0 : index
    %172 = tpu.strided_load %arg12[%c138, %c0_84] {strides = array<i32: 8, 1>} : memref<272x64xf32, #tpu.memory_space<vmem>>, vector<17x64xf32>
    %c139 = arith.constant 139 : index
    %c0_85 = arith.constant 0 : index
    %173 = tpu.strided_load %arg12[%c139, %c0_85] {strides = array<i32: 8, 1>} : memref<272x64xf32, #tpu.memory_space<vmem>>, vector<17x64xf32>
    %c140 = arith.constant 140 : index
    %c0_86 = arith.constant 0 : index
    %174 = tpu.strided_load %arg12[%c140, %c0_86] {strides = array<i32: 8, 1>} : memref<272x64xf32, #tpu.memory_space<vmem>>, vector<17x64xf32>
    %c141 = arith.constant 141 : index
    %c0_87 = arith.constant 0 : index
    %175 = tpu.strided_load %arg12[%c141, %c0_87] {strides = array<i32: 8, 1>} : memref<272x64xf32, #tpu.memory_space<vmem>>, vector<17x64xf32>
    %c142 = arith.constant 142 : index
    %c0_88 = arith.constant 0 : index
    %176 = tpu.strided_load %arg12[%c142, %c0_88] {strides = array<i32: 8, 1>} : memref<272x64xf32, #tpu.memory_space<vmem>>, vector<17x64xf32>
    %c143 = arith.constant 143 : index
    %c0_89 = arith.constant 0 : index
    %177 = tpu.strided_load %arg12[%c143, %c0_89] {strides = array<i32: 8, 1>} : memref<272x64xf32, #tpu.memory_space<vmem>>, vector<17x64xf32>
    %178 = tpu.concatenate %170, %171, %172, %173, %174, %175, %176, %177 in 1 : vector<17x64xf32>, vector<17x64xf32>, vector<17x64xf32>, vector<17x64xf32>, vector<17x64xf32>, vector<17x64xf32>, vector<17x64xf32>, vector<17x64xf32> -> vector<17x512xf32>
    %cst_90 = arith.constant dense<0.000000e+00> : vector<17x64xf32>
    %179 = tpu.matmul %178, %3, %cst_90 {dimension_numbers = #tpu.dot_dimension_numbers<[1], [0], [0], [1], [0, 0, 1, 1], [], []>} : vector<17x512xf32>, vector<512x64xf32>, vector<17x64xf32> -> vector<17x64xf32>
    %180 = vector.broadcast %4 : vector<1x64xf32> to vector<17x64xf32>
    %181 = arith.addf %179, %180 : vector<17x64xf32>
    %182 = tpu.concatenate %94, %181 in 1 : vector<17x64xf32>, vector<17x64xf32> -> vector<17x128xf32>
    %c0_91 = arith.constant 0 : index
    %c0_92 = arith.constant 0 : index
    %c0_93 = arith.constant 0 : index
    %183 = vector.load %arg11[%c0_91, %c0_92, %c0_93] : memref<1x17x128xf32, #tpu.memory_space<vmem>>, vector<1x17x128xf32>
    %184 = vector.shape_cast %183 : vector<1x17x128xf32> to vector<17x128xf32>
    %185 = vector.shape_cast %182 : vector<17x128xf32> to vector<1x17x128xf32>
    tpu.vector_store %arg11[%c0_91, %c0_92, %c0_93], %185 {strides = array<i32>} : memref<1x17x128xf32, #tpu.memory_space<vmem>>, vector<1x17x128xf32>,
    return
  }
  func.func @transform_0(%arg0: i32) -> (i32, i32, i32) {
    %c0_i32 = arith.constant 0 : i32
    %c0_i32_0 = arith.constant 0 : i32
    %c0_i32_1 = arith.constant 0 : i32
    return %arg0, %c0_i32, %c0_i32_0 : i32, i32, i32
  }
  func.func @transform_1(%arg0: i32) -> (i32, i32, i32) {
    %c0_i32 = arith.constant 0 : i32
    %c0_i32_0 = arith.constant 0 : i32
    %c0_i32_1 = arith.constant 0 : i32
    return %arg0, %c0_i32, %c0_i32_0 : i32, i32, i32
  }
  func.func @transform_2(%arg0: i32) -> (i32, i32) {
    %c0_i32 = arith.constant 0 : i32
    %c0_i32_0 = arith.constant 0 : i32
    %c0_i32_1 = arith.constant 0 : i32
    return %c0_i32, %c0_i32_0 : i32, i32
  }
  func.func @transform_3(%arg0: i32) -> (i32, i32) {
    %c0_i32 = arith.constant 0 : i32
    %c0_i32_0 = arith.constant 0 : i32
    %c0_i32_1 = arith.constant 0 : i32
    return %c0_i32, %c0_i32_0 : i32, i32
  }
  func.func @transform_4(%arg0: i32) -> (i32, i32) {
    %c0_i32 = arith.constant 0 : i32
    %c0_i32_0 = arith.constant 0 : i32
    %c0_i32_1 = arith.constant 0 : i32
    return %c0_i32, %c0_i32_0 : i32, i32
  }
  func.func @transform_5(%arg0: i32) -> (i32, i32) {
    %c0_i32 = arith.constant 0 : i32
    %c0_i32_0 = arith.constant 0 : i32
    %c0_i32_1 = arith.constant 0 : i32
    return %c0_i32, %c0_i32_0 : i32, i32
  }
  func.func @transform_6(%arg0: i32) -> (i32, i32) {
    %c0_i32 = arith.constant 0 : i32
    %c0_i32_0 = arith.constant 0 : i32
    %c0_i32_1 = arith.constant 0 : i32
    return %c0_i32, %c0_i32_0 : i32, i32
  }
  func.func @transform_7(%arg0: i32) -> (i32, i32) {
    %c0_i32 = arith.constant 0 : i32
    %c0_i32_0 = arith.constant 0 : i32
    %c0_i32_1 = arith.constant 0 : i32
    return %c0_i32, %c0_i32_0 : i32, i32
  }
  func.func @transform_8(%arg0: i32) -> (i32, i32) {
    %c0_i32 = arith.constant 0 : i32
    %c0_i32_0 = arith.constant 0 : i32
    %c0_i32_1 = arith.constant 0 : i32
    return %c0_i32, %c0_i32_0 : i32, i32
  }
  func.func @transform_9(%arg0: i32) -> (i32, i32) {
    %c0_i32 = arith.constant 0 : i32
    %c0_i32_0 = arith.constant 0 : i32
    %c0_i32_1 = arith.constant 0 : i32
    return %c0_i32, %c0_i32_0 : i32, i32
  }
  func.func @transform_10(%arg0: i32) -> (i32, i32, i32) {
    %c0_i32 = arith.constant 0 : i32
    %c0_i32_0 = arith.constant 0 : i32
    %c0_i32_1 = arith.constant 0 : i32
    return %arg0, %c0_i32, %c0_i32_0 : i32, i32, i32
  }
}

</mosaic_0001>

<bundles_post_ra>
// kernel: tpu_custom_call.1
= control target key start
LH: loop header
LB: loop body
LE: loop exit
PB: predicated region body
PF: predicated region fallthrough
CT: control target
= control target key end

     0   :  { %vm299_vm0 = vcmask 1040384   ;;  %vm274_vm1 = vcmask 138240   ;;  %v3626_v2 = vmov 0.0   ;;  %vm3627_vm2 = vmmov 0   ;;  %s3628_s17 = smov 64   ;;  %s5229_s0 = inlined_call_operand.vmem [shape: f32[2,17,64], index: 0, kind: input, shape index: {}]   ;;  %s5230_s4 = inlined_call_operand.vmem [shape: f32[64,17], index: 4, kind: input, shape index: {}]   ;;  %s5231_s2 = inlined_call_operand.vmem [shape: f32[128,64], index: 2, kind: input, shape index: {}]   ;;  %s5232_s3 = inlined_call_operand.vmem [shape: f32[64,64], index: 3, kind: input, shape index: {}]   ;;  %s5233_s1 = inlined_call_operand.vmem [shape: f32[2,1,128], index: 1, kind: input, shape index: {}]   ;;  %s5234_s7 = inlined_call_operand.vmem [shape: f32[64,128], index: 7, kind: input, shape index: {}]   ;;  %s5235_s8 = inlined_call_operand.vmem [shape: f32[64,64], index: 8, kind: input, shape index: {}]   ;;  %s5236_s9 = inlined_call_operand.vmem [shape: f32[64,512], index: 9, kind: input, shape index: {}]   ;;  %s5237_s5 = inlined_call_operand.vmem [shape: f32[512,64], index: 5, kind: input, shape index: {}]   ;;  %s5238_s6 = inlined_call_operand.vmem [shape: f32[1,64], index: 6, kind: input, shape index: {}]   ;;  %s5239_s10 = inlined_call_operand.vmem [shape: f32[1,17,128], index: 10, kind: output, shape index: {}]  }
   0x1   :  { %v3687_v0 = vld [vmem:[%s5229_s0 + $0x10] sm:$0x1]  ;;  %v3692_v1 = vld [vmem:[%s5229_s0 + $0x8] sm:$0xff]  ;;  %3120 = vmatprep.subr.mxu0 %v3626_v2  ;;  %3136 = vmatprep.mubr.msk.f32.mxu0 %vm3627_vm2, %v3626_v2  ;;  %v59_v3 = vld [vmem:[%s5230_s4] sm:$0xff]  ;;  %vm184_vm3 = vcmask 523264   ;;  %vm651_vm4 = vcmask 195712  }
   0x2   :  { %3145 = vmatprep.subr.msk.mxu1 %vm299_vm0, %v3687_v0  ;;  %v3707_v4 = vld [vmem:[%s5229_s0] sm:$0xff]  ;;  %3151 = vmatprep.mubr.msk.f32.mxu1 %vm274_vm1, %v59_v3  ;;  %v60_v5 = vld [vmem:[%s5230_s4 + $0x8] sm:$0xff]  ;;  %v50_v6 = vld [vmem:[%s5231_s2 + $0x78] sm:$0xff]  ;;  %vm623_vm5 = vcmask 64512   ;;  %vm665_vm6 = vcmask 261312   ;;  %vm637_vm7 = vcmask 130112  }
   0x3   :  { %3146 = vmatpush3.msk.msra.mxu1 %vm299_vm0, %v3687_v0  ;;  %v61_v7 = vld [vmem:[%s5230_s4 + $0x10] sm:$0xff]  ;;  %v48_v9 = vld [vmem:[%s5231_s2 + $0x68] sm:$0xff]  ;;  %v62_v10 = vld [vmem:[%s5230_s4 + $0x18] sm:$0xff]  ;;  %vm693_vm8 = vcmask 392512   ;;  %vm5241_vm9 = vcmask 326912   ;;  %vm707_vm10 = vcmask 458112  }
   0x4   :  { %3147 = vmatprep.subr.mxu1 %v3692_v1  ;;  %v49_v8 = vld [vmem:[%s5231_s2 + $0x70] sm:$0xff]  ;;  %v63_v11 = vld [vmem:[%s5230_s4 + $0x20] sm:$0xff]  ;;  %v58_v13 = vld [vmem:[%s5232_s3 + $0x38] sm:$0xff]  ;;  %vm5243_vm11 = vcmask 523712   ;;  %vm5240_vm12 = vcmask 122944   ;;  %vm5242_vm13 = vcmask 188544  }
   0x5   :  { %3148 = vmatpush3.msra.mxu1 %v3692_v1  ;;  %v47_v12 = vld [vmem:[%s5231_s2 + $0x60] sm:$0xff]  ;;  %v46_v14 = vld [vmem:[%s5231_s2 + $0x58] sm:$0xff]  ;;  %v64_v15 = vld [vmem:[%s5230_s4 + $0x28] sm:$0xff]  ;;  %3121 = vmatpush3.msra.mxu0 %v58_v13  ;;  %vm5247_vm14 = vcmask 254144   ;;  %vm5249_vm15 = vcmask 57344  }
   0x6   :  { %3149 = vmatprep.subr.mxu1 %v3707_v4  ;;  %v65_v16 = vld [vmem:[%s5230_s4 + $0x30] sm:$0xff]  ;;  %v132_v17 = vld [vmem:[%s5234_s7] sm:$0xff]  ;;  %3122 = vmatprep.subr.mxu0 %v3626_v2  ;;  %v44_v21 = vld [vmem:[%s5231_s2 + $0x48] sm:$0xff] }
   0x7   :  { %3150 = vmatpush3.msra.mxu1 %v3707_v4  ;;  %v3760_v18 = vld [vmem:[%s5233_s1] ss:$0 sm:$0xff]  ;;  %v45_v19 = vld [vmem:[%s5231_s2 + $0x50] sm:$0xff]  ;;  %v66_v22 = vld [vmem:[%s5230_s4 + $0x38] sm:$0xff] }
   0x8   :  { %3152 = vmatmul.mubr.msk.f32.vlgmr.msra.gmra.mxu1 %vm274_vm1, %v60_v5  ;;  %3163 = vmatprep.subr.mxu1 %v50_v6  ;;  %v57_v20 = vld [vmem:[%s5232_s3 + $0x30] sm:$0xff]  ;;  %v413_v23 = vmul.f32 %v3760_v18, %v132_v17  ;;  %v43_v24 = vld [vmem:[%s5231_s2 + $0x40] sm:$0xff]  ;;  %v56_v25 = vld [vmem:[%s5232_s3 + $0x28] sm:$0xff] }
   0x9   :  { %3164 = vmatpush3.msra.mxu1 %v50_v6  ;;  %3154 = vmatprep.mubr.msk.f32.mxu1 %vm274_vm1, %v61_v7  ;;  %v42_v26 = vld [vmem:[%s5231_s2 + $0x38] sm:$0xff]  ;;  %v55_v27 = vld [vmem:[%s5232_s3 + $0x20] sm:$0xff]  ;;  %v41_v28 = vld [vmem:[%s5231_s2 + $0x30] sm:$0xff] }
   0xa   :  { %3165 = vmatprep.subr.mxu1 %v49_v8  ;;  %3123 = vmatpush3.msra.mxu0 %v57_v20  ;;  %v54_v29 = vld [vmem:[%s5232_s3 + $0x18] sm:$0xff]  ;;  %v40_v30 = vld [vmem:[%s5231_s2 + $0x28] sm:$0xff]  ;;  %v53_v31 = vld [vmem:[%s5232_s3 + $0x10] sm:$0xff] }
   0xb   :  { %3166 = vmatpush3.msra.mxu1 %v49_v8  ;;  %3124 = vmatprep.subr.mxu0 %v3626_v2  ;;  %v39_v32 = vld [vmem:[%s5231_s2 + $0x20] sm:$0xff]  ;;  %v52_v33 = vld [vmem:[%s5232_s3 + $0x8] sm:$0xff]  ;;  %v38_v34 = vld [vmem:[%s5231_s2 + $0x18] sm:$0xff] }
   0xc   :  { %3167 = vmatprep.subr.mxu1 %v48_v9  ;;  %3155 = vmatmul.mubr.msk.f32.gmra.mxu1 %vm274_vm1, %v62_v10  ;;  %v51_v35 = vld [vmem:[%s5232_s3] sm:$0xff]  ;;  %v37_v36 = vld [vmem:[%s5231_s2 + $0x10] sm:$0xff]  ;;  %v36_v37 = vld [vmem:[%s5231_s2 + $0x8] sm:$0xff] }
   0xd   :  { %3168 = vmatpush3.msra.mxu1 %v48_v9  ;;  %3157 = vmatprep.mubr.msk.f32.mxu1 %vm274_vm1, %v63_v11  ;;  %v133_v38 = vld [vmem:[%s5234_s7 + $0x8] sm:$0xff]  ;;  %v134_v39 = vld [vmem:[%s5234_s7 + $0x10] sm:$0xff]  ;;  %v35_v40 = vld [vmem:[%s5231_s2] sm:$0xff] }
   0xe   :  { %3169 = vmatprep.subr.mxu1 %v47_v12  ;;  %3125 = vmatpush3.msra.mxu0 %v56_v25  ;;  %v414_v41 = vmul.f32 %v3760_v18, %v133_v38  ;;  %v415_v42 = vmul.f32 %v3760_v18, %v134_v39  ;;  %v135_v43 = vld [vmem:[%s5234_s7 + $0x18] sm:$0xff]  ;;  %v136_v44 = vld [vmem:[%s5234_s7 + $0x20] sm:$0xff]  ;;  %v137_v47 = vld [vmem:[%s5234_s7 + $0x28] sm:$0xff] }
   0xf   :  { %3170 = vmatpush3.msra.mxu1 %v47_v12  ;;  %3126 = vmatprep.subr.mxu0 %v3626_v2  ;;  %v416_v45 = vmul.f32 %v3760_v18, %v135_v43  ;;  %v417_v46 = vmul.f32 %v3760_v18, %v136_v44  ;;  %v138_v48 = vld [vmem:[%s5234_s7 + $0x30] sm:$0xff]  ;;  %v418_v49 = vmul.f32 %v3760_v18, %v137_v47  ;;  %v139_v51 = vld [vmem:[%s5234_s7 + $0x38] sm:$0xff]  ;;  %v144_v17 = vld [vmem:[%s5235_s8 + $0x20] sm:$0xff] }
  0x10   :  { %3171 = vmatprep.subr.mxu1 %v46_v14  ;;  %3158 = vmatmul.mubr.msk.f32.gmra.mxu1 %vm274_vm1, %v64_v15  ;;  %v419_v50 = vmul.f32 %v3760_v18, %v138_v48  ;;  %v420_v52 = vmul.f32 %v3760_v18, %v139_v51  ;;  %v147_v10 = vld [vmem:[%s5235_s8 + $0x38] sm:$0xff]  ;;  %v146_v12 = vld [vmem:[%s5235_s8 + $0x30] sm:$0xff]  ;;  %v140_v25 = vld [vmem:[%s5235_s8] sm:$0xff] }
  0x11   :  { %3172 = vmatpush3.msra.mxu1 %v46_v14  ;;  %3160 = vmatprep.mubr.msk.f32.mxu1 %vm274_vm1, %v65_v16  ;;  %v145_v14 = vld [vmem:[%s5235_s8 + $0x28] sm:$0xff] }
  0x12   :  { %3173 = vmatprep.subr.mxu1 %v45_v19  ;;  %3127 = vmatpush3.msra.mxu0 %v55_v27 }
  0x13   :  { %3174 = vmatpush3.msra.mxu1 %v45_v19  ;;  %3128 = vmatprep.subr.mxu0 %v3626_v2  ;;  %v143_v19 = vld [vmem:[%s5235_s8 + $0x18] sm:$0xff] }
  0x14   :  { %3175 = vmatprep.subr.mxu1 %v44_v21  ;;  %3161 = vmatmul.mubr.msk.f32.gmra.mxu1 %vm274_vm1, %v66_v22 }
  0x15   :  { %3176 = vmatpush3.msra.mxu1 %v44_v21  ;;  %3195 = vmatprep.mubr.f32.mxu1 %v413_v23  ;;  %v142_v21 = vld [vmem:[%s5235_s8 + $0x10] sm:$0xff]  ;;  %v141_v23 = vld [vmem:[%s5235_s8 + $0x8] sm:$0xff] }
  0x16   :  { %3177 = vmatprep.subr.mxu1 %v43_v24  ;;  %3129 = vmatpush3.msra.mxu0 %v54_v29 }
  0x17   :  { %3178 = vmatpush3.msra.mxu1 %v43_v24  ;;  %3130 = vmatprep.subr.mxu0 %v3626_v2 }
  0x18   :  { %3179 = vmatprep.subr.mxu1 %v42_v26  ;;  %3131 = vmatpush3.msra.mxu0 %v53_v31 }
  0x19   :  { %3180 = vmatpush3.msra.mxu1 %v42_v26  ;;  %3132 = vmatprep.subr.mxu0 %v3626_v2 }
  0x1a   :  { %3181 = vmatprep.subr.mxu1 %v41_v28  ;;  %3133 = vmatpush3.msra.mxu0 %v52_v33 }
  0x1b   :  { %3182 = vmatpush3.msra.mxu1 %v41_v28  ;;  %3134 = vmatprep.subr.mxu0 %v3626_v2 }
  0x1c   :  { %3183 = vmatprep.subr.mxu1 %v40_v30  ;;  %3135 = vmatpush3.msra.mxu0 %v51_v35 }
  0x1d   :  { %3184 = vmatpush3.msra.mxu1 %v40_v30  ;;  %3137 = vmatmul.mubr.msk.f32.vlgmr.msra.gmra.mxu0 %vm184_vm3, %v3707_v4 }
  0x1e   :  { %3185 = vmatprep.subr.mxu1 %v39_v32  ;;  %3139 = vmatprep.mubr.msk.f32.mxu0 %vm3627_vm2, %v3626_v2 }
  0x1f   :  { %3186 = vmatpush3.msra.mxu1 %v39_v32  ;;  %3207 = vmatprep.subr.mxu0 %v3626_v2 }
  0x20   :  { %3187 = vmatprep.subr.mxu1 %v38_v34 }
  0x21   :  { %3188 = vmatpush3.msra.mxu1 %v38_v34  ;;  %3140 = vmatmul.mubr.msk.f32.gmra.mxu0 %vm184_vm3, %v3692_v1 }
  0x22   :  { %3189 = vmatprep.subr.mxu1 %v37_v36  ;;  %3142 = vmatprep.mubr.msk.f32.mxu0 %vm3627_vm2, %v3626_v2 }
  0x23   :  { %3190 = vmatpush3.msra.mxu1 %v37_v36 }
  0x24   :  { %3191 = vmatprep.subr.mxu1 %v36_v37 }
  0x25   :  { %3192 = vmatpush3.msra.mxu1 %v36_v37  ;;  %3143 = vmatmul.mubr.msk.f32.gmra.mxu0 %vm184_vm3, %v3687_v0 }
  0x26   :  { %3193 = vmatprep.subr.mxu1 %v35_v40  ;;  %3223 = vmatprep.mubr.msk.f32.mxu0 %vm3627_vm2, %v3626_v2 }
  0x27   :  { %3194 = vmatpush3.msra.mxu1 %v35_v40 }
  0x28   :  { %3196 = vmatmul.mubr.f32.vlgmr.msra.gmra.mxu1 %v414_v41 }
  0x29   :  { %3198 = vmatprep.mubr.f32.mxu1 %v415_v42 }
  0x2c   :  { %3199 = vmatmul.mubr.f32.gmra.mxu1 %v416_v45 }
  0x2d   :  { %3201 = vmatprep.mubr.f32.mxu1 %v417_v46 }
  0x30   :  { %3202 = vmatmul.mubr.f32.gmra.mxu1 %v418_v49 }
  0x31   :  { %3204 = vmatprep.mubr.f32.mxu1 %v419_v50 }
  0x34   :  { %3205 = vmatmul.mubr.f32.gmra.mxu1 %v420_v52 }
  0x35   :  { %1008 = vmatprep.mubr.f32.mxu1 %v3626_v2 }
  0xc8   :  { %v3872_v53 = vpop.f32.mrf.mxu1 }
  0xca   :  { %v3874_v54 = vpop.f32.mrf.mxu1 }
  0xcc   :  { %v3876_v55 = vpop.f32.mrf.mxu1 }
  0xce   :  { %v3878_v56 = vpop.f32.mrf.mxu1 }
  0xd0   :  { %v3880_v57 = vpop.f32.mrf.mxu1 }
  0xd2   :  { %v3882_v58 = vpop.f32.mrf.mxu1 }
  0xd4   :  { %v3884_v60 = vpop.f32.mrf.mxu1 }
  0xd6   :  { %v3886_v63 = vpop.f32.mrf.mxu1 }
  0xdd   :  { %v260_v59 = vpop.f32.mrf.mxu0 }
  0xdf   :  { %v3138_v61 = vpop.f32.mrf.mxu0 }
  0xe1   :  { %v265_v62 = vpop.f32.mrf.mxu0 }
  0xe3   :  { %v3141_v0 = vpop.f32.mrf.mxu0 }
  0xe5   :  { %v270_v3 = vpop.f32.mrf.mxu0 }
  0xe7   :  { %v3144_v5 = vpop.f32.mrf.mxu0 }
  0xe8   :  { %v3197_v1 = vpop.f32.mrf.mxu1 }
  0xe9   :  { %v527_v26 = vmul.f32 %v3197_v1, %v141_v23 }
  0xea   :  { %v487_v4 = vpop.f32.mrf.mxu1 }
  0xeb   :  { %v526_v27 = vmul.f32 %v487_v4, %v140_v25 }
  0xec   :  { %v3200_v6 = vpop.f32.mrf.mxu1 }
  0xed   :  { %v529_v22 = vmul.f32 %v3200_v6, %v143_v19 }
  0xee   :  { %v497_v7 = vpop.f32.mrf.mxu1 }
  0xef   :  { %v528_v24 = vmul.f32 %v497_v7, %v142_v21 }
  0xf0   :  { %v3203_v8 = vpop.f32.mrf.mxu1 }
  0xf1   :  { %v531_v18 = vmul.f32 %v3203_v8, %v145_v14 }
  0xf2   :  { %v507_v9 = vpop.f32.mrf.mxu1 }
  0xf3   :  { %v530_v20 = vmul.f32 %v507_v9, %v144_v17 }
  0xf4   :  { %v3206_v11 = vpop.f32.mrf.mxu1 }
  0xf5   :  { %v533_v13 = vmul.f32 %v3206_v11, %v147_v10 }
  0xf6   :  { %v517_v15 = vpop.f32.mrf.mxu1 }
  0xf7   :  { %v532_v16 = vmul.f32 %v517_v15, %v146_v12  ;;  %3208 = vmatpush3.msra.mxu0 %v533_v13 }
  0xf8   :  { %3209 = vmatprep.subr.mxu0 %v3626_v2 }
  0xf9   :  { %3210 = vmatpush3.msra.mxu0 %v532_v16 }
  0xfa   :  { %3211 = vmatprep.subr.mxu0 %v3626_v2 }
  0xfb   :  { %3212 = vmatpush3.msra.mxu0 %v531_v18 }
  0xfc   :  { %3213 = vmatprep.subr.mxu0 %v3626_v2 }
  0xfd   :  { %3214 = vmatpush3.msra.mxu0 %v530_v20 }
  0xfe   :  { %3215 = vmatprep.subr.mxu0 %v3626_v2 }
  0xff   :  { %3216 = vmatpush3.msra.mxu0 %v529_v22 }
 0x100   :  { %3217 = vmatprep.subr.mxu0 %v3626_v2 }
 0x101   :  { %3218 = vmatpush3.msra.mxu0 %v528_v24 }
 0x102   :  { %3219 = vmatprep.subr.mxu0 %v3626_v2 }
 0x103   :  { %3220 = vmatpush3.msra.mxu0 %v527_v26 }
 0x104   :  { %3221 = vmatprep.subr.mxu0 %v3626_v2 }
 0x105   :  { %3222 = vmatpush3.msra.mxu0 %v526_v27 }
 0x106   :  { %3224 = vmatmul.mubr.msk.f32.vlgmr.msra.gmra.mxu0 %vm184_vm3, %v260_v59  ;;  %3232 = vmatprep.subr.mxu0 %v3626_v2 }
 0x107   :  { %3226 = vmatprep.mubr.msk.f32.mxu0 %vm3627_vm2, %v3626_v2  ;;  %3233 = vmatpush3.msra.mxu0 %v147_v10 }
 0x108   :  { %3234 = vmatprep.subr.mxu0 %v3626_v2 }
 0x109   :  { %3235 = vmatpush3.msra.mxu0 %v146_v12 }
 0x10a   :  { %3227 = vmatmul.mubr.msk.f32.gmra.mxu0 %vm184_vm3, %v265_v62  ;;  %3236 = vmatprep.subr.mxu0 %v3626_v2 }
 0x10b   :  { %3229 = vmatprep.mubr.msk.f32.mxu0 %vm3627_vm2, %v3626_v2  ;;  %3237 = vmatpush3.msra.mxu0 %v145_v14 }
 0x10c   :  { %3238 = vmatprep.subr.mxu0 %v3626_v2 }
 0x10d   :  { %3239 = vmatpush3.msra.mxu0 %v144_v17 }
 0x10e   :  { %3230 = vmatmul.mubr.msk.f32.gmra.mxu0 %vm184_vm3, %v270_v3  ;;  %3240 = vmatprep.subr.mxu0 %v3626_v2 }
 0x10f   :  { %3241 = vmatpush3.msra.mxu0 %v143_v19  ;;  %3248 = vmatprep.mubr.msk.f32.mxu0 %vm3627_vm2, %v3626_v2 }
 0x110   :  { %3242 = vmatprep.subr.mxu0 %v3626_v2 }
 0x111   :  { %3243 = vmatpush3.msra.mxu0 %v142_v21 }
 0x112   :  { %3244 = vmatprep.subr.mxu0 %v3626_v2 }
 0x113   :  { %3245 = vmatpush3.msra.mxu0 %v141_v23 }
 0x114   :  { %3246 = vmatprep.subr.mxu0 %v3626_v2 }
 0x115   :  { %3247 = vmatpush3.msra.mxu0 %v140_v25 }
 0x1c6   :  { %v3936_v28 = vpop.f32.mrf.mxu0 }
 0x1c7   :  { %v652_v29 = vsel %vm651_vm4, %v3936_v28, -inf  ;;  %v624_v30 = vsel %vm623_vm5, %v3936_v28, -inf  ;;  %v666_v33 = vsel %vm665_vm6, %v3936_v28, -inf  ;;  %v638_v34 = vsel %vm637_vm7, %v3936_v28, -inf }
 0x1c8   :  { %653 = vmax.xlane.f32.xlu1 %v652_v29  ;;  %625 = vmax.xlane.f32.xlu0 %v624_v30  ;;  %v3225_v31 = vpop.f32.mrf.mxu0  ;;  %v694_v37 = vsel %vm693_vm8, %v3936_v28, -inf  ;;  %v680_v38 = vsel %vm5241_vm9, %v3936_v28, -inf  ;;  %v708_v41 = vsel %vm707_vm10, %v3936_v28, -inf  ;;  %v722_v42 = vsel %vm5243_vm11, %v3936_v28, -inf }
 0x1ca   :  { %v3942_v32 = vpop.f32.mrf.mxu0 }
 0x1cb   :  { %v641_v40 = vsel %vm637_vm7, %v3942_v32, -inf  ;;  %v655_v43 = vsel %vm651_vm4, %v3942_v32, -inf  ;;  %v669_v44 = vsel %vm665_vm6, %v3942_v32, -inf  ;;  %v627_v45 = vsel %vm623_vm5, %v3942_v32, -inf }
 0x1cc   :  { %667 = vmax.xlane.f32.xlu1 %v666_v33  ;;  %639 = vmax.xlane.f32.xlu0 %v638_v34  ;;  %v3228_v35 = vpop.f32.mrf.mxu0  ;;  %v683_v46 = vsel %vm5241_vm9, %v3942_v32, -inf  ;;  %v697_v47 = vsel %vm693_vm8, %v3942_v32, -inf  ;;  %v711_v49 = vsel %vm707_vm10, %v3942_v32, -inf  ;;  %v725_v50 = vsel %vm5243_vm11, %v3942_v32, -inf }
 0x1cd   :  { %vm5248_vm9 = vcmask 385344   ;;  %vm5246_vm11 = vcmask 516544  }
 0x1ce   :  { %v3948_v36 = vpop.f32.mrf.mxu0 }
 0x1cf   :  { %v645_v48 = vsel %vm5240_vm12, %v3948_v36, -inf  ;;  %v659_v51 = vsel %vm5242_vm13, %v3948_v36, -inf  ;;  %v673_v52 = vsel %vm5247_vm14, %v3948_v36, -inf  ;;  %v631_v59 = vsel %vm5249_vm15, %v3948_v36, -inf }
 0x1d0   :  { %695 = vmax.xlane.f32.xlu1 %v694_v37  ;;  %681 = vmax.xlane.f32.xlu0 %v680_v38  ;;  %v3231_v39 = vpop.f32.mrf.mxu0  ;;  %vm5245_vm12 = vcmask 319744   ;;  %v701_v62 = vsel %vm5248_vm9, %v3948_v36, -inf  ;;  %vm5244_vm13 = vcmask 450944   ;;  %v729_v1 = vsel %vm5246_vm11, %v3948_v36, -inf }
 0x1d1   :  { %v687_v61 = vsel %vm5245_vm12, %v3948_v36, -inf  ;;  %v715_v0 = vsel %vm5244_vm13, %v3948_v36, -inf  ;;  %vm738_vm13 = vcmask 130048   ;;  %vm742_vm12 = vcmask 195584  }
 0x1d2   :  { %vm746_vm11 = vcmask 261120   ;;  %vm750_vm14 = vcmask 326656   ;;  %vm754_vm9 = vcmask 392192   ;;  %vm5250_vm15 = vcmask 457728  }
 0x1d4   :  { %709 = vmax.xlane.f32.xlu1 %v708_v41  ;;  %642 = vmax.xlane.f32.xlu0 %v641_v40 }
 0x1d8   :  { %723 = vmax.xlane.f32.xlu1 %v722_v42  ;;  %656 = vmax.xlane.f32.xlu0 %v655_v43 }
 0x1dc   :  { %670 = vmax.xlane.f32.xlu0 %v669_v44  ;;  %628 = vmax.xlane.f32.xlu1 %v627_v45 }
 0x1e0   :  { %684 = vmax.xlane.f32.xlu0 %v683_v46  ;;  %698 = vmax.xlane.f32.xlu1 %v697_v47 }
 0x1e4   :  { %712 = vmax.xlane.f32.xlu1 %v711_v49  ;;  %646 = vmax.xlane.f32.xlu0 %v645_v48 }
 0x1e8   :  { %726 = vmax.xlane.f32.xlu1 %v725_v50  ;;  %660 = vmax.xlane.f32.xlu0 %v659_v51 }
 0x1ec   :  { %674 = vmax.xlane.f32.xlu0 %v673_v52  ;;  %632 = vmax.xlane.f32.xlu1 %v631_v59 }
 0x1f0   :  { %688 = vmax.xlane.f32.xlu0 %v687_v61  ;;  %702 = vmax.xlane.f32.xlu1 %v701_v62 }
 0x1f4   :  { %716 = vmax.xlane.f32.xlu0 %v715_v0  ;;  %730 = vmax.xlane.f32.xlu1 %v729_v1 }
 0x205   :  { %883 = vrot.lane.b32.xlu1 %v3886_v63, %s3628_s17 }
 0x209   :  { %881 = vrot.lane.b32.xlu1 %v3880_v57, %s3628_s17 }
 0x20a   :  { %885 = vrot.lane.b32.xlu0 %v3884_v60, %s3628_s17 }
 0x20d   :  { %879 = vrot.lane.b32.xlu1 %v3882_v58, %s3628_s17 }
 0x20e   :  { %877 = vrot.lane.b32.xlu0 %v3876_v55, %s3628_s17 }
 0x211   :  { %875 = vrot.lane.b32.xlu1 %v3878_v56, %s3628_s17 }
 0x212   :  { %873 = vrot.lane.b32.xlu0 %v3872_v53, %s3628_s17 }
 0x215   :  { %871 = vrot.lane.b32.xlu1 %v3874_v54, %s3628_s17 }
 0x251   :  { %v654_v3 = vpop.xlane.xlu1 %653  ;;  %v626_v4 = vpop.xlane.xlu0 %625 }
 0x252   :  { %v634_v7 = vsub.f32 %v3936_v28, %v626_v4  ;;  %v662_v9 = vsub.f32 %v3936_v28, %v654_v3 }
 0x255   :  { %v668_v5 = vpop.xlane.xlu1 %667  ;;  %v640_v6 = vpop.xlane.xlu0 %639 }
 0x256   :  { %v648_v8 = vsub.f32 %v3936_v28, %v640_v6  ;;  %v676_v14 = vsub.f32 %v3936_v28, %v668_v5 }
 0x258   :  { %v735_v10 = vsel %vm623_vm5, %v634_v7, %v648_v8 }
 0x259   :  { %v739_v11 = vsel %vm738_vm13, %v735_v10, %v662_v9  ;;  %v696_v12 = vpop.xlane.xlu1 %695  ;;  %v682_v13 = vpop.xlane.xlu0 %681 }
 0x25a   :  { %v690_v15 = vsub.f32 %v3936_v28, %v682_v13  ;;  %v743_v16 = vsel %vm742_vm12, %v739_v11, %v676_v14  ;;  %v704_v19 = vsub.f32 %v3936_v28, %v696_v12 }
 0x25c   :  { %v747_v20 = vsel %vm746_vm11, %v743_v16, %v690_v15 }
 0x25d   :  { %v710_v17 = vpop.xlane.xlu1 %709  ;;  %v643_v18 = vpop.xlane.xlu0 %642  ;;  %v751_v24 = vsel %vm750_vm14, %v747_v20, %v704_v19  ;;  %v176_v20 = vld [vmem:[%s5236_s9 + $0xe0] sm:$0xff] }
 0x25e   :  { %v718_v21 = vsub.f32 %v3936_v28, %v710_v17  ;;  %v649_v33 = vsub.f32 %v3942_v32, %v643_v18 }
 0x260   :  { %v755_v26 = vsel %vm754_vm9, %v751_v24, %v718_v21 }
 0x261   :  { %v724_v22 = vpop.xlane.xlu1 %723  ;;  %v657_v23 = vpop.xlane.xlu0 %656 }
 0x262   :  { %v732_v25 = vsub.f32 %v3936_v28, %v724_v22  ;;  %v663_v35 = vsub.f32 %v3942_v32, %v657_v23  ;;  %v178_v22 = vld [vmem:[%s5236_s9 + $0xf0] sm:$0xff] }
 0x264   :  { %v759_v27 = vsel %vm5250_vm15, %v755_v26, %v732_v25  ;;  %v179_v25 = vld [vmem:[%s5236_s9 + $0xf8] sm:$0xff] }
 0x265   :  { %v762_v29 = vmul.f32 1.442695, %v759_v27  ;;  %v671_v30 = vpop.xlane.xlu0 %670  ;;  %v629_v31 = vpop.xlane.xlu1 %628 }
 0x266   :  { %v635_v34 = vsub.f32 %v3942_v32, %v629_v31  ;;  %v677_v40 = vsub.f32 %v3942_v32, %v671_v30  ;;  %v172_v30 = vld [vmem:[%s5236_s9 + $0xc0] sm:$0xff] }
 0x267   :  { %3457 = vpow2.f32 %v762_v29 }
 0x268   :  { %v736_v37 = vsel %vm623_vm5, %v635_v34, %v649_v33  ;;  %v173_v33 = vld [vmem:[%s5236_s9 + $0xc8] sm:$0xff] }
 0x269   :  { %v740_v38 = vsel %vm738_vm13, %v736_v37, %v663_v35  ;;  %v685_v39 = vpop.xlane.xlu0 %684  ;;  %v699_v28 = vpop.xlane.xlu1 %698 }
 0x26a   :  { %v691_v41 = vsub.f32 %v3942_v32, %v685_v39  ;;  %v744_v42 = vsel %vm742_vm12, %v740_v38, %v677_v40  ;;  %v705_v45 = vsub.f32 %v3942_v32, %v699_v28  ;;  %v168_v39 = vld [vmem:[%s5236_s9 + $0xa0] sm:$0xff]  ;;  %v170_v28 = vld [vmem:[%s5236_s9 + $0xb0] sm:$0xff] }
 0x26c   :  { %v748_v46 = vsel %vm746_vm11, %v744_v42, %v691_v41  ;;  %v169_v41 = vld [vmem:[%s5236_s9 + $0xa8] sm:$0xff]  ;;  %v171_v42 = vld [vmem:[%s5236_s9 + $0xb8] sm:$0xff] }
 0x26d   :  { %v713_v43 = vpop.xlane.xlu1 %712  ;;  %v647_v44 = vpop.xlane.xlu0 %646  ;;  %v752_v50 = vsel %vm750_vm14, %v748_v46, %v705_v45 }
 0x26e   :  { %v719_v47 = vsub.f32 %v3942_v32, %v713_v43  ;;  %v650_v3 = vsub.f32 %v3948_v36, %v647_v44 }
 0x270   :  { %v756_v52 = vsel %vm754_vm9, %v752_v50, %v719_v47 }
 0x271   :  { %v727_v48 = vpop.xlane.xlu1 %726  ;;  %v661_v49 = vpop.xlane.xlu0 %660 }
 0x272   :  { %v733_v51 = vsub.f32 %v3942_v32, %v727_v48  ;;  %v664_v32 = vsub.f32 %v3948_v36, %v661_v49 }
 0x274   :  { %v4035_v59 = vpop.eup %3457  ;;  %v760_v61 = vsel %vm5250_vm15, %v756_v52, %v733_v51 }
 0x275   :  { %v764_v62 = vmul.f32 1.442695, %v760_v61  ;;  %3249 = vmatmul.mubr.msk.f32.vlgmr.msra.gmra.mxu0 %vm184_vm3, %v4035_v59  ;;  %v675_v0 = vpop.xlane.xlu0 %674  ;;  %v633_v1 = vpop.xlane.xlu1 %632  ;;  %v164_v61 = vld [vmem:[%s5236_s9 + $0x80] sm:$0xff] }
 0x276   :  { %v636_v4 = vsub.f32 %v3948_v36, %v633_v1  ;;  %3251 = vmatprep.mubr.msk.f32.mxu0 %vm3627_vm2, %v3626_v2  ;;  %v678_v5 = vsub.f32 %v3948_v36, %v675_v0  ;;  %v165_v0 = vld [vmem:[%s5236_s9 + $0x88] sm:$0xff]  ;;  %v167_v1 = vld [vmem:[%s5236_s9 + $0x98] sm:$0xff] }
 0x277   :  { %3459 = vpow2.f32 %v764_v62  ;;  %v166_v62 = vld [vmem:[%s5236_s9 + $0x90] sm:$0xff] }
 0x278   :  { %v737_v6 = vsel %vm623_vm5, %v636_v4, %v650_v3  ;;  %v160_v3 = vld [vmem:[%s5236_s9 + $0x60] sm:$0xff]  ;;  %v162_v4 = vld [vmem:[%s5236_s9 + $0x70] sm:$0xff] }
 0x279   :  { %v741_v7 = vsel %vm738_vm13, %v737_v6, %v664_v32  ;;  %v689_v8 = vpop.xlane.xlu0 %688  ;;  %v703_v9 = vpop.xlane.xlu1 %702 }
 0x27a   :  { %v692_v10 = vsub.f32 %v3948_v36, %v689_v8  ;;  %v745_v11 = vsel %vm742_vm12, %v741_v7, %v678_v5  ;;  %v706_v12 = vsub.f32 %v3948_v36, %v703_v9  ;;  %v161_v8 = vld [vmem:[%s5236_s9 + $0x68] sm:$0xff]  ;;  %v163_v9 = vld [vmem:[%s5236_s9 + $0x78] sm:$0xff] }
 0x27c   :  { %v749_v13 = vsel %vm746_vm11, %v745_v11, %v692_v10 }
 0x27d   :  { %v717_v14 = vpop.xlane.xlu0 %716  ;;  %v731_v15 = vpop.xlane.xlu1 %730  ;;  %v753_v18 = vsel %vm750_vm14, %v749_v13, %v706_v12  ;;  %v157_v12 = vld [vmem:[%s5236_s9 + $0x48] sm:$0xff] }
 0x27e   :  { %v720_v16 = vsub.f32 %v3948_v36, %v717_v14  ;;  %v734_v17 = vsub.f32 %v3948_v36, %v731_v15  ;;  %v177_v36 = vld [vmem:[%s5236_s9 + $0xe8] sm:$0xff]  ;;  %v158_v15 = vld [vmem:[%s5236_s9 + $0x50] sm:$0xff] }
 0x280   :  { %v757_v19 = vsel %vm754_vm9, %v753_v18, %v720_v16 }
 0x281   :  { %v761_v21 = vsel %vm5250_vm15, %v757_v19, %v734_v17  ;;  %v886_v23 = vpop.permute.xlu0 %885  ;;  %v884_v24 = vpop.permute.xlu1 %883  ;;  %v159_v17 = vld [vmem:[%s5236_s9 + $0x58] sm:$0xff]  ;;  %vm1112_vm15 = vcmask 516096  }
 0x282   :  { %v766_v26 = vmul.f32 1.442695, %v761_v21  ;;  %v902_v27 = vsel %vm184_vm3, %v3884_v60, %v886_v23  ;;  %v901_v31 = vsel %vm184_vm3, %v3886_v63, %v884_v24  ;;  %v174_v60 = vld [vmem:[%s5236_s9 + $0xd0] sm:$0xff]  ;;  %v175_v63 = vld [vmem:[%s5236_s9 + $0xd8] sm:$0xff]  ;;  %v152_v21 = vld [vmem:[%s5236_s9 + $0x20] sm:$0xff] }
 0x283   :  { %v931_v29 = vmul.f32 %v902_v27, %v176_v20  ;;  %v933_v35 = vmul.f32 %v902_v27, %v178_v22  ;;  %v932_v37 = vmul.f32 %v902_v27, %v177_v36  ;;  %v934_v38 = vmul.f32 %v902_v27, %v179_v25  ;;  %v153_v36 = vld [vmem:[%s5236_s9 + $0x28] sm:$0xff] }
 0x284   :  { %v4079_v34 = vpop.eup %3459  ;;  %3461 = vpow2.f32 %v766_v26  ;;  %v928_v45 = vmul.f32 %v901_v31, %v173_v33  ;;  %v927_v46 = vmul.f32 %v901_v31, %v172_v30  ;;  %v929_v47 = vmul.f32 %v901_v31, %v174_v60  ;;  %v148_v26 = vld [vmem:[%s5236_s9] sm:$0xff]  ;;  %v149_v27 = vld [vmem:[%s5236_s9 + $0x8] sm:$0xff]  ;;  %v154_v30 = vld [vmem:[%s5236_s9 + $0x30] sm:$0xff] }
 0x285   :  { %3252 = vmatmul.mubr.msk.f32.gmra.mxu0 %vm184_vm3, %v4079_v34  ;;  %v882_v40 = vpop.permute.xlu1 %881  ;;  %960 = vmatprep.subr.mxu1 %v932_v37  ;;  %v878_v43 = vpop.permute.xlu0 %877  ;;  %v930_v49 = vmul.f32 %v901_v31, %v175_v63  ;;  %v150_v31 = vld [vmem:[%s5236_s9 + $0x10] sm:$0xff] }
 0x286   :  { %1043 = vmatprep.subr.mxu0 %v934_v38  ;;  %v900_v44 = vsel %vm184_vm3, %v3880_v57, %v882_v40  ;;  %961 = vmatpush1.msra.mxu1 %v931_v29  ;;  %v898_v32 = vsel %vm184_vm3, %v3876_v55, %v878_v43 }
 0x287   :  { %v923_v48 = vmul.f32 %v900_v44, %v168_v39  ;;  %v925_v50 = vmul.f32 %v900_v44, %v170_v28  ;;  %1044 = vmatpush1.msra.mxu0 %v933_v35  ;;  %962 = vmatprep.subr.mxu1 %v928_v45  ;;  %v924_v51 = vmul.f32 %v900_v44, %v169_v41  ;;  %v151_v35 = vld [vmem:[%s5236_s9 + $0x18] sm:$0xff] }
 0x288   :  { %v926_v52 = vmul.f32 %v900_v44, %v171_v42  ;;  %1045 = vmatprep.subr.mxu0 %v930_v49  ;;  %963 = vmatpush1.msra.mxu1 %v927_v46  ;;  %v915_v13 = vmul.f32 %v898_v32, %v160_v3  ;;  %v917_v14 = vmul.f32 %v898_v32, %v162_v4 }
 0x289   :  { %v880_v57 = vpop.permute.xlu1 %879  ;;  %1046 = vmatpush1.msra.mxu0 %v929_v47  ;;  %964 = vmatprep.subr.mxu1 %v924_v51  ;;  %v874_v10 = vpop.permute.xlu0 %873  ;;  %v916_v19 = vmul.f32 %v898_v32, %v161_v8  ;;  %v918_v20 = vmul.f32 %v898_v32, %v163_v9  ;;  %v98_v8 = vld [vmem:[%s5237_s5 + $0xf8] sm:$0xff] }
 0x28a   :  { %v899_v5 = vsel %vm184_vm3, %v3882_v58, %v880_v57  ;;  %1047 = vmatprep.subr.mxu0 %v926_v52  ;;  %965 = vmatpush1.msra.mxu1 %v923_v48  ;;  %v156_v58 = vld [vmem:[%s5236_s9 + $0x40] sm:$0xff]  ;;  %v896_v22 = vsel %vm184_vm3, %v3872_v53, %v874_v10  ;;  %v155_v53 = vld [vmem:[%s5236_s9 + $0x38] sm:$0xff]  ;;  %v97_v10 = vld [vmem:[%s5237_s5 + $0xf0] sm:$0xff] }
 0x28b   :  { %v919_v6 = vmul.f32 %v899_v5, %v164_v61  ;;  %v921_v7 = vmul.f32 %v899_v5, %v166_v62  ;;  %1048 = vmatpush1.msra.mxu0 %v925_v50  ;;  %v920_v55 = vmul.f32 %v899_v5, %v165_v0  ;;  %v922_v11 = vmul.f32 %v899_v5, %v167_v1  ;;  %v82_v9 = vld [vmem:[%s5237_s5 + $0x78] sm:$0xff] }
 0x28c   :  { %3254 = vmatprep.mubr.msk.f32.mxu0 %vm3627_vm2, %v3626_v2  ;;  %v907_v60 = vmul.f32 %v896_v22, %v152_v21  ;;  %v908_v38 = vmul.f32 %v896_v22, %v153_v36  ;;  %v910_v63 = vmul.f32 %v896_v22, %v155_v53  ;;  %v909_v40 = vmul.f32 %v896_v22, %v154_v30  ;;  %v128_v21 = vld [vmem:[%s5237_s5 + $0x1e8] sm:$0xff]  ;;  %v77_v22 = vld [vmem:[%s5237_s5 + $0x50] sm:$0xff]  ;;  %v127_v36 = vld [vmem:[%s5237_s5 + $0x1e0] sm:$0xff] }
 0x28d   :  { %v876_v16 = vpop.permute.xlu1 %875  ;;  %966 = vmatprep.subr.mxu1 %v920_v55  ;;  %1049 = vmatprep.subr.mxu0 %v922_v11  ;;  %v81_v55 = vld [vmem:[%s5237_s5 + $0x70] sm:$0xff]  ;;  %v96_v11 = vld [vmem:[%s5237_s5 + $0xe8] sm:$0xff]  ;;  %v126_v53 = vld [vmem:[%s5237_s5 + $0x1d8] sm:$0xff] }
 0x28e   :  { %v897_v18 = vsel %vm184_vm3, %v3878_v56, %v876_v16  ;;  %967 = vmatpush1.msra.mxu1 %v919_v6  ;;  %1050 = vmatpush1.msra.mxu0 %v921_v7  ;;  %v114_v16 = vld [vmem:[%s5237_s5 + $0x178] sm:$0xff] }
 0x28f   :  { %v911_v23 = vmul.f32 %v897_v18, %v156_v58  ;;  %v912_v24 = vmul.f32 %v897_v18, %v157_v12  ;;  %v913_v25 = vmul.f32 %v897_v18, %v158_v15  ;;  %968 = vmatprep.subr.mxu1 %v916_v19  ;;  %1051 = vmatprep.subr.mxu0 %v918_v20  ;;  %v80_v58 = vld [vmem:[%s5237_s5 + $0x68] sm:$0xff]  ;;  %v95_v12 = vld [vmem:[%s5237_s5 + $0xe0] sm:$0xff]  ;;  %v130_v15 = vld [vmem:[%s5237_s5 + $0x1f8] sm:$0xff] }
 0x290   :  { %v914_v56 = vmul.f32 %v897_v18, %v159_v17  ;;  %969 = vmatpush1.msra.mxu1 %v915_v13  ;;  %1052 = vmatpush1.msra.mxu0 %v917_v14  ;;  %v79_v13 = vld [vmem:[%s5237_s5 + $0x60] sm:$0xff]  ;;  %v94_v14 = vld [vmem:[%s5237_s5 + $0xd8] sm:$0xff]  ;;  %v129_v18 = vld [vmem:[%s5237_s5 + $0x1f0] sm:$0xff] }
 0x291   :  { %v3462_v29 = vpop.eup %3461  ;;  %v872_v33 = vpop.permute.xlu1 %871  ;;  %970 = vmatprep.subr.mxu1 %v912_v24  ;;  %v78_v17 = vld [vmem:[%s5237_s5 + $0x58] sm:$0xff]  ;;  %v93_v19 = vld [vmem:[%s5237_s5 + $0xd0] sm:$0xff]  ;;  %v92_v24 = vld [vmem:[%s5237_s5 + $0xc8] sm:$0xff] }
 0x292   :  { %1053 = vmatprep.subr.mxu0 %v914_v56  ;;  %v895_v37 = vsel %vm184_vm3, %v3874_v54, %v872_v33  ;;  %3255 = vmatmul.mubr.msk.f32.gmra.mxu0 %vm184_vm3, %v3462_v29  ;;  %v113_v20 = vld [vmem:[%s5237_s5 + $0x170] sm:$0xff]  ;;  %v111_v56 = vld [vmem:[%s5237_s5 + $0x160] sm:$0xff]  ;;  %v90_v30 = vld [vmem:[%s5237_s5 + $0xb8] sm:$0xff] }
 0x293   :  { %v903_v39 = vmul.f32 %v895_v37, %v148_v26  ;;  %971 = vmatpush1.msra.mxu1 %v911_v23  ;;  %v904_v28 = vmul.f32 %v895_v37, %v149_v27  ;;  %v905_v41 = vmul.f32 %v895_v37, %v150_v31  ;;  %1054 = vmatpush1.msra.mxu0 %v913_v25  ;;  %v112_v23 = vld [vmem:[%s5237_s5 + $0x168] sm:$0xff]  ;;  %v91_v26 = vld [vmem:[%s5237_s5 + $0xc0] sm:$0xff]  ;;  %v125_v31 = vld [vmem:[%s5237_s5 + $0x1d0] sm:$0xff] }
 0x294   :  { %972 = vmatprep.subr.mxu1 %v908_v38  ;;  %v906_v42 = vmul.f32 %v895_v37, %v151_v35  ;;  %1055 = vmatprep.subr.mxu0 %v910_v63  ;;  %v76_v25 = vld [vmem:[%s5237_s5 + $0x48] sm:$0xff]  ;;  %v75_v27 = vld [vmem:[%s5237_s5 + $0x40] sm:$0xff]  ;;  %v74_v33 = vld [vmem:[%s5237_s5 + $0x38] sm:$0xff] }
 0x295   :  { %973 = vmatpush1.msra.mxu1 %v907_v60  ;;  %1056 = vmatpush1.msra.mxu0 %v909_v40  ;;  %v109_v35 = vld [vmem:[%s5237_s5 + $0x150] sm:$0xff]  ;;  %v88_v38 = vld [vmem:[%s5237_s5 + $0xa8] sm:$0xff]  ;;  %v87_v63 = vld [vmem:[%s5237_s5 + $0xa0] sm:$0xff] }
 0x296   :  { %974 = vmatprep.subr.mxu1 %v904_v28  ;;  %1057 = vmatprep.subr.mxu0 %v906_v42  ;;  %v89_v60 = vld [vmem:[%s5237_s5 + $0xb0] sm:$0xff]  ;;  %v71_v28 = vld [vmem:[%s5237_s5 + $0x20] sm:$0xff]  ;;  %v86_v40 = vld [vmem:[%s5237_s5 + $0x98] sm:$0xff] }
 0x297   :  { %975 = vmatpush1.msra.mxu1 %v903_v39  ;;  %1058 = vmatpush1.msra.mxu0 %v905_v41  ;;  %v73_v37 = vld [vmem:[%s5237_s5 + $0x30] sm:$0xff]  ;;  %v72_v39 = vld [vmem:[%s5237_s5 + $0x28] sm:$0xff]  ;;  %v70_v41 = vld [vmem:[%s5237_s5 + $0x18] sm:$0xff] }
 0x298   :  { %1091 = vmatprep.mubr.f32.mxu0 %v3626_v2  ;;  %2888 = vmatprep.subr.mxu1 %v98_v8  ;;  %v85_v42 = vld [vmem:[%s5237_s5 + $0x90] sm:$0xff] }
 0x299   :  { %2929 = vmatprep.subr.mxu0 %v130_v15  ;;  %v119_v15 = vld [vmem:[%s5237_s5 + $0x1a0] sm:$0xff] }
 0x335   :  { %v843_v54 = vpop.f32.mrf.mxu0 }
 0x336   :  { %3463 = vrcp.f32 %v843_v54  ;;  %v69_v54 = vld [vmem:[%s5237_s5 + $0x10] sm:$0xff] }
 0x337   :  { %v3250_v43 = vpop.f32.mrf.mxu0 }
 0x338   :  { %v84_v43 = vld [vmem:[%s5237_s5 + $0x88] sm:$0xff] }
 0x343   :  { %v3464_v44 = vpop.eup %3463 }
 0x344   :  { %v860_v45 = vmul.f32 %v3464_v44, %v4035_v59 }
 0x345   :  { %v848_v46 = vpop.f32.mrf.mxu0 }
 0x346   :  { %3465 = vrcp.f32 %v848_v46  ;;  %2784 = vmatmul.mubr.msk.f32.vlgmr.msra.gmra.mxu1 %vm184_vm3, %v860_v45  ;;  %2787 = vmatmul.mubr.msk.f32.vlgmr.msra.gmra.mxu0 %vm184_vm3, %v860_v45 }
 0x347   :  { %v3253_v47 = vpop.f32.mrf.mxu0  ;;  %1014 = vmatprep.mubr.f32.mxu1 %v3626_v2  ;;  %1097 = vmatprep.mubr.f32.mxu0 %v3626_v2 }
 0x348   :  { %2889 = vmatpush3.msra.mxu1 %v82_v9  ;;  %2930 = vmatpush3.msra.mxu0 %v114_v16  ;;  %v105_v9 = vld [vmem:[%s5237_s5 + $0x130] sm:$0xff] }
 0x349   :  { %2890 = vmatprep.subr.mxu1 %v97_v10  ;;  %2931 = vmatprep.subr.mxu0 %v129_v18 }
 0x34a   :  { %2891 = vmatpush3.msra.mxu1 %v81_v55  ;;  %2932 = vmatpush3.msra.mxu0 %v113_v20  ;;  %v102_v20 = vld [vmem:[%s5237_s5 + $0x118] sm:$0xff] }
 0x34b   :  { %2892 = vmatprep.subr.mxu1 %v96_v11  ;;  %2933 = vmatprep.subr.mxu0 %v128_v21  ;;  %v120_v11 = vld [vmem:[%s5237_s5 + $0x1a8] sm:$0xff]  ;;  %v117_v21 = vld [vmem:[%s5237_s5 + $0x190] sm:$0xff] }
 0x34c   :  { %2893 = vmatpush3.msra.mxu1 %v80_v58  ;;  %2934 = vmatpush3.msra.mxu0 %v112_v23  ;;  %v101_v23 = vld [vmem:[%s5237_s5 + $0x110] sm:$0xff] }
 0x34d   :  { %2894 = vmatprep.subr.mxu1 %v95_v12  ;;  %2935 = vmatprep.subr.mxu0 %v127_v36 }
 0x34e   :  { %2895 = vmatpush3.msra.mxu1 %v79_v13  ;;  %2936 = vmatpush3.msra.mxu0 %v111_v56  ;;  %v104_v13 = vld [vmem:[%s5237_s5 + $0x128] sm:$0xff] }
 0x34f   :  { %2896 = vmatprep.subr.mxu1 %v94_v14  ;;  %2937 = vmatprep.subr.mxu0 %v126_v53 }
 0x350   :  { %2897 = vmatpush3.msra.mxu1 %v78_v17  ;;  %v103_v17 = vld [vmem:[%s5237_s5 + $0x120] sm:$0xff] }
 0x351   :  { %2898 = vmatprep.subr.mxu1 %v93_v19  ;;  %v118_v19 = vld [vmem:[%s5237_s5 + $0x198] sm:$0xff] }
 0x352   :  { %v853_v49 = vpop.f32.mrf.mxu0  ;;  %2899 = vmatpush3.msra.mxu1 %v77_v22 }
 0x353   :  { %v3466_v48 = vpop.eup %3465  ;;  %3467 = vrcp.f32 %v853_v49  ;;  %2900 = vmatprep.subr.mxu1 %v92_v24  ;;  %v68_v49 = vld [vmem:[%s5237_s5 + $0x8] sm:$0xff] }
 0x354   :  { %v861_v50 = vmul.f32 %v3466_v48, %v4079_v34  ;;  %v3256_v51 = vpop.f32.mrf.mxu0  ;;  %2901 = vmatpush3.msra.mxu1 %v76_v25 }
 0x355   :  { %2902 = vmatprep.subr.mxu1 %v91_v26  ;;  %v83_v51 = vld [vmem:[%s5237_s5 + $0x80] sm:$0xff] }
 0x356   :  { %2785 = vmatmul.mubr.msk.f32.gmra.mxu1 %vm184_vm3, %v861_v50  ;;  %2788 = vmatmul.mubr.msk.f32.gmra.mxu0 %vm184_vm3, %v861_v50  ;;  %v124_v50 = vld [vmem:[%s5237_s5 + $0x1c8] sm:$0xff] }
 0x357   :  { %1020 = vmatprep.mubr.f32.mxu1 %v3626_v2  ;;  %1103 = vmatprep.mubr.f32.mxu0 %v3626_v2 }
 0x358   :  { %2903 = vmatpush3.msra.mxu1 %v75_v27 }
 0x359   :  { %2904 = vmatprep.subr.mxu1 %v90_v30 }
 0x35a   :  { %2905 = vmatpush3.msra.mxu1 %v74_v33  ;;  %v116_v33 = vld [vmem:[%s5237_s5 + $0x188] sm:$0xff] }
 0x35b   :  { %2906 = vmatprep.subr.mxu1 %v89_v60  ;;  %v115_v60 = vld [vmem:[%s5237_s5 + $0x180] sm:$0xff] }
 0x35c   :  { %2907 = vmatpush3.msra.mxu1 %v73_v37 }
 0x35d   :  { %2908 = vmatprep.subr.mxu1 %v88_v38 }
 0x35e   :  { %2909 = vmatpush3.msra.mxu1 %v72_v39 }
 0x35f   :  { %2910 = vmatprep.subr.mxu1 %v87_v63 }
 0x360   :  { %v3468_v59 = vpop.eup %3467  ;;  %2911 = vmatpush3.msra.mxu1 %v71_v28  ;;  %v99_v28 = vld [vmem:[%s5237_s5 + $0x100] sm:$0xff] }
 0x361   :  { %v862_v52 = vmul.f32 %v3468_v59, %v3462_v29  ;;  %v110_v29 = vld [vmem:[%s5237_s5 + $0x158] sm:$0xff]  ;;  %2912 = vmatprep.subr.mxu1 %v86_v40  ;;  %v108_v59 = vld [vmem:[%s5237_s5 + $0x148] sm:$0xff] }
 0x362   :  { %2938 = vmatpush3.msra.mxu0 %v110_v29  ;;  %2913 = vmatpush3.msra.mxu1 %v70_v41  ;;  %v4431_v41 = vld [vmem:[%s5229_s0 + $0x28] sm:$0x1] }
 0x363   :  { %2786 = vmatmul.mubr.msk.f32.gmra.mxu1 %vm184_vm3, %v862_v52  ;;  %2789 = vmatmul.mubr.msk.f32.gmra.mxu0 %vm184_vm3, %v862_v52  ;;  %v67_v52 = vld [vmem:[%s5237_s5] sm:$0xff] }
 0x364   :  { %2939 = vmatprep.subr.mxu0 %v125_v31  ;;  %2914 = vmatprep.subr.mxu1 %v85_v42 }
 0x365   :  { %2940 = vmatpush3.msra.mxu0 %v109_v35  ;;  %2915 = vmatpush3.msra.mxu1 %v69_v54  ;;  %v100_v35 = vld [vmem:[%s5237_s5 + $0x108] sm:$0xff] }
 0x366   :  { %2916 = vmatprep.subr.mxu1 %v84_v43  ;;  %2941 = vmatprep.subr.mxu0 %v124_v50 }
 0x367   :  { %2917 = vmatpush3.msra.mxu1 %v68_v49  ;;  %2942 = vmatpush3.msra.mxu0 %v108_v59 }
 0x368   :  { %2918 = vmatprep.subr.mxu1 %v83_v51  ;;  %v3481_v51 = vld [vmem:[%s5232_s3 + $0x38] sm:$0xff] }
 0x369   :  { %2919 = vmatpush3.msra.mxu1 %v67_v52 }
 0x36a   :  { %3257 = vmatprep.subr.mxu1 %v3626_v2 }
 0x406   :  { %v1010_v61 = vpop.f32.mrf.mxu1  ;;  %v1093_v62 = vpop.f32.mrf.mxu0 }
 0x407   :  { %1110 = vst.msk [vmem:[#allocation2] sm:$0xff] %vm184_vm3, %v1010_v61  ;;  %1147 = vst.msk [vmem:[#allocation2 + $0x44] sm:$0xff] %vm184_vm3, %v1093_v62  ;;  %1117 = vrot.lane.b32.xlu0 %v1010_v61, %s3628_s17  ;;  %v123_v61 = vld [vmem:[%s5237_s5 + $0x1c0] sm:$0xff] }
 0x408   :  { %v1012_v34 = vpop.f32.mrf.mxu1  ;;  %v1095_v57 = vpop.f32.mrf.mxu0  ;;  %2943 = vmatprep.subr.mxu0 %v123_v61  ;;  %v3482_v61 = vld [vmem:[%s5232_s3 + $0x30] sm:$0xff] }
 0x409   :  { %1129 = vst.msk [vmem:[#allocation2 + $0x22] sm:$0xff] %vm184_vm3, %v1012_v34  ;;  %1165 = vst.msk [vmem:[#allocation2 + $0x66] sm:$0xff] %vm184_vm3, %v1095_v57 }
 0x40b   :  { %1135 = vrot.lane.b32.xlu0 %v1012_v34, %s3628_s17  ;;  %v107_v34 = vld [vmem:[%s5237_s5 + $0x140] sm:$0xff] }
 0x40c   :  { %2944 = vmatpush3.msra.mxu0 %v107_v34 }
 0x416   :  { %v1016_v0 = vpop.f32.mrf.mxu1  ;;  %v1099_v1 = vpop.f32.mrf.mxu0 }
 0x417   :  { %1111 = vst.msk [vmem:[#allocation2 + $0x8] sm:$0xff] %vm184_vm3, %v1016_v0  ;;  %1148 = vst.msk [vmem:[#allocation2 + $0x4c] sm:$0xff] %vm184_vm3, %v1099_v1  ;;  %1119 = vrot.lane.b32.xlu1 %v1016_v0, %s3628_s17  ;;  %v122_v0 = vld [vmem:[%s5237_s5 + $0x1b8] sm:$0xff] }
 0x418   :  { %v1018_v3 = vpop.f32.mrf.mxu1  ;;  %v1101_v4 = vpop.f32.mrf.mxu0  ;;  %2945 = vmatprep.subr.mxu0 %v122_v0 }
 0x419   :  { %1130 = vst.msk [vmem:[#allocation2 + $0x2a] sm:$0xff] %vm184_vm3, %v1018_v3  ;;  %1166 = vst.msk [vmem:[#allocation2 + $0x6e] sm:$0xff] %vm184_vm3, %v1101_v4 }
 0x41b   :  { %1137 = vrot.lane.b32.xlu1 %v1018_v3, %s3628_s17 }
 0x423   :  { %v1022_v32 = vpop.f32.mrf.mxu1  ;;  %v4201_v5 = vpop.f32.mrf.mxu0 }
 0x424   :  { %1113 = vst.msk [vmem:[#allocation2 + $0x10] sm:$0x1] %vm1112_vm15, %v1022_v32  ;;  %1149 = vst.msk [vmem:[#allocation2 + $0x54] sm:$0x1] %vm1112_vm15, %v4201_v5  ;;  %1121 = vrot.lane.b32.xlu0 %v1022_v32, %s3628_s17 }
 0x425   :  { %v1024_v6 = vpop.f32.mrf.mxu1  ;;  %v4207_v7 = vpop.f32.mrf.mxu0 }
 0x426   :  { %1131 = vst.msk [vmem:[#allocation2 + $0x32] sm:$0x1] %vm1112_vm15, %v1024_v6  ;;  %1167 = vst.msk [vmem:[#allocation2 + $0x76] sm:$0x1] %vm1112_vm15, %v4207_v7  ;;  %1139 = vrot.lane.b32.xlu1 %v1024_v6, %s3628_s17  ;;  %v121_v6 = vld [vmem:[%s5237_s5 + $0x1b0] sm:$0xff] }
 0x428   :  { %1153 = vrot.lane.b32.xlu0 %v1093_v62, %s3628_s17 }
 0x42a   :  { %1155 = vrot.lane.b32.xlu1 %v1099_v1, %s3628_s17  ;;  %v106_v1 = vld [vmem:[%s5237_s5 + $0x138] sm:$0xff] }
 0x42b   :  { %2946 = vmatpush3.msra.mxu0 %v106_v1 }
 0x42c   :  { %1171 = vrot.lane.b32.xlu0 %v1095_v57, %s3628_s17  ;;  %2947 = vmatprep.subr.mxu0 %v121_v6  ;;  %v3483_v6 = vld [vmem:[%s5232_s3 + $0x28] sm:$0xff] }
 0x42d   :  { %2948 = vmatpush3.msra.mxu0 %v105_v9 }
 0x42e   :  { %1173 = vrot.lane.b32.xlu1 %v1101_v4, %s3628_s17  ;;  %2949 = vmatprep.subr.mxu0 %v120_v11 }
 0x42f   :  { %2950 = vmatpush3.msra.mxu0 %v104_v13 }
 0x430   :  { %2951 = vmatprep.subr.mxu0 %v119_v15 }
 0x431   :  { %2952 = vmatpush3.msra.mxu0 %v103_v17 }
 0x432   :  { %2953 = vmatprep.subr.mxu0 %v118_v19 }
 0x433   :  { %2954 = vmatpush3.msra.mxu0 %v102_v20 }
 0x434   :  { %2955 = vmatprep.subr.mxu0 %v117_v21 }
 0x435   :  { %2956 = vmatpush3.msra.mxu0 %v101_v23 }
 0x436   :  { %2957 = vmatprep.subr.mxu0 %v116_v33 }
 0x437   :  { %2958 = vmatpush3.msra.mxu0 %v100_v35  ;;  %v3488_v35 = vld [vmem:[%s5232_s3] sm:$0xff] }
 0x438   :  { %2959 = vmatprep.subr.mxu0 %v115_v60 }
 0x439   :  { %2960 = vmatpush3.msra.mxu0 %v99_v28 }
 0x43a   :  { %3282 = vmatprep.subr.msk.mxu0 %vm299_vm0, %v4431_v41 }
 0x479   :  { %v1118_v44 = vpop.permute.xlu0 %1117 }
 0x47a   :  { %1126 = vst.msk [vmem:[#allocation2 + $0x11] sm:$0xff] %vm184_vm3, %v1118_v44 }
 0x47d   :  { %v1136_v45 = vpop.permute.xlu0 %1135 }
 0x47e   :  { %1144 = vst.msk [vmem:[#allocation2 + $0x33] sm:$0xff] %vm184_vm3, %v1136_v45 }
 0x485   :  { %v1204_v44 = vld [vmem:[#allocation2 + $0x2] ss:$8 sm:$0xf0] }
 0x489   :  { %v1120_v46 = vpop.permute.xlu1 %1119 }
 0x48a   :  { %1127 = vst.msk [vmem:[#allocation2 + $0x19] sm:$0xff] %vm184_vm3, %v1120_v46 }
 0x48d   :  { %v1138_v47 = vpop.permute.xlu1 %1137 }
 0x48e   :  { %1145 = vst.msk [vmem:[#allocation2 + $0x3b] sm:$0xff] %vm184_vm3, %v1138_v47 }
 0x491   :  { %v1193_v4 = vld [vmem:[#allocation2 + $0x1] ss:$8 sm:$0xf]  ;;  %v1213_v8 = vld [vmem:[#allocation2 + $0x3] ss:$8 sm:$0xf] }
 0x492   :  { %v1233_v37 = vld [vmem:[#allocation2 + $0x5] ss:$8 sm:$0xf]  ;;  %v1253_v38 = vld [vmem:[#allocation2 + $0x7] ss:$8 sm:$0xf] }
 0x493   :  { %v1203_v42 = vld [vmem:[#allocation2 + $0x2] ss:$8 sm:$0xf]  ;;  %v1184_v54 = vld [vmem:[#allocation2] ss:$8 sm:$0xf0] }
 0x494   :  { %v1243_v21 = vld [vmem:[#allocation2 + $0x6] ss:$8 sm:$0xf] }
 0x495   :  { %v1214_v32 = vld [vmem:[#allocation2 + $0x3] ss:$8 sm:$0xf0]  ;;  %v1234_v30 = vld [vmem:[#allocation2 + $0x5] ss:$8 sm:$0xf0] }
 0x496   :  { %v1122_v48 = vpop.permute.xlu0 %1121  ;;  %v1215_v12 = vor.u32 %v1214_v32, %v1213_v8  ;;  %v1254_v31 = vld [vmem:[#allocation2 + $0x7] ss:$8 sm:$0xf0]  ;;  %v1235_v39 = vor.u32 %v1234_v30, %v1233_v37  ;;  %v1244_v15 = vld [vmem:[#allocation2 + $0x6] ss:$8 sm:$0xf0] }
 0x497   :  { %1128 = vst.msk [vmem:[#allocation2 + $0x21] sm:$0x1] %vm1112_vm15, %v1122_v48  ;;  %v1255_v63 = vor.u32 %v1254_v31, %v1253_v38  ;;  %v3489_v38 = vld [vmem:[%s5231_s2 + $0x78] sm:$0xff] }
 0x498   :  { %v1140_v62 = vpop.permute.xlu1 %1139 }
 0x499   :  { %1146 = vst.msk [vmem:[#allocation2 + $0x43] sm:$0x1] %vm1112_vm15, %v1140_v62  ;;  %v3412_v40 = vpack.i.bf16 %v1235_v39, %v1255_v63 }
 0x49a   :  { %v1154_v57 = vpop.permute.xlu0 %1153 }
 0x49b   :  { %1162 = vst.msk [vmem:[#allocation2 + $0x55] sm:$0xff] %vm184_vm3, %v1154_v57 }
 0x49c   :  { %v1156_v3 = vpop.permute.xlu1 %1155 }
 0x49d   :  { %1163 = vst.msk [vmem:[#allocation2 + $0x5d] sm:$0xff] %vm184_vm3, %v1156_v3 }
 0x49e   :  { %v1172_v10 = vpop.permute.xlu0 %1171  ;;  %v1194_v55 = vld [vmem:[#allocation2 + $0x1] ss:$8 sm:$0xf0] }
 0x49f   :  { %1180 = vst.msk [vmem:[#allocation2 + $0x77] sm:$0xff] %vm184_vm3, %v1172_v10  ;;  %v1195_v58 = vor.u32 %v1194_v55, %v1193_v4  ;;  %v3484_v55 = vld [vmem:[%s5232_s3 + $0x20] sm:$0xff] }
 0x4a0   :  { %v1174_v14 = vpop.permute.xlu1 %1173 }
 0x4a1   :  { %1181 = vst.msk [vmem:[#allocation2 + $0x7f] sm:$0xff] %vm184_vm3, %v1174_v14  ;;  %v3397_v16 = vpack.i.bf16 %v1195_v58, %v1215_v12  ;;  %v3485_v14 = vld [vmem:[%s5232_s3 + $0x18] sm:$0xff] }
 0x4a2   :  { %v1197_v18 = vld [vmem:[#allocation2 + $0x41] ss:$8 sm:$0xf]  ;;  %v1217_v22 = vld [vmem:[#allocation2 + $0x43] ss:$8 sm:$0xf] }
 0x4a3   :  { %3398 = vrot.lane.b32.xlu0 %v3397_v16, %s3628_s17  ;;  %v1207_v52 = vld [vmem:[#allocation2 + $0x42] ss:$8 sm:$0xf]  ;;  %v1187_v0 = vld [vmem:[#allocation2 + $0x40] ss:$8 sm:$0xf] }
 0x4a4   :  { %v1224_v16 = vld [vmem:[#allocation2 + $0x4] ss:$8 sm:$0xf0]  ;;  %v1257_v33 = vld [vmem:[#allocation2 + $0x47] ss:$8 sm:$0xf] }
 0x4a6   :  { %v1198_v24 = vld [vmem:[#allocation2 + $0x41] ss:$8 sm:$0xf0]  ;;  %v1218_v36 = vld [vmem:[#allocation2 + $0x43] ss:$8 sm:$0xf0] }
 0x4a7   :  { %v1199_v25 = vor.u32 %v1198_v24, %v1197_v18  ;;  %v1219_v56 = vor.u32 %v1218_v36, %v1217_v22  ;;  %v1208_v50 = vld [vmem:[#allocation2 + $0x42] ss:$8 sm:$0xf0]  ;;  %v1188_v59 = vld [vmem:[#allocation2 + $0x40] ss:$8 sm:$0xf0]  ;;  %v1245_v36 = vor.u32 %v1244_v15, %v1243_v21 }
 0x4a8   :  { %v1201_v26 = vld [vmem:[#allocation2 + $0x81] ss:$8 sm:$0x1]  ;;  %v1221_v53 = vld [vmem:[#allocation2 + $0x83] ss:$8 sm:$0x1]  ;;  %v1209_v57 = vor.u32 %v1208_v50, %v1207_v52  ;;  %v1189_v32 = vor.u32 %v1188_v59, %v1187_v0 }
 0x4a9   :  { %v3407_v27 = vpack.i.bf16 %v1201_v26, %v1221_v53  ;;  %v3402_v29 = vpack.i.bf16 %v1199_v25, %v1219_v56  ;;  %v1211_v12 = vld [vmem:[#allocation2 + $0x82] ss:$8 sm:$0x1]  ;;  %v1191_v17 = vld [vmem:[#allocation2 + $0x80] ss:$8 sm:$0x1] }
 0x4aa   :  { %v3486_v18 = vld [vmem:[%s5232_s3 + $0x10] sm:$0xff]  ;;  %v3487_v56 = vld [vmem:[%s5232_s3 + $0x8] sm:$0xff]  ;;  %v2791_v26 = vld [vmem:[%s5229_s0 + $0x18] sm:$0xff] }
 0x4ab   :  { %3408 = vrot.lane.b32.xlu0 %v3407_v27, %s3628_s17  ;;  %3403 = vrot.lane.b32.xlu1 %v3402_v29, %s3628_s17  ;;  %v1223_v22 = vld [vmem:[#allocation2 + $0x4] ss:$8 sm:$0xf]  ;;  %v1237_v53 = vld [vmem:[#allocation2 + $0x45] ss:$8 sm:$0xf] }
 0x4ac   :  { %v1225_v25 = vor.u32 %v1224_v16, %v1223_v22  ;;  %v1258_v27 = vld [vmem:[#allocation2 + $0x47] ss:$8 sm:$0xf0]  ;;  %v1241_v31 = vld [vmem:[#allocation2 + $0x85] ss:$8 sm:$0x1] }
 0x4ad   :  { %v1259_v28 = vor.u32 %v1258_v27, %v1257_v33  ;;  %v3499_v50 = vld [vmem:[%s5231_s2 + $0x30] sm:$0xff]  ;;  %v3501_v59 = vld [vmem:[%s5231_s2 + $0x20] sm:$0xff]  ;;  %v3502_v52 = vld [vmem:[%s5231_s2 + $0x18] sm:$0xff] }
 0x4ae   :  { %v3506_v0 = vld [vmem:[%s5234_s7 + $0x10] sm:$0xff]  ;;  %v3516_v33 = vld [vmem:[%s5230_s4 + $0x18] sm:$0xff] }
 0x4af   :  { %1157 = vrot.lane.b32.xlu1 %v4201_v5, %s3628_s17  ;;  %1175 = vrot.lane.b32.xlu0 %v4207_v7, %s3628_s17  ;;  %v1183_v5 = vld [vmem:[#allocation2] ss:$8 sm:$0xf]  ;;  %v1205_v7 = vor.u32 %v1204_v44, %v1203_v42  ;;  %v1228_v15 = vld [vmem:[#allocation2 + $0x44] ss:$8 sm:$0xf0] }
 0x4b0   :  { %v1185_v47 = vor.u32 %v1184_v54, %v1183_v5  ;;  %v2792_v42 = vld [vmem:[%s5229_s0 + $0x20] sm:$0xff]  ;;  %v3490_v54 = vld [vmem:[%s5231_s2 + $0x70] sm:$0xff]  ;;  %v3491_v44 = vld [vmem:[%s5231_s2 + $0x68] sm:$0xff] }
 0x4b1   :  { %v3492_v5 = vld [vmem:[%s5234_s7] sm:$0xff] }
 0x4b2   :  { %v1247_v16 = vld [vmem:[#allocation2 + $0x46] ss:$8 sm:$0xf] }
 0x4b3   :  { %3413 = vrot.lane.b32.xlu1 %v3412_v40, %s3628_s17 }
 0x515   :  { %v3399_v43 = vpop.permute.xlu0 %3398 }
 0x516   :  { %v3401_v45 = vunpack.i.h.bf16 %v3399_v43  ;;  %v3400_v46 = vunpack.i.l.bf16 %v3399_v43  ;;  %v4499_v43 = vld [vmem:[%s5233_s1 + $0x1] ss:$0 sm:$0xff] }
 0x518   :  { %v1313_v48 = vsel %vm184_vm3, %v1205_v7, %v3400_v46  ;;  %v1310_v49 = vsel %vm184_vm3, %v1185_v47, %v3401_v45  ;;  %v1696_v45 = vmul.f32 %v3492_v5, %v4499_v43  ;;  %v3493_v46 = vld [vmem:[%s5231_s2 + $0x60] sm:$0xff]  ;;  %v3494_v7 = vld [vmem:[%s5231_s2 + $0x58] sm:$0xff]  ;;  %v3495_v47 = vld [vmem:[%s5231_s2 + $0x50] sm:$0xff] }
 0x519   :  { %1392 = vmatprep.mubr.f32.mxu1 %v1313_v48  ;;  %v3496_v48 = vld [vmem:[%s5231_s2 + $0x48] sm:$0xff] }
 0x51a   :  { %1393 = vmatmul.mubr.f32.vlgmr.msra.gmra.mxu1 %v1310_v49  ;;  %v3498_v49 = vld [vmem:[%s5231_s2 + $0x38] sm:$0xff] }
 0x51b   :  { %3258 = vmatpush3.msra.mxu1 %v3481_v51  ;;  %v3500_v51 = vld [vmem:[%s5231_s2 + $0x28] sm:$0xff] }
 0x51c   :  { %3259 = vmatprep.subr.mxu1 %v3626_v2 }
 0x51d   :  { %3260 = vmatpush3.msra.mxu1 %v3482_v61  ;;  %v3409_v62 = vpop.permute.xlu0 %3408  ;;  %v3404_v34 = vpop.permute.xlu1 %3403  ;;  %v3503_v61 = vld [vmem:[%s5231_s2 + $0x10] sm:$0xff] }
 0x51e   :  { %3261 = vmatprep.subr.mxu1 %v3626_v2  ;;  %v3410_v1 = vunpack.i.l.bf16 %v3409_v62  ;;  %v3406_v3 = vunpack.i.h.bf16 %v3404_v34  ;;  %v3405_v4 = vunpack.i.l.bf16 %v3404_v34  ;;  %v3411_v10 = vunpack.i.h.bf16 %v3409_v62  ;;  %v3504_v62 = vld [vmem:[%s5231_s2 + $0x8] sm:$0xff] }
 0x51f   :  { %3262 = vmatpush3.msra.mxu1 %v3483_v6  ;;  %v3505_v34 = vld [vmem:[%s5234_s7 + $0x8] sm:$0xff]  ;;  %v3509_v6 = vld [vmem:[%s5234_s7 + $0x20] sm:$0xff] }
 0x520   :  { %3263 = vmatprep.subr.mxu1 %v3626_v2  ;;  %v1314_v8 = vsel %vm184_vm3, %v1209_v57, %v3405_v4  ;;  %v1311_v9 = vsel %vm184_vm3, %v1189_v32, %v3406_v3  ;;  %v1315_v13 = vsel %vm184_vm3, %v1211_v12, %v3410_v1  ;;  %v1312_v20 = vsel %vm184_vm3, %v1191_v17, %v3411_v10  ;;  %v3507_v3 = vld [vmem:[%s5231_s2] sm:$0xff]  ;;  %v3508_v4 = vld [vmem:[%s5234_s7 + $0x18] sm:$0xff] }
 0x521   :  { %3264 = vmatpush3.msra.mxu1 %v3484_v55  ;;  %1397 = vmatprep.mubr.f32.mxu1 %v1314_v8  ;;  %v1158_v11 = vpop.permute.xlu1 %1157  ;;  %v1176_v58 = vpop.permute.xlu0 %1175  ;;  %v1697_v57 = vmul.f32 %v3505_v34, %v4499_v43  ;;  %v1698_v1 = vmul.f32 %v3506_v0, %v4499_v43  ;;  %v1699_v32 = vmul.f32 %v3508_v4, %v4499_v43  ;;  %v3511_v55 = vld [vmem:[%s5234_s7 + $0x30] sm:$0xff] }
 0x522   :  { %3265 = vmatprep.subr.mxu1 %v3626_v2  ;;  %1164 = vst.msk [vmem:[#allocation2 + $0x65] sm:$0x1] %vm1112_vm15, %v1158_v11  ;;  %1182 = vst.msk [vmem:[#allocation2 + $0x87] sm:$0x1] %vm1112_vm15, %v1176_v58  ;;  %1398 = vmatmul.mubr.f32.gmra.mxu1 %v1311_v9  ;;  %v1700_v8 = vmul.f32 %v3509_v6, %v4499_v43  ;;  %v3510_v9 = vld [vmem:[%s5234_s7 + $0x28] sm:$0xff]  ;;  %v1702_v11 = vmul.f32 %v3511_v55, %v4499_v43  ;;  %v3512_v58 = vld [vmem:[%s5234_s7 + $0x38] sm:$0xff] }
 0x523   :  { %3266 = vmatpush3.msra.mxu1 %v3485_v14  ;;  %1402 = vmatprep.mubr.f32.mxu1 %v1315_v13  ;;  %v1701_v10 = vmul.f32 %v3510_v9, %v4499_v43  ;;  %v1703_v12 = vmul.f32 %v3512_v58, %v4499_v43  ;;  %v1248_v13 = vld [vmem:[#allocation2 + $0x46] ss:$8 sm:$0xf0] }
 0x524   :  { %3267 = vmatprep.subr.mxu1 %v3626_v2  ;;  %v3522_v9 = vld [vmem:[%s5235_s8 + $0x30] sm:$0xff]  ;;  %v3523_v55 = vld [vmem:[%s5235_s8 + $0x28] sm:$0xff]  ;;  %v3524_v58 = vld [vmem:[%s5235_s8 + $0x20] sm:$0xff] }
 0x525   :  { %3268 = vmatpush3.msra.mxu1 %v3486_v18  ;;  %v3414_v19 = vpop.permute.xlu1 %3413  ;;  %v1249_v18 = vor.u32 %v1248_v13, %v1247_v16  ;;  %v3525_v13 = vld [vmem:[%s5235_s8 + $0x18] sm:$0xff] }
 0x526   :  { %3269 = vmatprep.subr.mxu1 %v3626_v2  ;;  %v3416_v23 = vunpack.i.h.bf16 %v3414_v19  ;;  %v3415_v24 = vunpack.i.l.bf16 %v3414_v19  ;;  %1403 = vmatmul.mubr.f32.gmra.mxu1 %v1312_v20  ;;  %v1227_v19 = vld [vmem:[#allocation2 + $0x44] ss:$8 sm:$0xf] }
 0x527   :  { %3270 = vmatpush3.msra.mxu1 %v3487_v56  ;;  %3273 = vmatprep.mubr.msk.f32.mxu1 %vm3627_vm2, %v3626_v2  ;;  %v1251_v56 = vld [vmem:[#allocation2 + $0x86] ss:$8 sm:$0x1] }
 0x528   :  { %3271 = vmatprep.subr.mxu1 %v3626_v2  ;;  %v1319_v29 = vsel %vm184_vm3, %v1245_v36, %v3415_v24  ;;  %v1316_v30 = vsel %vm184_vm3, %v1225_v25, %v3416_v23  ;;  %v1229_v23 = vor.u32 %v1228_v15, %v1227_v19  ;;  %v3526_v15 = vld [vmem:[%s5235_s8 + $0x10] sm:$0xff]  ;;  %v3528_v19 = vld [vmem:[%s5235_s8] sm:$0xff] }
 0x529   :  { %3272 = vmatpush3.msra.mxu1 %v3488_v35  ;;  %1472 = vmatprep.mubr.f32.mxu0 %v1319_v29  ;;  %v1261_v60 = vld [vmem:[#allocation2 + $0x87] ss:$8 sm:$0x1]  ;;  %v1238_v37 = vld [vmem:[#allocation2 + $0x45] ss:$8 sm:$0xf0] }
 0x52a   :  { %3300 = vmatprep.subr.mxu1 %v3489_v38  ;;  %1473 = vmatmul.mubr.f32.vlgmr.msra.gmra.mxu0 %v1316_v30  ;;  %v3422_v39 = vpack.i.bf16 %v1241_v31, %v1261_v60  ;;  %v1239_v63 = vor.u32 %v1238_v37, %v1237_v53  ;;  %v1231_v53 = vld [vmem:[#allocation2 + $0x84] ss:$8 sm:$0x1]  ;;  %v3514_v30 = vld [vmem:[%s5230_s4 + $0x8] sm:$0xff]  ;;  %v3515_v31 = vld [vmem:[%s5230_s4 + $0x10] sm:$0xff] }
 0x52b   :  { %3274 = vmatmul.mubr.msk.f32.vlgmr.msra.gmra.mxu1 %vm184_vm3, %v2791_v26  ;;  %3283 = vmatpush3.msk.msra.mxu0 %vm299_vm0, %v4431_v41  ;;  %v3513_v29 = vld [vmem:[%s5230_s4] sm:$0xff]  ;;  %v3518_v60 = vld [vmem:[%s5230_s4 + $0x28] sm:$0xff]  ;;  %v3519_v37 = vld [vmem:[%s5230_s4 + $0x30] sm:$0xff]  ;;  %vm5251_vm0 = vcmask 523712  }
 0x52c   :  { %3301 = vmatpush3.msra.mxu1 %v3489_v38  ;;  %3423 = vrot.lane.b32.xlu1 %v3422_v39, %s3628_s17  ;;  %v3417_v40 = vpack.i.bf16 %v1239_v63, %v1259_v28  ;;  %v3517_v35 = vld [vmem:[%s5230_s4 + $0x20] sm:$0xff]  ;;  %v3520_v38 = vld [vmem:[%s5230_s4 + $0x38] sm:$0xff] }
 0x52d   :  { %3302 = vmatprep.subr.mxu1 %v3490_v54  ;;  %3276 = vmatprep.mubr.msk.f32.mxu1 %vm3627_vm2, %v3626_v2 }
 0x52e   :  { %3303 = vmatpush3.msra.mxu1 %v3490_v54  ;;  %3418 = vrot.lane.b32.xlu0 %v3417_v40, %s3628_s17 }
 0x52f   :  { %3304 = vmatprep.subr.mxu1 %v3491_v44  ;;  %3277 = vmatmul.mubr.msk.f32.gmra.mxu1 %vm184_vm3, %v2792_v42 }
 0x530   :  { %3305 = vmatpush3.msra.mxu1 %v3491_v44  ;;  %3279 = vmatprep.mubr.msk.f32.mxu1 %vm3627_vm2, %v3626_v2 }
 0x531   :  { %3306 = vmatprep.subr.mxu1 %v3493_v46  ;;  %3284 = vmatprep.subr.mxu0 %v2792_v42 }
 0x532   :  { %3307 = vmatpush3.msra.mxu1 %v3493_v46  ;;  %3285 = vmatpush3.msra.mxu0 %v2792_v42 }
 0x533   :  { %3308 = vmatprep.subr.mxu1 %v3494_v7  ;;  %3280 = vmatmul.mubr.msk.f32.gmra.mxu1 %vm184_vm3, %v4431_v41  ;;  %v3497_v41 = vld [vmem:[%s5231_s2 + $0x40] sm:$0xff] }
 0x534   :  { %3309 = vmatpush3.msra.mxu1 %v3494_v7  ;;  %3332 = vmatprep.mubr.f32.mxu1 %v1696_v45  ;;  %v4628_v45 = vld [vmem:[%s5238_s6] ss:$0 sm:$0xff] }
 0x535   :  { %3310 = vmatprep.subr.mxu1 %v3495_v47  ;;  %3286 = vmatprep.subr.mxu0 %v2791_v26 }
 0x536   :  { %3311 = vmatpush3.msra.mxu1 %v3495_v47  ;;  %3287 = vmatpush3.msra.mxu0 %v2791_v26 }
 0x537   :  { %3312 = vmatprep.subr.mxu1 %v3496_v48  ;;  %3344 = vmatprep.subr.mxu0 %v3626_v2 }
 0x538   :  { %3313 = vmatpush3.msra.mxu1 %v3496_v48 }
 0x539   :  { %3314 = vmatprep.subr.mxu1 %v3497_v41 }
 0x53a   :  { %3315 = vmatpush3.msra.mxu1 %v3497_v41 }
 0x53b   :  { %3316 = vmatprep.subr.mxu1 %v3498_v49 }
 0x53c   :  { %3317 = vmatpush3.msra.mxu1 %v3498_v49 }
 0x53d   :  { %3318 = vmatprep.subr.mxu1 %v3499_v50 }
 0x53e   :  { %3319 = vmatpush3.msra.mxu1 %v3499_v50 }
 0x53f   :  { %3320 = vmatprep.subr.mxu1 %v3500_v51 }
 0x540   :  { %3321 = vmatpush3.msra.mxu1 %v3500_v51 }
 0x541   :  { %3322 = vmatprep.subr.mxu1 %v3501_v59 }
 0x542   :  { %3323 = vmatpush3.msra.mxu1 %v3501_v59 }
 0x543   :  { %3324 = vmatprep.subr.mxu1 %v3502_v52 }
 0x544   :  { %3325 = vmatpush3.msra.mxu1 %v3502_v52 }
 0x545   :  { %3326 = vmatprep.subr.mxu1 %v3503_v61 }
 0x546   :  { %3327 = vmatpush3.msra.mxu1 %v3503_v61 }
 0x547   :  { %3328 = vmatprep.subr.mxu1 %v3504_v62 }
 0x548   :  { %3329 = vmatpush3.msra.mxu1 %v3504_v62 }
 0x549   :  { %3330 = vmatprep.subr.mxu1 %v3507_v3 }
 0x54a   :  { %3331 = vmatpush3.msra.mxu1 %v3507_v3 }
 0x54b   :  { %3333 = vmatmul.mubr.f32.vlgmr.msra.gmra.mxu1 %v1697_v57 }
 0x54c   :  { %3335 = vmatprep.mubr.f32.mxu1 %v1698_v1 }
 0x54f   :  { %3336 = vmatmul.mubr.f32.gmra.mxu1 %v1699_v32  ;;  %v3521_v32 = vld [vmem:[%s5235_s8 + $0x38] sm:$0xff] }
 0x550   :  { %3338 = vmatprep.mubr.f32.mxu1 %v1700_v8 }
 0x553   :  { %3339 = vmatmul.mubr.f32.gmra.mxu1 %v1701_v10 }
 0x554   :  { %3341 = vmatprep.mubr.f32.mxu1 %v1702_v11 }
 0x557   :  { %3342 = vmatmul.mubr.f32.gmra.mxu1 %v1703_v12 }
 0x558   :  { %2269 = vmatprep.mubr.f32.mxu1 %v3626_v2 }
 0x59e   :  { %v3424_v14 = vpop.permute.xlu1 %3423 }
 0x59f   :  { %v3425_v20 = vunpack.i.l.bf16 %v3424_v14  ;;  %v3426_v25 = vunpack.i.h.bf16 %v3424_v14 }
 0x5a0   :  { %v3419_v17 = vpop.permute.xlu0 %3418 }
 0x5a1   :  { %v3421_v21 = vunpack.i.h.bf16 %v3419_v17  ;;  %v3420_v22 = vunpack.i.l.bf16 %v3419_v17  ;;  %v1321_v26 = vsel %vm184_vm3, %v1251_v56, %v3425_v20  ;;  %v1318_v27 = vsel %vm184_vm3, %v1231_v53, %v3426_v25  ;;  %v3527_v17 = vld [vmem:[%s5235_s8 + $0x8] sm:$0xff] }
 0x5a3   :  { %v1320_v24 = vsel %vm184_vm3, %v1249_v18, %v3420_v22  ;;  %v1317_v36 = vsel %vm184_vm3, %v1229_v23, %v3421_v21 }
 0x5a4   :  { %1477 = vmatprep.mubr.f32.mxu0 %v1320_v24 }
 0x5a5   :  { %1478 = vmatmul.mubr.f32.gmra.mxu0 %v1317_v36 }
 0x5a6   :  { %1482 = vmatprep.mubr.f32.mxu0 %v1321_v26 }
 0x5a9   :  { %1483 = vmatmul.mubr.f32.gmra.mxu0 %v1318_v27 }
 0x5aa   :  { %3288 = vmatprep.mubr.msk.f32.mxu0 %vm274_vm1, %v3513_v29 }
 0x5ad   :  { %3289 = vmatmul.mubr.msk.f32.vlgmr.msra.gmra.mxu0 %vm274_vm1, %v3514_v30 }
 0x5ae   :  { %3291 = vmatprep.mubr.msk.f32.mxu0 %vm274_vm1, %v3515_v31 }
 0x5b1   :  { %3292 = vmatmul.mubr.msk.f32.gmra.mxu0 %vm274_vm1, %v3516_v33 }
 0x5b2   :  { %3294 = vmatprep.mubr.msk.f32.mxu0 %vm274_vm1, %v3517_v35 }
 0x5b5   :  { %3295 = vmatmul.mubr.msk.f32.gmra.mxu0 %vm274_vm1, %v3518_v60 }
 0x5b6   :  { %3297 = vmatprep.mubr.msk.f32.mxu0 %vm274_vm1, %v3519_v37 }
 0x5b9   :  { %3298 = vmatmul.mubr.msk.f32.gmra.mxu0 %vm274_vm1, %v3520_v38  ;;  %vm5252_vm1 = vcmask 326912  }
 0x5ba   :  { %3360 = vmatprep.mubr.msk.f32.mxu0 %vm3627_vm2, %v3626_v2 }
 0x5da   :  { %v2920_v39 = vpop.f32.mrf.mxu1 }
 0x5dc   :  { %v2921_v63 = vpop.f32.mrf.mxu1 }
 0x5dd   :  { %v2922_v28 = vadd.f32 %v2921_v63, %v2920_v39 }
 0x5df   :  { %v1395_v48 = vadd.f32 %v2922_v28, %v4628_v45 }
 0x5e2   :  { %v2923_v40 = vpop.f32.mrf.mxu1 }
 0x5e4   :  { %v2924_v42 = vpop.f32.mrf.mxu1 }
 0x5e5   :  { %v4621_v54 = vadd.f32 %v2924_v42, %v2923_v40 }
 0x5e6   :  { %v2926_v43 = vpop.f32.mrf.mxu1 }
 0x5e7   :  { %v1400_v23 = vadd.f32 %v4621_v54, %v4628_v45 }
 0x5e8   :  { %v2927_v44 = vpop.f32.mrf.mxu1 }
 0x5e9   :  { %v4623_v5 = vadd.f32 %v2927_v44, %v2926_v43 }
 0x5ea   :  { %v2961_v46 = vpop.f32.mrf.mxu0 }
 0x5eb   :  { %v1569_v7 = vpop.f32.mrf.mxu1  ;;  %v1405_v26 = vadd.f32 %v4623_v5, %v4628_v45 }
 0x5ec   :  { %v2962_v47 = vpop.f32.mrf.mxu0 }
 0x5ed   :  { %v2963_v41 = vadd.f32 %v2962_v47, %v2961_v46  ;;  %v3275_v49 = vpop.f32.mrf.mxu1 }
 0x5ef   :  { %v4631_v50 = vadd.f32 %v2963_v41, %v1395_v48  ;;  %v1574_v51 = vpop.f32.mrf.mxu1 }
 0x5f1   :  { %v3278_v59 = vpop.f32.mrf.mxu1 }
 0x5f3   :  { %v1579_v52 = vpop.f32.mrf.mxu1 }
 0x5f5   :  { %v3281_v61 = vpop.f32.mrf.mxu1 }
 0x60b   :  { %v3334_v62 = vpop.f32.mrf.mxu1 }
 0x60c   :  { %v1810_v18 = vmul.f32 %v3527_v17, %v3334_v62 }
 0x60d   :  { %v1770_v34 = vpop.f32.mrf.mxu1 }
 0x60e   :  { %v1809_v20 = vmul.f32 %v3528_v19, %v1770_v34 }
 0x60f   :  { %v3337_v57 = vpop.f32.mrf.mxu1 }
 0x610   :  { %v1812_v14 = vmul.f32 %v3525_v13, %v3337_v57 }
 0x611   :  { %v1780_v0 = vpop.f32.mrf.mxu1 }
 0x612   :  { %v1811_v16 = vmul.f32 %v3526_v15, %v1780_v0 }
 0x613   :  { %v3340_v1 = vpop.f32.mrf.mxu1 }
 0x614   :  { %v1814_v11 = vmul.f32 %v3523_v55, %v3340_v1 }
 0x615   :  { %v1790_v3 = vpop.f32.mrf.mxu1 }
 0x616   :  { %v1813_v12 = vmul.f32 %v3524_v58, %v1790_v3 }
 0x617   :  { %v3343_v4 = vpop.f32.mrf.mxu1 }
 0x618   :  { %v1816_v6 = vmul.f32 %v3521_v32, %v3343_v4 }
 0x619   :  { %v1800_v8 = vpop.f32.mrf.mxu1 }
 0x61a   :  { %v1815_v10 = vmul.f32 %v3522_v9, %v1800_v8  ;;  %3345 = vmatpush3.msra.mxu0 %v1816_v6 }
 0x61b   :  { %3346 = vmatprep.subr.mxu0 %v3626_v2 }
 0x61c   :  { %3347 = vmatpush3.msra.mxu0 %v1815_v10 }
 0x61d   :  { %3348 = vmatprep.subr.mxu0 %v3626_v2 }
 0x61e   :  { %3349 = vmatpush3.msra.mxu0 %v1814_v11 }
 0x61f   :  { %3350 = vmatprep.subr.mxu0 %v3626_v2 }
 0x620   :  { %3351 = vmatpush3.msra.mxu0 %v1813_v12 }
 0x621   :  { %3352 = vmatprep.subr.mxu0 %v3626_v2 }
 0x622   :  { %3353 = vmatpush3.msra.mxu0 %v1812_v14 }
 0x623   :  { %3354 = vmatprep.subr.mxu0 %v3626_v2 }
 0x624   :  { %3355 = vmatpush3.msra.mxu0 %v1811_v16 }
 0x625   :  { %3356 = vmatprep.subr.mxu0 %v3626_v2 }
 0x626   :  { %3357 = vmatpush3.msra.mxu0 %v1810_v18 }
 0x627   :  { %3358 = vmatprep.subr.mxu0 %v3626_v2 }
 0x628   :  { %3359 = vmatpush3.msra.mxu0 %v1809_v20 }
 0x629   :  { %3361 = vmatmul.mubr.msk.f32.vlgmr.msra.gmra.mxu0 %vm184_vm3, %v1569_v7  ;;  %3369 = vmatprep.subr.mxu0 %v3626_v2 }
 0x62a   :  { %3363 = vmatprep.mubr.msk.f32.mxu0 %vm3627_vm2, %v3626_v2  ;;  %3370 = vmatpush3.msra.mxu0 %v3521_v32 }
 0x62b   :  { %3371 = vmatprep.subr.mxu0 %v3626_v2 }
 0x62c   :  { %3372 = vmatpush3.msra.mxu0 %v3522_v9 }
 0x62d   :  { %3364 = vmatmul.mubr.msk.f32.gmra.mxu0 %vm184_vm3, %v1574_v51  ;;  %3373 = vmatprep.subr.mxu0 %v3626_v2 }
 0x62e   :  { %3366 = vmatprep.mubr.msk.f32.mxu0 %vm3627_vm2, %v3626_v2  ;;  %3374 = vmatpush3.msra.mxu0 %v3523_v55 }
 0x62f   :  { %3375 = vmatprep.subr.mxu0 %v3626_v2 }
 0x630   :  { %3376 = vmatpush3.msra.mxu0 %v3524_v58 }
 0x631   :  { %3367 = vmatmul.mubr.msk.f32.gmra.mxu0 %vm184_vm3, %v1579_v52  ;;  %3377 = vmatprep.subr.mxu0 %v3626_v2 }
 0x632   :  { %3378 = vmatpush3.msra.mxu0 %v3525_v13  ;;  %3385 = vmatprep.mubr.msk.f32.mxu0 %vm3627_vm2, %v3626_v2 }
 0x633   :  { %3379 = vmatprep.subr.mxu0 %v3626_v2 }
 0x634   :  { %3380 = vmatpush3.msra.mxu0 %v3526_v15 }
 0x635   :  { %3381 = vmatprep.subr.mxu0 %v3626_v2 }
 0x636   :  { %3382 = vmatpush3.msra.mxu0 %v3527_v17 }
 0x637   :  { %3383 = vmatprep.subr.mxu0 %v3626_v2 }
 0x638   :  { %3384 = vmatpush3.msra.mxu0 %v3528_v19 }
 0x665   :  { %v2964_v21 = vpop.f32.mrf.mxu0 }
 0x667   :  { %v2965_v22 = vpop.f32.mrf.mxu0 }
 0x668   :  { %v2966_v24 = vadd.f32 %v2965_v22, %v2964_v21 }
 0x669   :  { %v2967_v36 = vpop.f32.mrf.mxu0 }
 0x66a   :  { %v4683_v25 = vadd.f32 %v2966_v24, %v1400_v23 }
 0x66b   :  { %v2968_v56 = vpop.f32.mrf.mxu0 }
 0x66c   :  { %v2969_v53 = vadd.f32 %v2968_v56, %v2967_v36 }
 0x66d   :  { %v4689_v29 = vpop.f32.mrf.mxu0 }
 0x66e   :  { %v4687_v27 = vadd.f32 %v2969_v53, %v1405_v26 }
 0x66f   :  { %v4691_v30 = vpop.f32.mrf.mxu0 }
 0x671   :  { %v4693_v31 = vpop.f32.mrf.mxu0 }
 0x673   :  { %v4695_v33 = vpop.f32.mrf.mxu0 }
 0x675   :  { %v4697_v35 = vpop.f32.mrf.mxu0 }
 0x677   :  { %v4699_v60 = vpop.f32.mrf.mxu0 }
 0x679   :  { %v4701_v37 = vpop.f32.mrf.mxu0 }
 0x67b   :  { %v4703_v38 = vpop.f32.mrf.mxu0 }
 0x6e9   :  { %v4705_v39 = vpop.f32.mrf.mxu0 }
 0x6ea   :  { %v1918_v63 = vsel %vm637_vm7, %v4705_v39, -inf  ;;  %v1906_v28 = vsel %vm623_vm5, %v4705_v39, -inf  ;;  %v1966_v54 = vsel %vm693_vm8, %v4705_v39, -inf  ;;  %v1930_v43 = vsel %vm651_vm4, %v4705_v39, -inf }
 0x6eb   :  { %1919 = vmax.xlane.f32.xlu1 %v1918_v63  ;;  %1907 = vmax.xlane.f32.xlu0 %v1906_v28  ;;  %v3362_v40 = vpop.f32.mrf.mxu0  ;;  %v1978_v45 = vsel %vm707_vm10, %v4705_v39, -inf  ;;  %v1942_v46 = vsel %vm665_vm6, %v4705_v39, -inf  ;;  %v1990_v47 = vsel %vm5251_vm0, %v4705_v39, -inf  ;;  %v1954_v48 = vsel %vm5252_vm1, %v4705_v39, -inf }
 0x6ed   :  { %v4711_v42 = vpop.f32.mrf.mxu0 }
 0x6ee   :  { %v1921_v41 = vsel %vm637_vm7, %v4711_v42, -inf  ;;  %v1909_v49 = vsel %vm623_vm5, %v4711_v42, -inf  ;;  %v1933_v51 = vsel %vm651_vm4, %v4711_v42, -inf  ;;  %v1969_v59 = vsel %vm693_vm8, %v4711_v42, -inf  ;;  %vm5253_vm7 = vmmov %vm5252_vm1 }
 0x6ef   :  { %1967 = vmax.xlane.f32.xlu1 %v1966_v54  ;;  %1931 = vmax.xlane.f32.xlu0 %v1930_v43  ;;  %v3365_v44 = vpop.f32.mrf.mxu0  ;;  %v1945_v52 = vsel %vm665_vm6, %v4711_v42, -inf  ;;  %v1981_v61 = vsel %vm707_vm10, %v4711_v42, -inf  ;;  %v1957_v62 = vsel %vm5253_vm7, %v4711_v42, -inf  ;;  %v1993_v34 = vsel %vm5251_vm0, %v4711_v42, -inf }
 0x6f0   :  { %vm5254_vm4 = vcmask 122944   ;;  %vm5255_vm8 = vcmask 57344   ;;  %vm5256_vm6 = vcmask 188544   ;;  %vm5257_vm10 = vcmask 385344  }
 0x6f1   :  { %v4717_v5 = vpop.f32.mrf.mxu0  ;;  %vm5258_vm1 = vcmask 254144   ;;  %vm5259_vm7 = vcmask 516544   ;;  %vm5260_vm0 = vcmask 319744  }
 0x6f2   :  { %v1924_v57 = vsel %vm5254_vm4, %v4717_v5, -inf  ;;  %v1912_v0 = vsel %vm5255_vm8, %v4717_v5, -inf  ;;  %v1936_v1 = vsel %vm5256_vm6, %v4717_v5, -inf  ;;  %v1972_v3 = vsel %vm5257_vm10, %v4717_v5, -inf }
 0x6f3   :  { %1979 = vmax.xlane.f32.xlu1 %v1978_v45  ;;  %1943 = vmax.xlane.f32.xlu0 %v1942_v46  ;;  %v3368_v7 = vpop.f32.mrf.mxu0  ;;  %v1948_v4 = vsel %vm5258_vm1, %v4717_v5, -inf  ;;  %v1996_v32 = vsel %vm5259_vm7, %v4717_v5, -inf  ;;  %v1960_v6 = vsel %vm5260_vm0, %v4717_v5, -inf  ;;  %vm5261_vm4 = vcmask 450944  }
 0x6f4   :  { %v1984_v8 = vsel %vm5261_vm4, %v4717_v5, -inf  ;;  %vm5262_vm8 = vcmask 457728  }
 0x6f5   :  { %vm5263_vm6 = vmmov %vm5262_vm8 }
 0x6f7   :  { %1991 = vmax.xlane.f32.xlu1 %v1990_v47  ;;  %1955 = vmax.xlane.f32.xlu0 %v1954_v48 }
 0x6fb   :  { %1922 = vmax.xlane.f32.xlu0 %v1921_v41  ;;  %1910 = vmax.xlane.f32.xlu1 %v1909_v49 }
 0x6ff   :  { %1934 = vmax.xlane.f32.xlu0 %v1933_v51  ;;  %1970 = vmax.xlane.f32.xlu1 %v1969_v59 }
 0x703   :  { %1946 = vmax.xlane.f32.xlu0 %v1945_v52  ;;  %1982 = vmax.xlane.f32.xlu1 %v1981_v61 }
 0x707   :  { %1958 = vmax.xlane.f32.xlu0 %v1957_v62  ;;  %1994 = vmax.xlane.f32.xlu1 %v1993_v34 }
 0x70b   :  { %1925 = vmax.xlane.f32.xlu0 %v1924_v57  ;;  %1913 = vmax.xlane.f32.xlu1 %v1912_v0 }
 0x70f   :  { %1937 = vmax.xlane.f32.xlu0 %v1936_v1  ;;  %1973 = vmax.xlane.f32.xlu1 %v1972_v3 }
 0x713   :  { %1949 = vmax.xlane.f32.xlu0 %v1948_v4  ;;  %1997 = vmax.xlane.f32.xlu1 %v1996_v32 }
 0x717   :  { %1961 = vmax.xlane.f32.xlu0 %v1960_v6 }
 0x71b   :  { %1985 = vmax.xlane.f32.xlu0 %v1984_v8 }
 0x724   :  { %2144 = vrot.lane.b32.xlu1 %v4703_v38, %s3628_s17 }
 0x728   :  { %2142 = vrot.lane.b32.xlu1 %v4697_v35, %s3628_s17 }
 0x72c   :  { %2140 = vrot.lane.b32.xlu1 %v4699_v60, %s3628_s17 }
 0x730   :  { %2136 = vrot.lane.b32.xlu1 %v4695_v33, %s3628_s17 }
 0x731   :  { %2146 = vrot.lane.b32.xlu0 %v4701_v37, %s3628_s17 }
 0x734   :  { %2132 = vrot.lane.b32.xlu1 %v4691_v30, %s3628_s17 }
 0x735   :  { %2138 = vrot.lane.b32.xlu0 %v4693_v31, %s3628_s17 }
 0x739   :  { %2134 = vrot.lane.b32.xlu0 %v4689_v29, %s3628_s17 }
 0x774   :  { %v1920_v9 = vpop.xlane.xlu1 %1919  ;;  %v1908_v10 = vpop.xlane.xlu0 %1907 }
 0x775   :  { %v1927_v58 = vsub.f32 %v4705_v39, %v1920_v9  ;;  %v1915_v12 = vsub.f32 %v4705_v39, %v1908_v10 }
 0x777   :  { %v2002_v17 = vsel %vm623_vm5, %v1915_v12, %v1927_v58 }
 0x778   :  { %v1968_v55 = vpop.xlane.xlu1 %1967  ;;  %v1932_v11 = vpop.xlane.xlu0 %1931 }
 0x779   :  { %v1939_v15 = vsub.f32 %v4705_v39, %v1932_v11  ;;  %v1975_v22 = vsub.f32 %v4705_v39, %v1968_v55 }
 0x77b   :  { %v2005_v20 = vsel %vm738_vm13, %v2002_v17, %v1939_v15 }
 0x77c   :  { %v1980_v13 = vpop.xlane.xlu1 %1979  ;;  %v1944_v14 = vpop.xlane.xlu0 %1943 }
 0x77d   :  { %v1951_v16 = vsub.f32 %v4705_v39, %v1944_v14  ;;  %v1987_v24 = vsub.f32 %v4705_v39, %v1980_v13 }
 0x77f   :  { %v2008_v23 = vsel %vm742_vm12, %v2005_v20, %v1951_v16 }
 0x780   :  { %v1992_v18 = vpop.xlane.xlu1 %1991  ;;  %v1956_v19 = vpop.xlane.xlu0 %1955 }
 0x781   :  { %v1963_v21 = vsub.f32 %v4705_v39, %v1956_v19  ;;  %v1999_v56 = vsub.f32 %v4705_v39, %v1992_v18 }
 0x783   :  { %v2011_v36 = vsel %vm746_vm11, %v2008_v23, %v1963_v21 }
 0x784   :  { %v2014_v26 = vsel %vm750_vm14, %v2011_v36, %v1975_v22  ;;  %v1923_v53 = vpop.xlane.xlu0 %1922  ;;  %v1911_v63 = vpop.xlane.xlu1 %1910 }
 0x785   :  { %v2017_v28 = vsel %vm754_vm9, %v2014_v26, %v1987_v24  ;;  %v1928_v45 = vsub.f32 %v4711_v42, %v1923_v53  ;;  %v1916_v46 = vsub.f32 %v4711_v42, %v1911_v63 }
 0x786   :  { %v2020_v40 = vsel %vm5262_vm8, %v2017_v28, %v1999_v56 }
 0x787   :  { %v2023_v54 = vmul.f32 1.442695, %v2020_v40  ;;  %v2003_v41 = vsel %vm623_vm5, %v1916_v46, %v1928_v45  ;;  %v3529_v45 = vld [vmem:[%s5236_s9 + $0xe0] sm:$0xff] }
 0x788   :  { %v1935_v43 = vpop.xlane.xlu0 %1934  ;;  %v1971_v44 = vpop.xlane.xlu1 %1970 }
 0x789   :  { %3469 = vpow2.f32 %v2023_v54  ;;  %v1940_v39 = vsub.f32 %v4711_v42, %v1935_v43  ;;  %v1976_v61 = vsub.f32 %v4711_v42, %v1971_v44 }
 0x78b   :  { %v2006_v59 = vsel %vm738_vm13, %v2003_v41, %v1940_v39  ;;  %v3531_v39 = vld [vmem:[%s5236_s9 + $0xe8] sm:$0xff] }
 0x78c   :  { %v1947_v7 = vpop.xlane.xlu0 %1946  ;;  %v1983_v47 = vpop.xlane.xlu1 %1982 }
 0x78d   :  { %v1952_v48 = vsub.f32 %v4711_v42, %v1947_v7  ;;  %v1988_v34 = vsub.f32 %v4711_v42, %v1983_v47  ;;  %v3530_v7 = vld [vmem:[%s5236_s9 + $0xf0] sm:$0xff] }
 0x78f   :  { %v2009_v62 = vsel %vm742_vm12, %v2006_v59, %v1952_v48 }
 0x790   :  { %v1959_v49 = vpop.xlane.xlu0 %1958  ;;  %v1995_v51 = vpop.xlane.xlu1 %1994 }
 0x791   :  { %v1964_v52 = vsub.f32 %v4711_v42, %v1959_v49  ;;  %v2000_v1 = vsub.f32 %v4711_v42, %v1995_v51  ;;  %v3533_v51 = vld [vmem:[%s5236_s9 + $0xc8] sm:$0xff] }
 0x793   :  { %v2012_v57 = vsel %vm746_vm11, %v2009_v62, %v1964_v52  ;;  %v3534_v52 = vld [vmem:[%s5236_s9 + $0xc0] sm:$0xff] }
 0x794   :  { %v2015_v0 = vsel %vm750_vm14, %v2012_v57, %v1976_v61  ;;  %v1926_v3 = vpop.xlane.xlu0 %1925  ;;  %v1914_v4 = vpop.xlane.xlu1 %1913  ;;  %v3536_v57 = vld [vmem:[%s5236_s9 + $0xd0] sm:$0xff] }
 0x795   :  { %v2018_v32 = vsel %vm754_vm9, %v2015_v0, %v1988_v34  ;;  %v1929_v42 = vsub.f32 %v4717_v5, %v1926_v3  ;;  %v1917_v11 = vsub.f32 %v4717_v5, %v1914_v4  ;;  %v3535_v34 = vld [vmem:[%s5236_s9 + $0xd8] sm:$0xff]  ;;  %v3537_v3 = vld [vmem:[%s5236_s9 + $0xa8] sm:$0xff] }
 0x796   :  { %v4804_v6 = vpop.eup %3469  ;;  %v2021_v8 = vsel %vm5263_vm6, %v2018_v32, %v2000_v1  ;;  %v3538_v32 = vld [vmem:[%s5236_s9 + $0xb8] sm:$0xff] }
 0x797   :  { %v2025_v9 = vmul.f32 1.442695, %v2021_v8  ;;  %3386 = vmatmul.mubr.msk.f32.vlgmr.msra.gmra.mxu0 %vm184_vm3, %v4804_v6  ;;  %v2004_v15 = vsel %vm623_vm5, %v1917_v11, %v1929_v42  ;;  %vm5264_vm5 = vmmov %vm5263_vm6 }
 0x798   :  { %v1938_v10 = vpop.xlane.xlu0 %1937  ;;  %v1974_v55 = vpop.xlane.xlu1 %1973  ;;  %3388 = vmatprep.mubr.msk.f32.mxu0 %vm3627_vm2, %v3626_v2 }
 0x799   :  { %3471 = vpow2.f32 %v2025_v9  ;;  %v1941_v13 = vsub.f32 %v4717_v5, %v1938_v10  ;;  %v1977_v22 = vsub.f32 %v4717_v5, %v1974_v55  ;;  %v3539_v9 = vld [vmem:[%s5236_s9 + $0xa0] sm:$0xff] }
 0x79b   :  { %v2007_v18 = vsel %vm738_vm13, %v2004_v15, %v1941_v13  ;;  %v3542_v13 = vld [vmem:[%s5236_s9 + $0x98] sm:$0xff]  ;;  %v3543_v15 = vld [vmem:[%s5236_s9 + $0x80] sm:$0xff] }
 0x79c   :  { %v1950_v58 = vpop.xlane.xlu0 %1949  ;;  %v1998_v12 = vpop.xlane.xlu1 %1997 }
 0x79d   :  { %v1953_v14 = vsub.f32 %v4717_v5, %v1950_v58  ;;  %v2001_v26 = vsub.f32 %v4717_v5, %v1998_v12  ;;  %v3541_v58 = vld [vmem:[%s5236_s9 + $0x88] sm:$0xff] }
 0x79f   :  { %v2010_v20 = vsel %vm742_vm12, %v2007_v18, %v1953_v14 }
 0x7a0   :  { %v1962_v16 = vpop.xlane.xlu0 %1961  ;;  %v2145_v17 = vpop.permute.xlu1 %2144 }
 0x7a1   :  { %v1965_v19 = vsub.f32 %v4717_v5, %v1962_v16 }
 0x7a3   :  { %v2013_v21 = vsel %vm746_vm11, %v2010_v20, %v1965_v19  ;;  %v3545_v20 = vld [vmem:[%s5236_s9 + $0x68] sm:$0xff] }
 0x7a4   :  { %v1986_v23 = vpop.xlane.xlu0 %1985  ;;  %v2143_v24 = vpop.permute.xlu1 %2142  ;;  %v2016_v53 = vsel %vm750_vm14, %v2013_v21, %v1977_v22  ;;  %v3546_v22 = vld [vmem:[%s5236_s9 + $0x78] sm:$0xff] }
 0x7a5   :  { %v1989_v36 = vsub.f32 %v4717_v5, %v1986_v23  ;;  %v2162_v5 = vsel %vm184_vm3, %v4703_v38, %v2145_v17  ;;  %v2161_v41 = vsel %vm184_vm3, %v4697_v35, %v2143_v24  ;;  %v3547_v24 = vld [vmem:[%s5236_s9 + $0x60] sm:$0xff] }
 0x7a6   :  { %v4822_v56 = vpop.eup %3471  ;;  %v2189_v59 = vmul.f32 %v3533_v51, %v2162_v5  ;;  %v2188_v61 = vmul.f32 %v3534_v52, %v2162_v5  ;;  %v2191_v35 = vmul.f32 %v3535_v34, %v2162_v5  ;;  %v2190_v0 = vmul.f32 %v3536_v57, %v2162_v5  ;;  %v3560_v34 = vld [vmem:[%s5236_s9 + $0x10] sm:$0xff]  ;;  %v3561_v57 = vld [vmem:[%s5237_s5 + $0x1f8] sm:$0xff] }
 0x7a7   :  { %v2019_v63 = vsel %vm754_vm9, %v2016_v53, %v1989_v36  ;;  %3389 = vmatmul.mubr.msk.f32.gmra.mxu0 %vm184_vm3, %v4822_v56  ;;  %v2185_v4 = vmul.f32 %v3537_v3, %v2161_v41  ;;  %v2187_v8 = vmul.f32 %v3538_v32, %v2161_v41  ;;  %v2184_v10 = vmul.f32 %v3539_v9, %v2161_v41  ;;  %v3548_v36 = vld [vmem:[%s5236_s9 + $0x70] sm:$0xff] }
 0x7a8   :  { %v2022_v28 = vsel %vm5264_vm5, %v2019_v63, %v2001_v26  ;;  %v2147_v40 = vpop.permute.xlu0 %2146  ;;  %v2141_v54 = vpop.permute.xlu1 %2140  ;;  %3391 = vmatprep.mubr.msk.f32.mxu0 %vm3627_vm2, %v3626_v2  ;;  %v3549_v63 = vld [vmem:[%s5236_s9 + $0x48] sm:$0xff] }
 0x7a9   :  { %v2027_v43 = vmul.f32 1.442695, %v2022_v28  ;;  %v2163_v44 = vsel %vm184_vm3, %v4701_v37, %v2147_v40  ;;  %v3532_v37 = vld [vmem:[%s5236_s9 + $0xf8] sm:$0xff]  ;;  %v2160_v1 = vsel %vm184_vm3, %v4699_v60, %v2141_v54  ;;  %v3540_v60 = vld [vmem:[%s5236_s9 + $0xb0] sm:$0xff] }
 0x7aa   :  { %v2192_v46 = vmul.f32 %v3529_v45, %v2163_v44  ;;  %v2194_v47 = vmul.f32 %v3530_v7, %v2163_v44  ;;  %v2193_v48 = vmul.f32 %v3531_v39, %v2163_v44  ;;  %v2195_v38 = vmul.f32 %v3532_v37, %v2163_v44  ;;  %v3550_v40 = vld [vmem:[%s5236_s9 + $0x58] sm:$0xff]  ;;  %v3553_v7 = vld [vmem:[%s5236_s9 + $0x28] sm:$0xff] }
 0x7ab   :  { %3473 = vpow2.f32 %v2027_v43  ;;  %v2186_v55 = vmul.f32 %v3540_v60, %v2161_v41  ;;  %v2181_v12 = vmul.f32 %v3541_v58, %v2160_v1  ;;  %v2183_v14 = vmul.f32 %v3542_v13, %v2160_v1  ;;  %v3551_v43 = vld [vmem:[%s5236_s9 + $0x40] sm:$0xff]  ;;  %v3554_v39 = vld [vmem:[%s5236_s9 + $0x38] sm:$0xff]  ;;  %v3565_v60 = vld [vmem:[%s5237_s5 + $0x1f0] sm:$0xff] }
 0x7ac   :  { %v2139_v49 = vpop.permute.xlu0 %2138  ;;  %2221 = vmatprep.subr.mxu1 %v2193_v48  ;;  %2304 = vmatprep.subr.mxu0 %v2195_v38  ;;  %v2137_v62 = vpop.permute.xlu1 %2136  ;;  %v2180_v16 = vmul.f32 %v3543_v15, %v2160_v1  ;;  %v3556_v38 = vld [vmem:[%s5236_s9 + $0x30] sm:$0xff]  ;;  %v3569_v58 = vld [vmem:[%s5237_s5 + $0x1e8] sm:$0xff]  ;;  %v3573_v15 = vld [vmem:[%s5237_s5 + $0x1e0] sm:$0xff] }
 0x7ad   :  { %2222 = vmatpush1.msra.mxu1 %v2192_v46  ;;  %2305 = vmatpush1.msra.mxu0 %v2194_v47  ;;  %v2159_v42 = vsel %vm184_vm3, %v4693_v31, %v2139_v49  ;;  %v3544_v31 = vld [vmem:[%s5236_s9 + $0x90] sm:$0xff]  ;;  %v2158_v18 = vsel %vm184_vm3, %v4695_v33, %v2137_v62  ;;  %v3557_v49 = vld [vmem:[%s5236_s9 + $0x8] sm:$0xff] }
 0x7ae   :  { %2223 = vmatprep.subr.mxu1 %v2189_v59  ;;  %2306 = vmatprep.subr.mxu0 %v2191_v35  ;;  %v2182_v17 = vmul.f32 %v3544_v31, %v2160_v1  ;;  %v2177_v21 = vmul.f32 %v3545_v20, %v2159_v42  ;;  %v2179_v23 = vmul.f32 %v3546_v22, %v2159_v42  ;;  %v3558_v59 = vld [vmem:[%s5236_s9] sm:$0xff]  ;;  %v3571_v13 = vld [vmem:[%s5237_s5 + $0x168] sm:$0xff]  ;;  %v3579_v20 = vld [vmem:[%s5237_s5 + $0x158] sm:$0xff] }
 0x7af   :  { %2224 = vmatpush1.msra.mxu1 %v2188_v61  ;;  %2307 = vmatpush1.msra.mxu0 %v2190_v0  ;;  %v2176_v33 = vmul.f32 %v3547_v24, %v2159_v42  ;;  %v2178_v26 = vmul.f32 %v3548_v36, %v2159_v42  ;;  %v2173_v28 = vmul.f32 %v3549_v63, %v2158_v18  ;;  %v3559_v61 = vld [vmem:[%s5236_s9 + $0x18] sm:$0xff]  ;;  %v3567_v42 = vld [vmem:[%s5237_s5 + $0x170] sm:$0xff]  ;;  %v3575_v31 = vld [vmem:[%s5237_s5 + $0x160] sm:$0xff] }
 0x7b0   :  { %2225 = vmatprep.subr.mxu1 %v2185_v4  ;;  %v2135_v11 = vpop.permute.xlu0 %2134  ;;  %2308 = vmatprep.subr.mxu0 %v2187_v8  ;;  %v2133_v19 = vpop.permute.xlu1 %2132  ;;  %v2175_v54 = vmul.f32 %v3550_v40, %v2158_v18  ;;  %v2172_v44 = vmul.f32 %v3551_v43, %v2158_v18  ;;  %v3562_v0 = vld [vmem:[%s5237_s5 + $0xf8] sm:$0xff]  ;;  %v3581_v22 = vld [vmem:[%s5237_s5 + $0x1d0] sm:$0xff]  ;;  %v3588_v40 = vld [vmem:[%s5237_s5 + $0x48] sm:$0xff] }
 0x7b1   :  { %2226 = vmatpush1.msra.mxu1 %v2184_v10  ;;  %2309 = vmatpush1.msra.mxu0 %v2186_v55  ;;  %v2157_v53 = vsel %vm184_vm3, %v4689_v29, %v2135_v11  ;;  %v3552_v29 = vld [vmem:[%s5236_s9 + $0x50] sm:$0xff]  ;;  %v2156_v45 = vsel %vm184_vm3, %v4691_v30, %v2133_v19  ;;  %v3555_v30 = vld [vmem:[%s5236_s9 + $0x20] sm:$0xff]  ;;  %v3563_v10 = vld [vmem:[%s5237_s5 + $0x178] sm:$0xff] }
 0x7b2   :  { %2227 = vmatprep.subr.mxu1 %v2181_v12  ;;  %2310 = vmatprep.subr.mxu0 %v2183_v14  ;;  %v2174_v5 = vmul.f32 %v3552_v29, %v2158_v18  ;;  %v2169_v47 = vmul.f32 %v3553_v7, %v2157_v53  ;;  %v2171_v48 = vmul.f32 %v3554_v39, %v2157_v53  ;;  %v3566_v55 = vld [vmem:[%s5237_s5 + $0xf0] sm:$0xff]  ;;  %v3570_v12 = vld [vmem:[%s5237_s5 + $0xe8] sm:$0xff]  ;;  %v3577_v18 = vld [vmem:[%s5237_s5 + $0x1d8] sm:$0xff] }
 0x7b3   :  { %2228 = vmatpush1.msra.mxu1 %v2180_v16  ;;  %2311 = vmatpush1.msra.mxu0 %v2182_v17  ;;  %v2168_v37 = vmul.f32 %v3555_v30, %v2157_v53  ;;  %v2170_v41 = vmul.f32 %v3556_v38, %v2157_v53  ;;  %v2165_v51 = vmul.f32 %v3557_v49, %v2156_v45  ;;  %v3568_v11 = vld [vmem:[%s5237_s5 + $0x70] sm:$0xff]  ;;  %v3572_v14 = vld [vmem:[%s5237_s5 + $0x68] sm:$0xff]  ;;  %v3574_v16 = vld [vmem:[%s5237_s5 + $0xe0] sm:$0xff] }
 0x7b4   :  { %2229 = vmatprep.subr.mxu1 %v2177_v21  ;;  %2312 = vmatprep.subr.mxu0 %v2179_v23  ;;  %v2164_v52 = vmul.f32 %v3558_v59, %v2156_v45  ;;  %v2167_v62 = vmul.f32 %v3559_v61, %v2156_v45  ;;  %v2166_v35 = vmul.f32 %v3560_v34, %v2156_v45  ;;  %v3576_v17 = vld [vmem:[%s5237_s5 + $0x60] sm:$0xff]  ;;  %v3578_v19 = vld [vmem:[%s5237_s5 + $0xd8] sm:$0xff]  ;;  %v3582_v23 = vld [vmem:[%s5237_s5 + $0xd0] sm:$0xff] }
 0x7b5   :  { %2230 = vmatpush1.msra.mxu1 %v2176_v33  ;;  %2313 = vmatpush1.msra.mxu0 %v2178_v26  ;;  %v3580_v21 = vld [vmem:[%s5237_s5 + $0x58] sm:$0xff]  ;;  %v3583_v24 = vld [vmem:[%s5237_s5 + $0x150] sm:$0xff]  ;;  %v3585_v26 = vld [vmem:[%s5237_s5 + $0x1c8] sm:$0xff] }
 0x7b6   :  { %2231 = vmatprep.subr.mxu1 %v2173_v28  ;;  %2314 = vmatprep.subr.mxu0 %v2175_v54  ;;  %v3584_v33 = vld [vmem:[%s5237_s5 + $0x50] sm:$0xff]  ;;  %v3586_v53 = vld [vmem:[%s5237_s5 + $0xc8] sm:$0xff]  ;;  %v3589_v54 = vld [vmem:[%s5237_s5 + $0x1c0] sm:$0xff] }
 0x7b7   :  { %2232 = vmatpush1.msra.mxu1 %v2172_v44  ;;  %2315 = vmatpush1.msra.mxu0 %v2174_v5  ;;  %v3587_v28 = vld [vmem:[%s5237_s5 + $0x148] sm:$0xff]  ;;  %v3590_v43 = vld [vmem:[%s5237_s5 + $0xc0] sm:$0xff]  ;;  %v3593_v5 = vld [vmem:[%s5237_s5 + $0x1b8] sm:$0xff] }
 0x7b8   :  { %v4920_v46 = vpop.eup %3473  ;;  %2233 = vmatprep.subr.mxu1 %v2169_v47  ;;  %2316 = vmatprep.subr.mxu0 %v2171_v48  ;;  %v3592_v44 = vld [vmem:[%s5237_s5 + $0x40] sm:$0xff]  ;;  %v3595_v45 = vld [vmem:[%s5237_s5 + $0x138] sm:$0xff]  ;;  %v3597_v39 = vld [vmem:[%s5237_s5 + $0x1b0] sm:$0xff] }
 0x7b9   :  { %3392 = vmatmul.mubr.msk.f32.gmra.mxu0 %vm184_vm3, %v4920_v46  ;;  %2234 = vmatpush1.msra.mxu1 %v2168_v37  ;;  %v3596_v7 = vld [vmem:[%s5237_s5 + $0x38] sm:$0xff]  ;;  %v3598_v48 = vld [vmem:[%s5237_s5 + $0xb0] sm:$0xff]  ;;  %v3601_v38 = vld [vmem:[%s5237_s5 + $0x1a8] sm:$0xff] }
 0x7ba   :  { %2317 = vmatpush1.msra.mxu0 %v2170_v41  ;;  %2235 = vmatprep.subr.mxu1 %v2165_v51  ;;  %v3599_v30 = vld [vmem:[%s5237_s5 + $0x130] sm:$0xff]  ;;  %v3602_v41 = vld [vmem:[%s5237_s5 + $0xa8] sm:$0xff]  ;;  %v3605_v59 = vld [vmem:[%s5237_s5 + $0x1a0] sm:$0xff] }
 0x7bb   :  { %2318 = vmatprep.subr.mxu0 %v2167_v62  ;;  %2236 = vmatpush1.msra.mxu1 %v2164_v52  ;;  %v3600_v37 = vld [vmem:[%s5237_s5 + $0x30] sm:$0xff]  ;;  %v3603_v49 = vld [vmem:[%s5237_s5 + $0x128] sm:$0xff]  ;;  %v3606_v52 = vld [vmem:[%s5237_s5 + $0xa0] sm:$0xff] }
 0x7bc   :  { %2319 = vmatpush1.msra.mxu0 %v2166_v35  ;;  %2352 = vmatprep.mubr.f32.mxu0 %v3626_v2  ;;  %v3604_v51 = vld [vmem:[%s5237_s5 + $0x28] sm:$0xff]  ;;  %v3607_v61 = vld [vmem:[%s5237_s5 + $0x120] sm:$0xff]  ;;  %v3609_v34 = vld [vmem:[%s5237_s5 + $0x198] sm:$0xff] }
 0x7bd   :  { %3079 = vmatprep.subr.mxu0 %v3561_v57  ;;  %3038 = vmatprep.subr.mxu1 %v3562_v0  ;;  %v3608_v62 = vld [vmem:[%s5237_s5 + $0x20] sm:$0xff]  ;;  %v3610_v35 = vld [vmem:[%s5237_s5 + $0x98] sm:$0xff] }
 0x7be   :  { %v3611_v57 = vld [vmem:[%s5237_s5 + $0x118] sm:$0xff] }
 0x7bf   :  { %v3612_v0 = vld [vmem:[%s5237_s5 + $0x18] sm:$0xff] }
 0x857   :  { %v2104_v1 = vpop.f32.mrf.mxu0 }
 0x858   :  { %3475 = vrcp.f32 %v2104_v1  ;;  %v3613_v1 = vld [vmem:[%s5237_s5 + $0x190] sm:$0xff] }
 0x859   :  { %v3387_v3 = vpop.f32.mrf.mxu0 }
 0x85a   :  { %v3614_v3 = vld [vmem:[%s5237_s5 + $0x90] sm:$0xff] }
 0x865   :  { %v3476_v4 = vpop.eup %3475 }
 0x866   :  { %v2121_v32 = vmul.f32 %v3476_v4, %v4804_v6  ;;  %v3564_v6 = vld [vmem:[%s5237_s5 + $0x78] sm:$0xff]  ;;  %v3615_v4 = vld [vmem:[%s5237_s5 + $0x110] sm:$0xff] }
 0x867   :  { %v2109_v8 = vpop.f32.mrf.mxu0 }
 0x868   :  { %3477 = vrcp.f32 %v2109_v8  ;;  %2814 = vmatmul.mubr.msk.f32.vlgmr.msra.gmra.mxu1 %vm184_vm3, %v2121_v32  ;;  %2817 = vmatmul.mubr.msk.f32.vlgmr.msra.gmra.mxu0 %vm184_vm3, %v2121_v32  ;;  %v3616_v32 = vld [vmem:[%s5237_s5 + $0x10] sm:$0xff]  ;;  %v3617_v8 = vld [vmem:[%s5237_s5 + $0x188] sm:$0xff] }
 0x869   :  { %v3390_v9 = vpop.f32.mrf.mxu0  ;;  %2275 = vmatprep.mubr.f32.mxu1 %v3626_v2  ;;  %2358 = vmatprep.mubr.f32.mxu0 %v3626_v2 }
 0x86a   :  { %3080 = vmatpush3.msra.mxu0 %v3563_v10  ;;  %3039 = vmatpush3.msra.mxu1 %v3564_v6  ;;  %v3618_v9 = vld [vmem:[%s5237_s5 + $0x88] sm:$0xff] }
 0x86b   :  { %3081 = vmatprep.subr.mxu0 %v3565_v60  ;;  %3040 = vmatprep.subr.mxu1 %v3566_v55  ;;  %v3619_v10 = vld [vmem:[%s5237_s5 + $0x108] sm:$0xff]  ;;  %v3621_v55 = vld [vmem:[%s5237_s5 + $0x180] sm:$0xff] }
 0x86c   :  { %3082 = vmatpush3.msra.mxu0 %v3567_v42  ;;  %3041 = vmatpush3.msra.mxu1 %v3568_v11  ;;  %v3620_v6 = vld [vmem:[%s5237_s5 + $0x8] sm:$0xff]  ;;  %v3622_v42 = vld [vmem:[%s5237_s5 + $0x80] sm:$0xff] }
 0x86d   :  { %3083 = vmatprep.subr.mxu0 %v3569_v58  ;;  %3042 = vmatprep.subr.mxu1 %v3570_v12  ;;  %v3623_v58 = vld [vmem:[%s5237_s5 + $0x100] sm:$0xff] }
 0x86e   :  { %3084 = vmatpush3.msra.mxu0 %v3571_v13  ;;  %3043 = vmatpush3.msra.mxu1 %v3572_v14  ;;  %v3624_v12 = vld [vmem:[%s5237_s5] sm:$0xff] }
 0x86f   :  { %3085 = vmatprep.subr.mxu0 %v3573_v15  ;;  %3044 = vmatprep.subr.mxu1 %v3574_v16 }
 0x870   :  { %3086 = vmatpush3.msra.mxu0 %v3575_v31  ;;  %3045 = vmatpush3.msra.mxu1 %v3576_v17 }
 0x871   :  { %3087 = vmatprep.subr.mxu0 %v3577_v18  ;;  %3046 = vmatprep.subr.mxu1 %v3578_v19 }
 0x872   :  { %3088 = vmatpush3.msra.mxu0 %v3579_v20  ;;  %3047 = vmatpush3.msra.mxu1 %v3580_v21 }
 0x873   :  { %3089 = vmatprep.subr.mxu0 %v3581_v22  ;;  %3048 = vmatprep.subr.mxu1 %v3582_v23 }
 0x874   :  { %3090 = vmatpush3.msra.mxu0 %v3583_v24  ;;  %3049 = vmatpush3.msra.mxu1 %v3584_v33 }
 0x875   :  { %v3478_v36 = vpop.eup %3477  ;;  %3091 = vmatprep.subr.mxu0 %v3585_v26  ;;  %3050 = vmatprep.subr.mxu1 %v3586_v53 }
 0x876   :  { %v2122_v63 = vmul.f32 %v3478_v36, %v4822_v56  ;;  %3092 = vmatpush3.msra.mxu0 %v3587_v28  ;;  %3051 = vmatpush3.msra.mxu1 %v3588_v40  ;;  %v3591_v56 = vld [vmem:[%s5237_s5 + $0x140] sm:$0xff] }
 0x877   :  { %3093 = vmatprep.subr.mxu0 %v3589_v54  ;;  %3052 = vmatprep.subr.mxu1 %v3590_v43 }
 0x878   :  { %2815 = vmatmul.mubr.msk.f32.gmra.mxu1 %vm184_vm3, %v2122_v63  ;;  %2818 = vmatmul.mubr.msk.f32.gmra.mxu0 %vm184_vm3, %v2122_v63 }
 0x879   :  { %2281 = vmatprep.mubr.f32.mxu1 %v3626_v2  ;;  %2364 = vmatprep.mubr.f32.mxu0 %v3626_v2  ;;  %v2114_v29 = vpop.f32.mrf.mxu0  ;;  %v3594_v2 = vld [vmem:[%s5237_s5 + $0xb8] sm:$0xff] }
 0x87a   :  { %3094 = vmatpush3.msra.mxu0 %v3591_v56  ;;  %3053 = vmatpush3.msra.mxu1 %v3592_v44  ;;  %3479 = vrcp.f32 %v2114_v29 }
 0x87b   :  { %3095 = vmatprep.subr.mxu0 %v3593_v5  ;;  %3054 = vmatprep.subr.mxu1 %v3594_v2  ;;  %v3393_v47 = vpop.f32.mrf.mxu0 }
 0x87c   :  { %3096 = vmatpush3.msra.mxu0 %v3595_v45  ;;  %3055 = vmatpush3.msra.mxu1 %v3596_v7 }
 0x87d   :  { %3097 = vmatprep.subr.mxu0 %v3597_v39  ;;  %3056 = vmatprep.subr.mxu1 %v3598_v48 }
 0x87e   :  { %3098 = vmatpush3.msra.mxu0 %v3599_v30  ;;  %3057 = vmatpush3.msra.mxu1 %v3600_v37 }
 0x87f   :  { %3099 = vmatprep.subr.mxu0 %v3601_v38  ;;  %3058 = vmatprep.subr.mxu1 %v3602_v41 }
 0x880   :  { %3100 = vmatpush3.msra.mxu0 %v3603_v49  ;;  %3059 = vmatpush3.msra.mxu1 %v3604_v51 }
 0x881   :  { %3101 = vmatprep.subr.mxu0 %v3605_v59  ;;  %3060 = vmatprep.subr.mxu1 %v3606_v52 }
 0x882   :  { %3102 = vmatpush3.msra.mxu0 %v3607_v61  ;;  %3061 = vmatpush3.msra.mxu1 %v3608_v62 }
 0x883   :  { %3103 = vmatprep.subr.mxu0 %v3609_v34  ;;  %3062 = vmatprep.subr.mxu1 %v3610_v35 }
 0x884   :  { %3104 = vmatpush3.msra.mxu0 %v3611_v57  ;;  %3063 = vmatpush3.msra.mxu1 %v3612_v0 }
 0x885   :  { %3105 = vmatprep.subr.mxu0 %v3613_v1  ;;  %3064 = vmatprep.subr.mxu1 %v3614_v3 }
 0x886   :  { %3106 = vmatpush3.msra.mxu0 %v3615_v4  ;;  %3065 = vmatpush3.msra.mxu1 %v3616_v32 }
 0x887   :  { %3107 = vmatprep.subr.mxu0 %v3617_v8  ;;  %3066 = vmatprep.subr.mxu1 %v3618_v9  ;;  %v3480_v60 = vpop.eup %3479 }
 0x888   :  { %3108 = vmatpush3.msra.mxu0 %v3619_v10  ;;  %3067 = vmatpush3.msra.mxu1 %v3620_v6  ;;  %v2123_v11 = vmul.f32 %v3480_v60, %v4920_v46 }
 0x889   :  { %3109 = vmatprep.subr.mxu0 %v3621_v55  ;;  %3068 = vmatprep.subr.mxu1 %v3622_v42 }
 0x88a   :  { %3110 = vmatpush3.msra.mxu0 %v3623_v58  ;;  %3069 = vmatpush3.msra.mxu1 %v3624_v12 }
 0x88b   :  { %2816 = vmatmul.mubr.msk.f32.gmra.mxu1 %vm184_vm3, %v2123_v11  ;;  %2819 = vmatmul.mubr.msk.f32.gmra.mxu0 %vm184_vm3, %v2123_v11 }
 0x928   :  { %v2271_v13 = vpop.f32.mrf.mxu1  ;;  %v2354_v14 = vpop.f32.mrf.mxu0 }
 0x929   :  { %2371 = vst.msk [vmem:[#allocation2 + $0x88] sm:$0xff] %vm184_vm3, %v2271_v13  ;;  %2407 = vst.msk [vmem:[#allocation2 + $0xcc] sm:$0xff] %vm184_vm3, %v2354_v14  ;;  %2377 = vrot.lane.b32.xlu0 %v2271_v13, %s3628_s17 }
 0x92a   :  { %v2273_v46 = vpop.f32.mrf.mxu1  ;;  %v2356_v15 = vpop.f32.mrf.mxu0 }
 0x92b   :  { %2389 = vst.msk [vmem:[#allocation2 + $0xaa] sm:$0xff] %vm184_vm3, %v2273_v46  ;;  %2425 = vst.msk [vmem:[#allocation2 + $0xee] sm:$0xff] %vm184_vm3, %v2356_v15 }
 0x92d   :  { %2413 = vrot.lane.b32.xlu0 %v2354_v14, %s3628_s17 }
 0x931   :  { %2395 = vrot.lane.b32.xlu0 %v2273_v46, %s3628_s17 }
 0x938   :  { %v2277_v16 = vpop.f32.mrf.mxu1  ;;  %v2360_v31 = vpop.f32.mrf.mxu0 }
 0x939   :  { %2372 = vst.msk [vmem:[#allocation2 + $0x90] sm:$0xff] %vm184_vm3, %v2277_v16  ;;  %2408 = vst.msk [vmem:[#allocation2 + $0xd4] sm:$0xff] %vm184_vm3, %v2360_v31  ;;  %2379 = vrot.lane.b32.xlu1 %v2277_v16, %s3628_s17 }
 0x93a   :  { %v2279_v17 = vpop.f32.mrf.mxu1  ;;  %v2362_v18 = vpop.f32.mrf.mxu0 }
 0x93b   :  { %2390 = vst.msk [vmem:[#allocation2 + $0xb2] sm:$0xff] %vm184_vm3, %v2279_v17  ;;  %2426 = vst.msk [vmem:[#allocation2 + $0xf6] sm:$0xff] %vm184_vm3, %v2362_v18 }
 0x93d   :  { %2415 = vrot.lane.b32.xlu1 %v2360_v31, %s3628_s17 }
 0x941   :  { %2397 = vrot.lane.b32.xlu1 %v2279_v17, %s3628_s17 }
 0x94b   :  { %v2283_v19 = vpop.f32.mrf.mxu1  ;;  %v2366_v20 = vpop.f32.mrf.mxu0 }
 0x94c   :  { %2373 = vst.msk [vmem:[#allocation2 + $0x98] sm:$0x1] %vm1112_vm15, %v2283_v19  ;;  %2409 = vst.msk [vmem:[#allocation2 + $0xdc] sm:$0x1] %vm1112_vm15, %v2366_v20  ;;  %2381 = vrot.lane.b32.xlu0 %v2283_v19, %s3628_s17 }
 0x94d   :  { %v2285_v21 = vpop.f32.mrf.mxu1  ;;  %v2368_v22 = vpop.f32.mrf.mxu0 }
 0x94e   :  { %2391 = vst.msk [vmem:[#allocation2 + $0xba] sm:$0x1] %vm1112_vm15, %v2285_v21  ;;  %2427 = vst.msk [vmem:[#allocation2 + $0xfe] sm:$0x1] %vm1112_vm15, %v2368_v22  ;;  %2399 = vrot.lane.b32.xlu1 %v2285_v21, %s3628_s17 }
 0x950   :  { %2431 = vrot.lane.b32.xlu0 %v2356_v15, %s3628_s17 }
 0x952   :  { %2433 = vrot.lane.b32.xlu1 %v2362_v18, %s3628_s17 }
 0x954   :  { %2417 = vrot.lane.b32.xlu0 %v2366_v20, %s3628_s17 }
 0x956   :  { %2435 = vrot.lane.b32.xlu1 %v2368_v22, %s3628_s17 }
 0x99b   :  { %v2378_v23 = vpop.permute.xlu0 %2377 }
 0x99c   :  { %2386 = vst.msk [vmem:[#allocation2 + $0x99] sm:$0xff] %vm184_vm3, %v2378_v23 }
 0x99f   :  { %v2414_v24 = vpop.permute.xlu0 %2413 }
 0x9a0   :  { %2422 = vst.msk [vmem:[#allocation2 + $0xdd] sm:$0xff] %vm184_vm3, %v2414_v24 }
 0x9a3   :  { %v2396_v33 = vpop.permute.xlu0 %2395  ;;  %v2444_v23 = vld [vmem:[#allocation2 + $0x88] ss:$8 sm:$0xf] }
 0x9a4   :  { %2404 = vst.msk [vmem:[#allocation2 + $0xbb] sm:$0xff] %vm184_vm3, %v2396_v33 }
 0x9ab   :  { %v2380_v36 = vpop.permute.xlu1 %2379  ;;  %v2465_v22 = vld [vmem:[#allocation2 + $0x8a] ss:$8 sm:$0xf0] }
 0x9ac   :  { %2387 = vst.msk [vmem:[#allocation2 + $0xa1] sm:$0xff] %vm184_vm3, %v2380_v36 }
 0x9af   :  { %v2416_v26 = vpop.permute.xlu1 %2415 }
 0x9b0   :  { %2423 = vst.msk [vmem:[#allocation2 + $0xe5] sm:$0xff] %vm184_vm3, %v2416_v26 }
 0x9b3   :  { %v2398_v53 = vpop.permute.xlu1 %2397  ;;  %v2494_v63 = vld [vmem:[#allocation2 + $0x8d] ss:$8 sm:$0xf]  ;;  %v2514_v28 = vld [vmem:[#allocation2 + $0x8f] ss:$8 sm:$0xf] }
 0x9b4   :  { %2405 = vst.msk [vmem:[#allocation2 + $0xc3] sm:$0xff] %vm184_vm3, %v2398_v53  ;;  %v2454_v47 = vld [vmem:[#allocation2 + $0x89] ss:$8 sm:$0xf] }
 0x9b5   :  { %v2474_v30 = vld [vmem:[#allocation2 + $0x8b] ss:$8 sm:$0xf]  ;;  %v2504_v13 = vld [vmem:[#allocation2 + $0x8e] ss:$8 sm:$0xf] }
 0x9b6   :  { %v2484_v14 = vld [vmem:[#allocation2 + $0x8c] ss:$8 sm:$0xf]  ;;  %v2464_v19 = vld [vmem:[#allocation2 + $0x8a] ss:$8 sm:$0xf] }
 0x9b7   :  { %v2498_v35 = vld [vmem:[#allocation2 + $0xcd] ss:$8 sm:$0xf]  ;;  %v2518_v57 = vld [vmem:[#allocation2 + $0xcf] ss:$8 sm:$0xf]  ;;  %v2466_v36 = vor.u32 %v2465_v22, %v2464_v19 }
 0x9b8   :  { %v2445_v20 = vld [vmem:[#allocation2 + $0x88] ss:$8 sm:$0xf0] }
 0x9b9   :  { %v2446_v26 = vor.u32 %v2445_v20, %v2444_v23 }
 0x9bb   :  { %v2495_v40 = vld [vmem:[#allocation2 + $0x8d] ss:$8 sm:$0xf0]  ;;  %v2515_v54 = vld [vmem:[#allocation2 + $0x8f] ss:$8 sm:$0xf0] }
 0x9bc   :  { %v2496_v43 = vor.u32 %v2495_v40, %v2494_v63  ;;  %v2516_v56 = vor.u32 %v2515_v54, %v2514_v28  ;;  %v2475_v7 = vld [vmem:[#allocation2 + $0x8b] ss:$8 sm:$0xf0]  ;;  %v2458_v51 = vld [vmem:[#allocation2 + $0xc9] ss:$8 sm:$0xf] }
 0x9bd   :  { %v2476_v38 = vor.u32 %v2475_v7, %v2474_v30  ;;  %v2505_v11 = vld [vmem:[#allocation2 + $0x8e] ss:$8 sm:$0xf0]  ;;  %v2485_v58 = vld [vmem:[#allocation2 + $0x8c] ss:$8 sm:$0xf0] }
 0x9be   :  { %v3427_v44 = vpack.i.bf16 %v2496_v43, %v2516_v56  ;;  %v2382_v29 = vpop.permute.xlu0 %2381  ;;  %v2506_v16 = vor.u32 %v2505_v11, %v2504_v13  ;;  %v2486_v31 = vor.u32 %v2485_v58, %v2484_v14  ;;  %v2468_v43 = vld [vmem:[#allocation2 + $0xca] ss:$8 sm:$0xf]  ;;  %v2448_v56 = vld [vmem:[#allocation2 + $0xc8] ss:$8 sm:$0xf] }
 0x9bf   :  { %2388 = vst.msk [vmem:[#allocation2 + $0xa9] sm:$0x1] %vm1112_vm15, %v2382_v29  ;;  %v2488_v30 = vld [vmem:[#allocation2 + $0xcc] ss:$8 sm:$0xf] }
 0x9c0   :  { %3428 = vrot.lane.b32.xlu1 %v3427_v44, %s3628_s17  ;;  %v2400_v5 = vpop.permute.xlu1 %2399  ;;  %v3625_v14 = vld [vmem:[%s5238_s6] ss:$0 sm:$0xff] }
 0x9c1   :  { %2406 = vst.msk [vmem:[#allocation2 + $0xcb] sm:$0x1] %vm1112_vm15, %v2400_v5 }
 0x9c2   :  { %v2432_v2 = vpop.permute.xlu0 %2431 }
 0x9c3   :  { %2440 = vst.msk [vmem:[#allocation2 + $0xff] sm:$0xff] %vm184_vm3, %v2432_v2 }
 0x9c4   :  { %v2434_v45 = vpop.permute.xlu1 %2433 }
 0x9c5   :  { %2441 = vst.msk [vmem:[#allocation2 + $0x107] sm:$0xff] %vm184_vm3, %v2434_v45 }
 0x9c6   :  { %v2418_v39 = vpop.permute.xlu0 %2417  ;;  %v2455_v48 = vld [vmem:[#allocation2 + $0x89] ss:$8 sm:$0xf0] }
 0x9c7   :  { %2424 = vst.msk [vmem:[#allocation2 + $0xed] sm:$0x1] %vm1112_vm15, %v2418_v39  ;;  %v2456_v37 = vor.u32 %v2455_v48, %v2454_v47  ;;  %v2508_v48 = vld [vmem:[#allocation2 + $0xce] ss:$8 sm:$0xf] }
 0x9c8   :  { %v2436_v41 = vpop.permute.xlu1 %2435  ;;  %v2478_v59 = vld [vmem:[#allocation2 + $0xcb] ss:$8 sm:$0xf] }
 0x9c9   :  { %2442 = vst.msk [vmem:[#allocation2 + $0x10f] sm:$0x1] %vm1112_vm15, %v2436_v41  ;;  %v3432_v49 = vpack.i.bf16 %v2456_v37, %v2476_v38 }
 0x9ca   :  { %v2459_v52 = vld [vmem:[#allocation2 + $0xc9] ss:$8 sm:$0xf0]  ;;  %v2479_v61 = vld [vmem:[#allocation2 + $0xcb] ss:$8 sm:$0xf0] }
 0x9cb   :  { %3433 = vrot.lane.b32.xlu0 %v3432_v49, %s3628_s17  ;;  %v2460_v62 = vor.u32 %v2459_v52, %v2458_v51  ;;  %v2480_v34 = vor.u32 %v2479_v61, %v2478_v59  ;;  %v2469_v53 = vld [vmem:[#allocation2 + $0xca] ss:$8 sm:$0xf0]  ;;  %v2449_v63 = vld [vmem:[#allocation2 + $0xc8] ss:$8 sm:$0xf0] }
 0x9cc   :  { %v2462_v1 = vld [vmem:[#allocation2 + $0x109] ss:$8 sm:$0x1]  ;;  %v2519_v3 = vld [vmem:[#allocation2 + $0xcf] ss:$8 sm:$0xf0]  ;;  %v2470_v5 = vor.u32 %v2469_v53, %v2468_v43  ;;  %v2450_v2 = vor.u32 %v2449_v63, %v2448_v56 }
 0x9cd   :  { %v3442_v0 = vpack.i.bf16 %v2460_v62, %v2480_v34  ;;  %v2482_v4 = vld [vmem:[#allocation2 + $0x10b] ss:$8 sm:$0x1]  ;;  %v2520_v9 = vor.u32 %v2519_v3, %v2518_v57  ;;  %v2502_v55 = vld [vmem:[#allocation2 + $0x10d] ss:$8 sm:$0x1] }
 0x9ce   :  { %v2499_v32 = vld [vmem:[#allocation2 + $0xcd] ss:$8 sm:$0xf0]  ;;  %v3447_v10 = vpack.i.bf16 %v2462_v1, %v2482_v4  ;;  %v2509_v45 = vld [vmem:[#allocation2 + $0xce] ss:$8 sm:$0xf0] }
 0x9cf   :  { %3443 = vrot.lane.b32.xlu0 %v3442_v0, %s3628_s17  ;;  %v2500_v8 = vor.u32 %v2499_v32, %v2498_v35  ;;  %v2489_v7 = vld [vmem:[#allocation2 + $0xcc] ss:$8 sm:$0xf0]  ;;  %v2510_v41 = vor.u32 %v2509_v45, %v2508_v48  ;;  %v2472_v62 = vld [vmem:[#allocation2 + $0x10a] ss:$8 sm:$0x1] }
 0x9d0   :  { %v2522_v60 = vld [vmem:[#allocation2 + $0x10f] ss:$8 sm:$0x1]  ;;  %v2490_v49 = vor.u32 %v2489_v7, %v2488_v30  ;;  %v2452_v34 = vld [vmem:[#allocation2 + $0x108] ss:$8 sm:$0x1] }
 0x9d1   :  { %v3437_v6 = vpack.i.bf16 %v2500_v8, %v2520_v9  ;;  %v3452_v42 = vpack.i.bf16 %v2502_v55, %v2522_v60  ;;  %v2512_v8 = vld [vmem:[#allocation2 + $0x10e] ss:$8 sm:$0x1]  ;;  %v2492_v9 = vld [vmem:[#allocation2 + $0x10c] ss:$8 sm:$0x1] }
 0x9d3   :  { %3448 = vrot.lane.b32.xlu0 %v3447_v10, %s3628_s17  ;;  %3438 = vrot.lane.b32.xlu1 %v3437_v6, %s3628_s17 }
 0x9d7   :  { %3453 = vrot.lane.b32.xlu1 %v3452_v42, %s3628_s17 }
 0xa32   :  { %v3429_v12 = vpop.permute.xlu1 %3428 }
 0xa33   :  { %v3431_v46 = vunpack.i.h.bf16 %v3429_v12  ;;  %v3430_v15 = vunpack.i.l.bf16 %v3429_v12 }
 0xa35   :  { %v2580_v17 = vsel %vm184_vm3, %v2506_v16, %v3430_v15  ;;  %v2577_v18 = vsel %vm184_vm3, %v2486_v31, %v3431_v46 }
 0xa36   :  { %2727 = vmatprep.mubr.f32.mxu0 %v2580_v17 }
 0xa37   :  { %2728 = vmatmul.mubr.f32.vlgmr.msra.gmra.mxu0 %v2577_v18 }
 0xa3d   :  { %v3434_v21 = vpop.permute.xlu0 %3433 }
 0xa3e   :  { %v3436_v24 = vunpack.i.h.bf16 %v3434_v21  ;;  %v3435_v33 = vunpack.i.l.bf16 %v3434_v21 }
 0xa40   :  { %v2574_v28 = vsel %vm184_vm3, %v2466_v36, %v3435_v33  ;;  %v2571_v40 = vsel %vm184_vm3, %v2446_v26, %v3436_v24 }
 0xa41   :  { %v3444_v54 = vpop.permute.xlu0 %3443  ;;  %2647 = vmatprep.mubr.f32.mxu1 %v2574_v28 }
 0xa42   :  { %v3446_v44 = vunpack.i.h.bf16 %v3444_v54  ;;  %v3445_v29 = vunpack.i.l.bf16 %v3444_v54  ;;  %2648 = vmatmul.mubr.f32.vlgmr.msra.gmra.mxu1 %v2571_v40 }
 0xa44   :  { %v2575_v47 = vsel %vm184_vm3, %v2470_v5, %v3445_v29  ;;  %v2572_v39 = vsel %vm184_vm3, %v2450_v2, %v3446_v44 }
 0xa45   :  { %v3449_v37 = vpop.permute.xlu0 %3448  ;;  %2652 = vmatprep.mubr.f32.mxu1 %v2575_v47  ;;  %v3439_v38 = vpop.permute.xlu1 %3438 }
 0xa46   :  { %v3451_v51 = vunpack.i.h.bf16 %v3449_v37  ;;  %v3450_v59 = vunpack.i.l.bf16 %v3449_v37  ;;  %v3441_v52 = vunpack.i.h.bf16 %v3439_v38  ;;  %v3440_v61 = vunpack.i.l.bf16 %v3439_v38  ;;  %2653 = vmatmul.mubr.f32.gmra.mxu1 %v2572_v39 }
 0xa48   :  { %v2576_v35 = vsel %vm184_vm3, %v2472_v62, %v3450_v59  ;;  %v2581_v57 = vsel %vm184_vm3, %v2510_v41, %v3440_v61  ;;  %v2573_v0 = vsel %vm184_vm3, %v2452_v34, %v3451_v51  ;;  %v2578_v1 = vsel %vm184_vm3, %v2490_v49, %v3441_v52 }
 0xa49   :  { %2657 = vmatprep.mubr.f32.mxu1 %v2576_v35  ;;  %v3454_v3 = vpop.permute.xlu1 %3453  ;;  %2732 = vmatprep.mubr.f32.mxu0 %v2581_v57 }
 0xa4a   :  { %v3456_v4 = vunpack.i.h.bf16 %v3454_v3  ;;  %v3455_v32 = vunpack.i.l.bf16 %v3454_v3  ;;  %2658 = vmatmul.mubr.f32.gmra.mxu1 %v2573_v0  ;;  %2733 = vmatmul.mubr.f32.gmra.mxu0 %v2578_v1 }
 0xa4c   :  { %v2582_v10 = vsel %vm184_vm3, %v2512_v8, %v3455_v32  ;;  %v2579_v6 = vsel %vm184_vm3, %v2492_v9, %v3456_v4 }
 0xa4d   :  { %2737 = vmatprep.mubr.f32.mxu0 %v2582_v10 }
 0xa4e   :  { %2738 = vmatmul.mubr.f32.gmra.mxu0 %v2579_v6 }
 0xaf7   :  { %v3111_v60 = vpop.f32.mrf.mxu0 }
 0xaf9   :  { %v3112_v42 = vpop.f32.mrf.mxu0 }
 0xafa   :  { %v3113_v13 = vadd.f32 %v3112_v42, %v3111_v60 }
 0xb02   :  { %v3070_v55 = vpop.f32.mrf.mxu1 }
 0xb04   :  { %v3071_v11 = vpop.f32.mrf.mxu1 }
 0xb05   :  { %v3072_v58 = vadd.f32 %v3071_v11, %v3070_v55 }
 0xb06   :  { %v3073_v12 = vpop.f32.mrf.mxu1 }
 0xb07   :  { %v2650_v46 = vadd.f32 %v3625_v14, %v3072_v58 }
 0xb08   :  { %v3074_v15 = vpop.f32.mrf.mxu1 }
 0xb09   :  { %v2730_v16 = vadd.f32 %v3113_v13, %v2650_v46  ;;  %v3075_v31 = vadd.f32 %v3074_v15, %v3073_v12 }
 0xb0a   :  { %v3076_v17 = vpop.f32.mrf.mxu1  ;;  %v3114_v18 = vpop.f32.mrf.mxu0 }
 0xb0b   :  { %2746 = vrot.lane.b32.xlu0 %v2730_v16, %s3628_s17  ;;  %v2655_v21 = vadd.f32 %v3625_v14, %v3075_v31 }
 0xb0c   :  { %v3077_v19 = vpop.f32.mrf.mxu1  ;;  %v3115_v20 = vpop.f32.mrf.mxu0 }
 0xb0d   :  { %v3078_v22 = vadd.f32 %v3077_v19, %v3076_v17  ;;  %v3116_v23 = vadd.f32 %v3115_v20, %v3114_v18 }
 0xb0e   :  { %v3117_v24 = vpop.f32.mrf.mxu0 }
 0xb0f   :  { %v2735_v33 = vadd.f32 %v3116_v23, %v2655_v21  ;;  %v2660_v26 = vadd.f32 %v3625_v14, %v3078_v22 }
 0xb10   :  { %v3118_v36 = vpop.f32.mrf.mxu0 }
 0xb11   :  { %v3119_v53 = vadd.f32 %v3118_v36, %v3117_v24  ;;  %2748 = vrot.lane.b32.xlu1 %v2735_v33, %s3628_s17 }
 0xb13   :  { %v2740_v63 = vadd.f32 %v3119_v53, %v2660_v26 }
 0xb15   :  { %2750 = vrot.lane.b32.xlu0 %v2740_v63, %s3628_s17 }
 0xb7d   :  { %v2747_v28 = vpop.permute.xlu0 %2746 }
 0xb7e   :  { %v2755_v40 = vsel %vm184_vm3, %v4631_v50, %v2747_v28 }
 0xb7f   :  { %2758 = vst [vmem:[%s5239_s10] sm:$0xff] %v2755_v40 }
 0xb83   :  { %v2749_v54 = vpop.permute.xlu1 %2748 }
 0xb84   :  { %v2756_v43 = vsel %vm184_vm3, %v4683_v25, %v2749_v54 }
 0xb85   :  { %2759 = vst [vmem:[%s5239_s10 + $0x8] sm:$0xff] %v2756_v43 }
 0xb87   :  { %v2751_v56 = vpop.permute.xlu0 %2750 }
 0xb88   :  { %v2757_v44 = vsel %vm184_vm3, %v4687_v27, %v2751_v56 }
 0xb89   :  { %2760 = vst [vmem:[%s5239_s10 + $0x10] sm:$0x1] %v2757_v44 }

</bundles_post_ra>
